<compile_context>
chip_gen: v7x
topology: tpu7x:2x2x1
jax: 0.10.0
libtpu: 0.0.40
codegen_flags: <defaults>
</compile_context>

<pallas_src>
import functools

import jax
import jax.numpy as jnp
from jax.experimental import pallas as pl
from jax.experimental.pallas import tpu as pltpu


LANE = 128  # lane width: classifier output is padded to this for dense stores
VMEM_SPEC = pl.BlockSpec(memory_space=pltpu.MemorySpace.VMEM)


# --------------------------------------------------------------------------
# Config
# --------------------------------------------------------------------------
class Config:
    vocab_size = 128
    hidden_size = 32
    num_hidden_layers = 2
    num_attention_heads = 4
    intermediate_size = 64
    max_position_embeddings = 16
    type_vocab_size = 2
    hidden_dropout_prob = 0.1
    num_labels = 2


# --------------------------------------------------------------------------
# Single fused kernel: emb-LN -> L x (attn + FFN) -> pooler -> classifier
# --------------------------------------------------------------------------
def _bert_kernel(
    # inputs
    x_ref, amask_ref, emb_g_ref, emb_b_ref,
    wqkv_ref, bqkv_ref, wo_ref, bo_ref, ln1_g_ref, ln1_b_ref,
    w1_ref, b1_ref, w2_ref, b2_ref, ln2_g_ref, ln2_b_ref,
    pool_w_ref, pool_b_ref, cls_w_ref, cls_b_ref,
    # outputs
    o_ref,
    # scratch
    h_ref, ctx_ref,
    *, num_layers, num_heads, B, S, H, eps,
):
    dh = H // num_heads
    scale = 1.0 / (dh ** 0.5)

    def ln(x, g, b):
        mu = jnp.mean(x, axis=-1, keepdims=True)
        xc = x - mu
        var = jnp.mean(xc * xc, axis=-1, keepdims=True)
        return xc * jax.lax.rsqrt(var + eps) * g + b

    def mm(a, w_bf16, bias_f32):
        # bf16 MXU operands, f32 accumulate, f32 epilogue
        return jnp.dot(a.astype(jnp.bfloat16), w_bf16,
                       preferred_element_type=jnp.float32) + bias_f32

    # ---- embeddings LayerNorm (embedding gather done in JAX glue) ----
    h_ref[...] = ln(x_ref[...], emb_g_ref[...], emb_b_ref[...])

    amask = amask_ref[...]  # (B, 1, S) additive mask, f32

    # ---- encoder layers ----
    # TODO(synk): for many layers switch to lax.fori_loop over the stacked
    # weights; with num_layers=2 a static unroll keeps all indexing static.
    for l in range(num_layers):
        h = h_ref[...]                                      # (B*S, H) f32

        # fused QKV projection: one (H, 3H) matmul instead of 3 small ones
        qkv = mm(h, wqkv_ref[l], bqkv_ref[l])               # (B*S, 3H) f32

        # per-head attention, written directly into the ctx slab (no JAX-side
        # transposes / HBM relayouts between kernels)
        for hh in range(num_heads):
            qh = qkv[:, hh * dh:(hh + 1) * dh].reshape(B, S, dh)
            kh = qkv[:, H + hh * dh:H + (hh + 1) * dh].reshape(B, S, dh)
            vh = qkv[:, 2 * H + hh * dh:2 * H + (hh + 1) * dh].reshape(B, S, dh)

            s = jnp.einsum("bqd,bkd->bqk",
                           qh.astype(jnp.bfloat16), kh.astype(jnp.bfloat16),
                           preferred_element_type=jnp.float32) * scale
            s = s + amask                                   # mask stays f32
            s = s - jnp.max(s, axis=-1, keepdims=True)
            p = jnp.exp(s)
            p = p * pl.reciprocal(jnp.sum(p, axis=-1, keepdims=True),
                                  approx=True)
            ctxh = jnp.einsum("bqk,bkd->bqd",
                              p.astype(jnp.bfloat16), vh.astype(jnp.bfloat16),
                              preferred_element_type=jnp.float32)
            ctx_ref[:, hh * dh:(hh + 1) * dh] = ctxh.reshape(B * S, dh)

        # attention output projection + residual + LN
        attn_out = mm(ctx_ref[...], wo_ref[l], bo_ref[l])
        h = ln(h + attn_out, ln1_g_ref[l], ln1_b_ref[l])

        # FFN (GELU tanh-approx; element-wise math in f32)
        y = mm(h, w1_ref[l], b1_ref[l])
        # TODO(synk): HF default hidden_act='gelu' is erf-based; tanh approx used.
        y = 0.5 * y * (1.0 + jnp.tanh(
            0.7978845608028654 * (y + 0.044715 * y * y * y)))
        ffn = mm(y, w2_ref[l], b2_ref[l])
        h_ref[...] = ln(h + ffn, ln2_g_ref[l], ln2_b_ref[l])

    # ---- pooler: tanh(W @ h[:, 0]) on the [CLS] token of each sequence ----
    h_final = h_ref[...]
    pooled_in = h_final.reshape(B, S, H)[:, 0, :]           # (B, H)
    pooled = jnp.tanh(mm(pooled_in, pool_w_ref[...], pool_b_ref[...]))

    # dropout(hidden_dropout_prob) is identity at inference (eval semantics)

    # ---- classifier: lane-dense (B, 128) output slab; sliced in wrapper ----
    o_ref[...] = mm(pooled, cls_w_ref[...], cls_b_ref[...])


# --------------------------------------------------------------------------
# Parameters (deterministic synthetic init, stacked per-layer weights)
# --------------------------------------------------------------------------
def init_params(key, cfg):
    H, I, L = cfg.hidden_size, cfg.intermediate_size, cfg.num_hidden_layers
    keys = iter(jax.random.split(key, 64))

    def nrm(shape, std=0.02, dtype=jnp.float32):
        return (jax.random.normal(next(keys), shape, jnp.float32) * std).astype(dtype)

    p = {
        "word_emb": nrm((cfg.vocab_size, H)),
        "pos_emb": nrm((cfg.max_position_embeddings, H)),
        "type_emb": nrm((cfg.type_vocab_size, H)),
        "emb_ln_g": jnp.ones((1, H), jnp.float32),
        "emb_ln_b": jnp.zeros((1, H), jnp.float32),
        # per-layer weights stacked on a leading (L, ...) axis; matmul weights
        # are stored in bf16 (MXU-native), biases / LN params stay f32.
        "wqkv": nrm((L, H, 3 * H), dtype=jnp.bfloat16),      # fused Q|K|V
        "bqkv": jnp.zeros((L, 1, 3 * H), jnp.float32),
        "wo": nrm((L, H, H), dtype=jnp.bfloat16),
        "bo": jnp.zeros((L, 1, H), jnp.float32),
        "ln1_g": jnp.ones((L, 1, H), jnp.float32),
        "ln1_b": jnp.zeros((L, 1, H), jnp.float32),
        "w1": nrm((L, H, I), dtype=jnp.bfloat16),
        "b1": jnp.zeros((L, 1, I), jnp.float32),
        "w2": nrm((L, I, H), dtype=jnp.bfloat16),
        "b2": jnp.zeros((L, 1, H), jnp.float32),
        "ln2_g": jnp.ones((L, 1, H), jnp.float32),
        "ln2_b": jnp.zeros((L, 1, H), jnp.float32),
        "pool_w": nrm((H, H), dtype=jnp.bfloat16),
        "pool_b": jnp.zeros((1, H), jnp.float32),
    }
    # classifier: nn.init.xavier_normal_ (std = sqrt(2/(fan_in+fan_out)))
    xav_std = (2.0 / (H + cfg.num_labels)) ** 0.5
    cls_w = jax.random.normal(next(keys), (H, cfg.num_labels), jnp.float32) * xav_std
    # pad to lane-dense 128 output columns (zeros beyond num_labels)
    cls_w_pad = jnp.zeros((H, LANE), jnp.float32).at[:, :cfg.num_labels].set(cls_w)
    p["cls_w"] = cls_w_pad.astype(jnp.bfloat16)
    p["cls_b"] = jnp.zeros((1, LANE), jnp.float32)
    return p


# --------------------------------------------------------------------------
# Forward pass: embedding gather in JAX glue, everything else in one kernel
# --------------------------------------------------------------------------
def bert_for_sequence_classification(params, cfg, input_ids, token_type_ids,
                                     attention_mask):
    B, S = input_ids.shape
    H = cfg.hidden_size

    # ---- embeddings (gather is a one-off; LayerNorm happens in the kernel) ----
    pos = jnp.arange(S)
    x = (params["word_emb"][input_ids]
         + params["pos_emb"][pos][None, :, :]
         + params["type_emb"][token_type_ids]).astype(jnp.float32)
    x = x.reshape(B * S, H)

    # additive attention mask, (B, 1, S), kept in f32 (do NOT cast to bf16)
    amask = ((1.0 - attention_mask.astype(jnp.float32)) * -1e9)[:, None, :]

    kernel = functools.partial(
        _bert_kernel,
        num_layers=cfg.num_hidden_layers,
        num_heads=cfg.num_attention_heads,
        B=B, S=S, H=H, eps=1e-12,
    )

    logits_padded = pl.pallas_call(
        kernel,
        out_shape=jax.ShapeDtypeStruct((B, LANE), jnp.float32),
        in_specs=[VMEM_SPEC] * 20,
        out_specs=VMEM_SPEC,
        scratch_shapes=[
            pltpu.VMEM((B * S, H), jnp.float32),   # hidden-state slab
            pltpu.VMEM((B * S, H), jnp.float32),   # attention context slab
        ],
    )(
        x, amask, params["emb_ln_g"], params["emb_ln_b"],
        params["wqkv"], params["bqkv"], params["wo"], params["bo"],
        params["ln1_g"], params["ln1_b"],
        params["w1"], params["b1"], params["w2"], params["b2"],
        params["ln2_g"], params["ln2_b"],
        params["pool_w"], params["pool_b"], params["cls_w"], params["cls_b"],
    )
    return logits_padded[:, :cfg.num_labels]


# --------------------------------------------------------------------------
if __name__ == "__main__":
    cfg = Config()
    key = jax.random.PRNGKey(0)
    k_param, k_ids, k_type = jax.random.split(key, 3)

    B, S = 2, 8
    params = init_params(k_param, cfg)
    input_ids = jax.random.randint(k_ids, (B, S), 0, cfg.vocab_size, dtype=jnp.int32)
    token_type_ids = jnp.zeros((B, S), dtype=jnp.int32)
    attention_mask = jnp.ones((B, S), dtype=jnp.int32).at[1, 6:].set(0)  # padding

    logits = bert_for_sequence_classification(
        params, cfg, input_ids, token_type_ids, attention_mask)
    logits = jax.block_until_ready(logits)
    assert logits.shape == (B, cfg.num_labels) and logits.dtype == jnp.float32
    assert bool(jnp.all(jnp.isfinite(logits)))
    print("KERNEL_OK")
</pallas_src>

<mosaic_0001>
module attributes {stable_mosaic.version = 11 : i64} {
  func.func @_bert_kernel(%arg0: memref<16x32xf32, #tpu.memory_space<vmem>>, %arg1: memref<2x1x8xf32, #tpu.memory_space<vmem>>, %arg2: memref<1x32xf32, #tpu.memory_space<vmem>>, %arg3: memref<1x32xf32, #tpu.memory_space<vmem>>, %arg4: memref<2x32x96xbf16, #tpu.memory_space<vmem>>, %arg5: memref<2x1x96xf32, #tpu.memory_space<vmem>>, %arg6: memref<2x32x32xbf16, #tpu.memory_space<vmem>>, %arg7: memref<2x1x32xf32, #tpu.memory_space<vmem>>, %arg8: memref<2x1x32xf32, #tpu.memory_space<vmem>>, %arg9: memref<2x1x32xf32, #tpu.memory_space<vmem>>, %arg10: memref<2x32x64xbf16, #tpu.memory_space<vmem>>, %arg11: memref<2x1x64xf32, #tpu.memory_space<vmem>>, %arg12: memref<2x64x32xbf16, #tpu.memory_space<vmem>>, %arg13: memref<2x1x32xf32, #tpu.memory_space<vmem>>, %arg14: memref<2x1x32xf32, #tpu.memory_space<vmem>>, %arg15: memref<2x1x32xf32, #tpu.memory_space<vmem>>, %arg16: memref<32x32xbf16, #tpu.memory_space<vmem>>, %arg17: memref<1x32xf32, #tpu.memory_space<vmem>>, %arg18: memref<32x128xbf16, #tpu.memory_space<vmem>>, %arg19: memref<1x128xf32, #tpu.memory_space<vmem>>, %arg20: memref<2x128xf32, #tpu.memory_space<vmem>>, %arg21: memref<16x32xf32, #tpu.memory_space<vmem>>, %arg22: memref<16x32xf32, #tpu.memory_space<vmem>>) attributes {dimension_semantics = [], scalar_prefetch = 0 : i64, scratch_operands = 2 : i64, tpu.core_type = #tpu.core_type<tc>} {
    %c0 = arith.constant 0 : index
    %c0_0 = arith.constant 0 : index
    %0 = vector.load %arg0[%c0, %c0_0] : memref<16x32xf32, #tpu.memory_space<vmem>>, vector<16x32xf32>
    %c0_1 = arith.constant 0 : index
    %c0_2 = arith.constant 0 : index
    %1 = vector.load %arg2[%c0_1, %c0_2] : memref<1x32xf32, #tpu.memory_space<vmem>>, vector<1x32xf32>
    %c0_3 = arith.constant 0 : index
    %c0_4 = arith.constant 0 : index
    %2 = vector.load %arg3[%c0_3, %c0_4] : memref<1x32xf32, #tpu.memory_space<vmem>>, vector<1x32xf32>
    %cst = arith.constant dense<0.000000e+00> : vector<16xf32>
    %3 = vector.multi_reduction <add>, %0, %cst [1] : vector<16x32xf32> to vector<16xf32>
    %4 = vector.shape_cast %3 : vector<16xf32> to vector<16x1xf32>
    %cst_5 = arith.constant 3.200000e+01 : f32
    %5 = vector.broadcast %cst_5 : f32 to vector<16x1xf32>
    %6 = arith.divf %4, %5 : vector<16x1xf32>
    %7 = vector.broadcast %6 : vector<16x1xf32> to vector<16x32xf32>
    %8 = arith.subf %0, %7 : vector<16x32xf32>
    %9 = arith.mulf %8, %8 : vector<16x32xf32>
    %cst_6 = arith.constant dense<0.000000e+00> : vector<16xf32>
    %10 = vector.multi_reduction <add>, %9, %cst_6 [1] : vector<16x32xf32> to vector<16xf32>
    %11 = vector.shape_cast %10 : vector<16xf32> to vector<16x1xf32>
    %cst_7 = arith.constant 3.200000e+01 : f32
    %12 = vector.broadcast %cst_7 : f32 to vector<16x1xf32>
    %13 = arith.divf %11, %12 : vector<16x1xf32>
    %cst_8 = arith.constant 9.99999996E-13 : f32
    %14 = vector.broadcast %cst_8 : f32 to vector<16x1xf32>
    %15 = arith.addf %13, %14 : vector<16x1xf32>
    %16 = math.rsqrt %15 : vector<16x1xf32>
    %17 = vector.broadcast %16 : vector<16x1xf32> to vector<16x32xf32>
    %18 = arith.mulf %8, %17 : vector<16x32xf32>
    %19 = vector.broadcast %1 : vector<1x32xf32> to vector<16x32xf32>
    %20 = arith.mulf %18, %19 : vector<16x32xf32>
    %21 = vector.broadcast %2 : vector<1x32xf32> to vector<16x32xf32>
    %22 = arith.addf %20, %21 : vector<16x32xf32>
    %c0_9 = arith.constant 0 : index
    %c0_10 = arith.constant 0 : index
    %23 = vector.load %arg21[%c0_9, %c0_10] : memref<16x32xf32, #tpu.memory_space<vmem>>, vector<16x32xf32>
    tpu.vector_store %arg21[%c0_9, %c0_10], %22 {strides = array<i32>} : memref<16x32xf32, #tpu.memory_space<vmem>>, vector<16x32xf32>,
    %c0_11 = arith.constant 0 : index
    %c0_12 = arith.constant 0 : index
    %c0_13 = arith.constant 0 : index
    %24 = vector.load %arg1[%c0_11, %c0_12, %c0_13] : memref<2x1x8xf32, #tpu.memory_space<vmem>>, vector<2x1x8xf32>
    %c0_14 = arith.constant 0 : index
    %c0_15 = arith.constant 0 : index
    %25 = vector.load %arg21[%c0_14, %c0_15] : memref<16x32xf32, #tpu.memory_space<vmem>>, vector<16x32xf32>
    %c0_16 = arith.constant 0 : index
    %c0_17 = arith.constant 0 : index
    %c0_18 = arith.constant 0 : index
    %26 = vector.load %arg4[%c0_16, %c0_17, %c0_18] : memref<2x32x96xbf16, #tpu.memory_space<vmem>>, vector<1x32x96xbf16>
    %27 = vector.shape_cast %26 : vector<1x32x96xbf16> to vector<32x96xbf16>
    %c0_19 = arith.constant 0 : index
    %c0_20 = arith.constant 0 : index
    %c0_21 = arith.constant 0 : index
    %28 = vector.load %arg5[%c0_19, %c0_20, %c0_21] : memref<2x1x96xf32, #tpu.memory_space<vmem>>, vector<1x1x96xf32>
    %29 = vector.shape_cast %28 : vector<1x1x96xf32> to vector<1x96xf32>
    %30 = arith.truncf %25 : vector<16x32xf32> to vector<16x32xbf16>
    %cst_22 = arith.constant dense<0.000000e+00> : vector<16x96xf32>
    %31 = tpu.matmul %30, %27, %cst_22 {dimension_numbers = #tpu.dot_dimension_numbers<[1], [0], [0], [1], [0, 0, 1, 1], [], []>} : vector<16x32xbf16>, vector<32x96xbf16>, vector<16x96xf32> -> vector<16x96xf32>
    %32 = vector.broadcast %29 : vector<1x96xf32> to vector<16x96xf32>
    %33 = arith.addf %31, %32 : vector<16x96xf32>
    %34 = vector.extract_strided_slice %33 {offsets = [0, 0], sizes = [16, 8], strides = [1, 1]} : vector<16x96xf32> to vector<16x8xf32>
    %35 = vector.shape_cast %34 : vector<16x8xf32> to vector<2x8x8xf32>
    %36 = vector.extract_strided_slice %33 {offsets = [0, 32], sizes = [16, 8], strides = [1, 1]} : vector<16x96xf32> to vector<16x8xf32>
    %37 = vector.shape_cast %36 : vector<16x8xf32> to vector<2x8x8xf32>
    %38 = vector.extract_strided_slice %33 {offsets = [0, 64], sizes = [16, 8], strides = [1, 1]} : vector<16x96xf32> to vector<16x8xf32>
    %39 = vector.shape_cast %38 : vector<16x8xf32> to vector<2x8x8xf32>
    %40 = arith.truncf %35 : vector<2x8x8xf32> to vector<2x8x8xbf16>
    %41 = arith.truncf %37 : vector<2x8x8xf32> to vector<2x8x8xbf16>
    "tpu.trace_start"() <{level = 10 : i32, message = "bqd,bkd->bqk"}> : () -> ()
    %cst_23 = arith.constant dense<0.000000e+00> : vector<2x8x8xf32>
    %42 = tpu.matmul %40, %41, %cst_23 {dimension_numbers = #tpu.dot_dimension_numbers<[2], [2], [1], [1], [0, 0, 0, 1, 1, 1], [0], [0]>} : vector<2x8x8xbf16>, vector<2x8x8xbf16>, vector<2x8x8xf32> -> vector<2x8x8xf32>
    "tpu.trace_stop"() : () -> ()
    %cst_24 = arith.constant 0.353553385 : f32
    %43 = vector.broadcast %cst_24 : f32 to vector<2x8x8xf32>
    %44 = arith.mulf %42, %43 : vector<2x8x8xf32>
    %45 = vector.broadcast %24 : vector<2x1x8xf32> to vector<2x8x8xf32>
    %46 = arith.addf %44, %45 : vector<2x8x8xf32>
    %cst_25 = arith.constant dense<0xFF800000> : vector<2x8xf32>
    %47 = vector.multi_reduction <maximumf>, %46, %cst_25 [2] : vector<2x8x8xf32> to vector<2x8xf32>
    %48 = vector.shape_cast %47 : vector<2x8xf32> to vector<2x8x1xf32>
    %49 = vector.broadcast %48 : vector<2x8x1xf32> to vector<2x8x8xf32>
    %50 = arith.subf %46, %49 : vector<2x8x8xf32>
    %51 = math.exp %50 : vector<2x8x8xf32>
    %cst_26 = arith.constant dense<0.000000e+00> : vector<2x8xf32>
    %52 = vector.multi_reduction <add>, %51, %cst_26 [2] : vector<2x8x8xf32> to vector<2x8xf32>
    %53 = vector.shape_cast %52 : vector<2x8xf32> to vector<2x8x1xf32>
    %54 = tpu.reciprocal %53 {approx = true} : vector<2x8x1xf32> -> vector<2x8x1xf32>
    %55 = vector.broadcast %54 : vector<2x8x1xf32> to vector<2x8x8xf32>
    %56 = arith.mulf %51, %55 : vector<2x8x8xf32>
    %57 = arith.truncf %56 : vector<2x8x8xf32> to vector<2x8x8xbf16>
    %58 = arith.truncf %39 : vector<2x8x8xf32> to vector<2x8x8xbf16>
    "tpu.trace_start"() <{level = 10 : i32, message = "bqk,bkd->bqd"}> : () -> ()
    %cst_27 = arith.constant dense<0.000000e+00> : vector<2x8x8xf32>
    %59 = tpu.matmul %57, %58, %cst_27 {dimension_numbers = #tpu.dot_dimension_numbers<[2], [1], [1], [2], [0, 0, 0, 1, 1, 2], [0], [0]>} : vector<2x8x8xbf16>, vector<2x8x8xbf16>, vector<2x8x8xf32> -> vector<2x8x8xf32>
    "tpu.trace_stop"() : () -> ()
    %60 = vector.shape_cast %59 : vector<2x8x8xf32> to vector<16x8xf32>
    %c0_28 = arith.constant 0 : index
    %c0_29 = arith.constant 0 : index
    %61 = vector.load %arg22[%c0_28, %c0_29] : memref<16x32xf32, #tpu.memory_space<vmem>>, vector<16x8xf32>
    tpu.vector_store %arg22[%c0_28, %c0_29], %60 {strides = array<i32>} : memref<16x32xf32, #tpu.memory_space<vmem>>, vector<16x8xf32>,
    %62 = vector.extract_strided_slice %33 {offsets = [0, 8], sizes = [16, 8], strides = [1, 1]} : vector<16x96xf32> to vector<16x8xf32>
    %63 = vector.shape_cast %62 : vector<16x8xf32> to vector<2x8x8xf32>
    %64 = vector.extract_strided_slice %33 {offsets = [0, 40], sizes = [16, 8], strides = [1, 1]} : vector<16x96xf32> to vector<16x8xf32>
    %65 = vector.shape_cast %64 : vector<16x8xf32> to vector<2x8x8xf32>
    %66 = vector.extract_strided_slice %33 {offsets = [0, 72], sizes = [16, 8], strides = [1, 1]} : vector<16x96xf32> to vector<16x8xf32>
    %67 = vector.shape_cast %66 : vector<16x8xf32> to vector<2x8x8xf32>
    %68 = arith.truncf %63 : vector<2x8x8xf32> to vector<2x8x8xbf16>
    %69 = arith.truncf %65 : vector<2x8x8xf32> to vector<2x8x8xbf16>
    "tpu.trace_start"() <{level = 10 : i32, message = "bqd,bkd->bqk"}> : () -> ()
    %cst_30 = arith.constant dense<0.000000e+00> : vector<2x8x8xf32>
    %70 = tpu.matmul %68, %69, %cst_30 {dimension_numbers = #tpu.dot_dimension_numbers<[2], [2], [1], [1], [0, 0, 0, 1, 1, 1], [0], [0]>} : vector<2x8x8xbf16>, vector<2x8x8xbf16>, vector<2x8x8xf32> -> vector<2x8x8xf32>
    "tpu.trace_stop"() : () -> ()
    %cst_31 = arith.constant 0.353553385 : f32
    %71 = vector.broadcast %cst_31 : f32 to vector<2x8x8xf32>
    %72 = arith.mulf %70, %71 : vector<2x8x8xf32>
    %73 = vector.broadcast %24 : vector<2x1x8xf32> to vector<2x8x8xf32>
    %74 = arith.addf %72, %73 : vector<2x8x8xf32>
    %cst_32 = arith.constant dense<0xFF800000> : vector<2x8xf32>
    %75 = vector.multi_reduction <maximumf>, %74, %cst_32 [2] : vector<2x8x8xf32> to vector<2x8xf32>
    %76 = vector.shape_cast %75 : vector<2x8xf32> to vector<2x8x1xf32>
    %77 = vector.broadcast %76 : vector<2x8x1xf32> to vector<2x8x8xf32>
    %78 = arith.subf %74, %77 : vector<2x8x8xf32>
    %79 = math.exp %78 : vector<2x8x8xf32>
    %cst_33 = arith.constant dense<0.000000e+00> : vector<2x8xf32>
    %80 = vector.multi_reduction <add>, %79, %cst_33 [2] : vector<2x8x8xf32> to vector<2x8xf32>
    %81 = vector.shape_cast %80 : vector<2x8xf32> to vector<2x8x1xf32>
    %82 = tpu.reciprocal %81 {approx = true} : vector<2x8x1xf32> -> vector<2x8x1xf32>
    %83 = vector.broadcast %82 : vector<2x8x1xf32> to vector<2x8x8xf32>
    %84 = arith.mulf %79, %83 : vector<2x8x8xf32>
    %85 = arith.truncf %84 : vector<2x8x8xf32> to vector<2x8x8xbf16>
    %86 = arith.truncf %67 : vector<2x8x8xf32> to vector<2x8x8xbf16>
    "tpu.trace_start"() <{level = 10 : i32, message = "bqk,bkd->bqd"}> : () -> ()
    %cst_34 = arith.constant dense<0.000000e+00> : vector<2x8x8xf32>
    %87 = tpu.matmul %85, %86, %cst_34 {dimension_numbers = #tpu.dot_dimension_numbers<[2], [1], [1], [2], [0, 0, 0, 1, 1, 2], [0], [0]>} : vector<2x8x8xbf16>, vector<2x8x8xbf16>, vector<2x8x8xf32> -> vector<2x8x8xf32>
    "tpu.trace_stop"() : () -> ()
    %88 = vector.shape_cast %87 : vector<2x8x8xf32> to vector<16x8xf32>
    %c0_35 = arith.constant 0 : index
    %c8 = arith.constant 8 : index
    %89 = vector.load %arg22[%c0_35, %c8] : memref<16x32xf32, #tpu.memory_space<vmem>>, vector<16x8xf32>
    tpu.vector_store %arg22[%c0_35, %c8], %88 {strides = array<i32>} : memref<16x32xf32, #tpu.memory_space<vmem>>, vector<16x8xf32>,
    %90 = vector.extract_strided_slice %33 {offsets = [0, 16], sizes = [16, 8], strides = [1, 1]} : vector<16x96xf32> to vector<16x8xf32>
    %91 = vector.shape_cast %90 : vector<16x8xf32> to vector<2x8x8xf32>
    %92 = vector.extract_strided_slice %33 {offsets = [0, 48], sizes = [16, 8], strides = [1, 1]} : vector<16x96xf32> to vector<16x8xf32>
    %93 = vector.shape_cast %92 : vector<16x8xf32> to vector<2x8x8xf32>
    %94 = vector.extract_strided_slice %33 {offsets = [0, 80], sizes = [16, 8], strides = [1, 1]} : vector<16x96xf32> to vector<16x8xf32>
    %95 = vector.shape_cast %94 : vector<16x8xf32> to vector<2x8x8xf32>
    %96 = arith.truncf %91 : vector<2x8x8xf32> to vector<2x8x8xbf16>
    %97 = arith.truncf %93 : vector<2x8x8xf32> to vector<2x8x8xbf16>
    "tpu.trace_start"() <{level = 10 : i32, message = "bqd,bkd->bqk"}> : () -> ()
    %cst_36 = arith.constant dense<0.000000e+00> : vector<2x8x8xf32>
    %98 = tpu.matmul %96, %97, %cst_36 {dimension_numbers = #tpu.dot_dimension_numbers<[2], [2], [1], [1], [0, 0, 0, 1, 1, 1], [0], [0]>} : vector<2x8x8xbf16>, vector<2x8x8xbf16>, vector<2x8x8xf32> -> vector<2x8x8xf32>
    "tpu.trace_stop"() : () -> ()
    %cst_37 = arith.constant 0.353553385 : f32
    %99 = vector.broadcast %cst_37 : f32 to vector<2x8x8xf32>
    %100 = arith.mulf %98, %99 : vector<2x8x8xf32>
    %101 = vector.broadcast %24 : vector<2x1x8xf32> to vector<2x8x8xf32>
    %102 = arith.addf %100, %101 : vector<2x8x8xf32>
    %cst_38 = arith.constant dense<0xFF800000> : vector<2x8xf32>
    %103 = vector.multi_reduction <maximumf>, %102, %cst_38 [2] : vector<2x8x8xf32> to vector<2x8xf32>
    %104 = vector.shape_cast %103 : vector<2x8xf32> to vector<2x8x1xf32>
    %105 = vector.broadcast %104 : vector<2x8x1xf32> to vector<2x8x8xf32>
    %106 = arith.subf %102, %105 : vector<2x8x8xf32>
    %107 = math.exp %106 : vector<2x8x8xf32>
    %cst_39 = arith.constant dense<0.000000e+00> : vector<2x8xf32>
    %108 = vector.multi_reduction <add>, %107, %cst_39 [2] : vector<2x8x8xf32> to vector<2x8xf32>
    %109 = vector.shape_cast %108 : vector<2x8xf32> to vector<2x8x1xf32>
    %110 = tpu.reciprocal %109 {approx = true} : vector<2x8x1xf32> -> vector<2x8x1xf32>
    %111 = vector.broadcast %110 : vector<2x8x1xf32> to vector<2x8x8xf32>
    %112 = arith.mulf %107, %111 : vector<2x8x8xf32>
    %113 = arith.truncf %112 : vector<2x8x8xf32> to vector<2x8x8xbf16>
    %114 = arith.truncf %95 : vector<2x8x8xf32> to vector<2x8x8xbf16>
    "tpu.trace_start"() <{level = 10 : i32, message = "bqk,bkd->bqd"}> : () -> ()
    %cst_40 = arith.constant dense<0.000000e+00> : vector<2x8x8xf32>
    %115 = tpu.matmul %113, %114, %cst_40 {dimension_numbers = #tpu.dot_dimension_numbers<[2], [1], [1], [2], [0, 0, 0, 1, 1, 2], [0], [0]>} : vector<2x8x8xbf16>, vector<2x8x8xbf16>, vector<2x8x8xf32> -> vector<2x8x8xf32>
    "tpu.trace_stop"() : () -> ()
    %116 = vector.shape_cast %115 : vector<2x8x8xf32> to vector<16x8xf32>
    %c0_41 = arith.constant 0 : index
    %c16 = arith.constant 16 : index
    %117 = vector.load %arg22[%c0_41, %c16] : memref<16x32xf32, #tpu.memory_space<vmem>>, vector<16x8xf32>
    tpu.vector_store %arg22[%c0_41, %c16], %116 {strides = array<i32>} : memref<16x32xf32, #tpu.memory_space<vmem>>, vector<16x8xf32>,
    %118 = vector.extract_strided_slice %33 {offsets = [0, 24], sizes = [16, 8], strides = [1, 1]} : vector<16x96xf32> to vector<16x8xf32>
    %119 = vector.shape_cast %118 : vector<16x8xf32> to vector<2x8x8xf32>
    %120 = vector.extract_strided_slice %33 {offsets = [0, 56], sizes = [16, 8], strides = [1, 1]} : vector<16x96xf32> to vector<16x8xf32>
    %121 = vector.shape_cast %120 : vector<16x8xf32> to vector<2x8x8xf32>
    %122 = vector.extract_strided_slice %33 {offsets = [0, 88], sizes = [16, 8], strides = [1, 1]} : vector<16x96xf32> to vector<16x8xf32>
    %123 = vector.shape_cast %122 : vector<16x8xf32> to vector<2x8x8xf32>
    %124 = arith.truncf %119 : vector<2x8x8xf32> to vector<2x8x8xbf16>
    %125 = arith.truncf %121 : vector<2x8x8xf32> to vector<2x8x8xbf16>
    "tpu.trace_start"() <{level = 10 : i32, message = "bqd,bkd->bqk"}> : () -> ()
    %cst_42 = arith.constant dense<0.000000e+00> : vector<2x8x8xf32>
    %126 = tpu.matmul %124, %125, %cst_42 {dimension_numbers = #tpu.dot_dimension_numbers<[2], [2], [1], [1], [0, 0, 0, 1, 1, 1], [0], [0]>} : vector<2x8x8xbf16>, vector<2x8x8xbf16>, vector<2x8x8xf32> -> vector<2x8x8xf32>
    "tpu.trace_stop"() : () -> ()
    %cst_43 = arith.constant 0.353553385 : f32
    %127 = vector.broadcast %cst_43 : f32 to vector<2x8x8xf32>
    %128 = arith.mulf %126, %127 : vector<2x8x8xf32>
    %129 = vector.broadcast %24 : vector<2x1x8xf32> to vector<2x8x8xf32>
    %130 = arith.addf %128, %129 : vector<2x8x8xf32>
    %cst_44 = arith.constant dense<0xFF800000> : vector<2x8xf32>
    %131 = vector.multi_reduction <maximumf>, %130, %cst_44 [2] : vector<2x8x8xf32> to vector<2x8xf32>
    %132 = vector.shape_cast %131 : vector<2x8xf32> to vector<2x8x1xf32>
    %133 = vector.broadcast %132 : vector<2x8x1xf32> to vector<2x8x8xf32>
    %134 = arith.subf %130, %133 : vector<2x8x8xf32>
    %135 = math.exp %134 : vector<2x8x8xf32>
    %cst_45 = arith.constant dense<0.000000e+00> : vector<2x8xf32>
    %136 = vector.multi_reduction <add>, %135, %cst_45 [2] : vector<2x8x8xf32> to vector<2x8xf32>
    %137 = vector.shape_cast %136 : vector<2x8xf32> to vector<2x8x1xf32>
    %138 = tpu.reciprocal %137 {approx = true} : vector<2x8x1xf32> -> vector<2x8x1xf32>
    %139 = vector.broadcast %138 : vector<2x8x1xf32> to vector<2x8x8xf32>
    %140 = arith.mulf %135, %139 : vector<2x8x8xf32>
    %141 = arith.truncf %140 : vector<2x8x8xf32> to vector<2x8x8xbf16>
    %142 = arith.truncf %123 : vector<2x8x8xf32> to vector<2x8x8xbf16>
    "tpu.trace_start"() <{level = 10 : i32, message = "bqk,bkd->bqd"}> : () -> ()
    %cst_46 = arith.constant dense<0.000000e+00> : vector<2x8x8xf32>
    %143 = tpu.matmul %141, %142, %cst_46 {dimension_numbers = #tpu.dot_dimension_numbers<[2], [1], [1], [2], [0, 0, 0, 1, 1, 2], [0], [0]>} : vector<2x8x8xbf16>, vector<2x8x8xbf16>, vector<2x8x8xf32> -> vector<2x8x8xf32>
    "tpu.trace_stop"() : () -> ()
    %144 = vector.shape_cast %143 : vector<2x8x8xf32> to vector<16x8xf32>
    %c0_47 = arith.constant 0 : index
    %c24 = arith.constant 24 : index
    %145 = vector.load %arg22[%c0_47, %c24] : memref<16x32xf32, #tpu.memory_space<vmem>>, vector<16x8xf32>
    tpu.vector_store %arg22[%c0_47, %c24], %144 {strides = array<i32>} : memref<16x32xf32, #tpu.memory_space<vmem>>, vector<16x8xf32>,
    %c0_48 = arith.constant 0 : index
    %c0_49 = arith.constant 0 : index
    %146 = vector.load %arg22[%c0_48, %c0_49] : memref<16x32xf32, #tpu.memory_space<vmem>>, vector<16x32xf32>
    %c0_50 = arith.constant 0 : index
    %c0_51 = arith.constant 0 : index
    %c0_52 = arith.constant 0 : index
    %147 = vector.load %arg6[%c0_50, %c0_51, %c0_52] : memref<2x32x32xbf16, #tpu.memory_space<vmem>>, vector<1x32x32xbf16>
    %148 = vector.shape_cast %147 : vector<1x32x32xbf16> to vector<32x32xbf16>
    %c0_53 = arith.constant 0 : index
    %c0_54 = arith.constant 0 : index
    %c0_55 = arith.constant 0 : index
    %149 = vector.load %arg7[%c0_53, %c0_54, %c0_55] : memref<2x1x32xf32, #tpu.memory_space<vmem>>, vector<1x1x32xf32>
    %150 = vector.shape_cast %149 : vector<1x1x32xf32> to vector<1x32xf32>
    %151 = arith.truncf %146 : vector<16x32xf32> to vector<16x32xbf16>
    %cst_56 = arith.constant dense<0.000000e+00> : vector<16x32xf32>
    %152 = tpu.matmul %151, %148, %cst_56 {dimension_numbers = #tpu.dot_dimension_numbers<[1], [0], [0], [1], [0, 0, 1, 1], [], []>} : vector<16x32xbf16>, vector<32x32xbf16>, vector<16x32xf32> -> vector<16x32xf32>
    %153 = vector.broadcast %150 : vector<1x32xf32> to vector<16x32xf32>
    %154 = arith.addf %152, %153 : vector<16x32xf32>
    %155 = arith.addf %25, %154 : vector<16x32xf32>
    %c0_57 = arith.constant 0 : index
    %c0_58 = arith.constant 0 : index
    %c0_59 = arith.constant 0 : index
    %156 = vector.load %arg8[%c0_57, %c0_58, %c0_59] : memref<2x1x32xf32, #tpu.memory_space<vmem>>, vector<1x1x32xf32>
    %157 = vector.shape_cast %156 : vector<1x1x32xf32> to vector<1x32xf32>
    %c0_60 = arith.constant 0 : index
    %c0_61 = arith.constant 0 : index
    %c0_62 = arith.constant 0 : index
    %158 = vector.load %arg9[%c0_60, %c0_61, %c0_62] : memref<2x1x32xf32, #tpu.memory_space<vmem>>, vector<1x1x32xf32>
    %159 = vector.shape_cast %158 : vector<1x1x32xf32> to vector<1x32xf32>
    %cst_63 = arith.constant dense<0.000000e+00> : vector<16xf32>
    %160 = vector.multi_reduction <add>, %155, %cst_63 [1] : vector<16x32xf32> to vector<16xf32>
    %161 = vector.shape_cast %160 : vector<16xf32> to vector<16x1xf32>
    %cst_64 = arith.constant 3.200000e+01 : f32
    %162 = vector.broadcast %cst_64 : f32 to vector<16x1xf32>
    %163 = arith.divf %161, %162 : vector<16x1xf32>
    %164 = vector.broadcast %163 : vector<16x1xf32> to vector<16x32xf32>
    %165 = arith.subf %155, %164 : vector<16x32xf32>
    %166 = arith.mulf %165, %165 : vector<16x32xf32>
    %cst_65 = arith.constant dense<0.000000e+00> : vector<16xf32>
    %167 = vector.multi_reduction <add>, %166, %cst_65 [1] : vector<16x32xf32> to vector<16xf32>
    %168 = vector.shape_cast %167 : vector<16xf32> to vector<16x1xf32>
    %cst_66 = arith.constant 3.200000e+01 : f32
    %169 = vector.broadcast %cst_66 : f32 to vector<16x1xf32>
    %170 = arith.divf %168, %169 : vector<16x1xf32>
    %cst_67 = arith.constant 9.99999996E-13 : f32
    %171 = vector.broadcast %cst_67 : f32 to vector<16x1xf32>
    %172 = arith.addf %170, %171 : vector<16x1xf32>
    %173 = math.rsqrt %172 : vector<16x1xf32>
    %174 = vector.broadcast %173 : vector<16x1xf32> to vector<16x32xf32>
    %175 = arith.mulf %165, %174 : vector<16x32xf32>
    %176 = vector.broadcast %157 : vector<1x32xf32> to vector<16x32xf32>
    %177 = arith.mulf %175, %176 : vector<16x32xf32>
    %178 = vector.broadcast %159 : vector<1x32xf32> to vector<16x32xf32>
    %179 = arith.addf %177, %178 : vector<16x32xf32>
    %c0_68 = arith.constant 0 : index
    %c0_69 = arith.constant 0 : index
    %c0_70 = arith.constant 0 : index
    %180 = vector.load %arg10[%c0_68, %c0_69, %c0_70] : memref<2x32x64xbf16, #tpu.memory_space<vmem>>, vector<1x32x64xbf16>
    %181 = vector.shape_cast %180 : vector<1x32x64xbf16> to vector<32x64xbf16>
    %c0_71 = arith.constant 0 : index
    %c0_72 = arith.constant 0 : index
    %c0_73 = arith.constant 0 : index
    %182 = vector.load %arg11[%c0_71, %c0_72, %c0_73] : memref<2x1x64xf32, #tpu.memory_space<vmem>>, vector<1x1x64xf32>
    %183 = vector.shape_cast %182 : vector<1x1x64xf32> to vector<1x64xf32>
    %184 = arith.truncf %179 : vector<16x32xf32> to vector<16x32xbf16>
    %cst_74 = arith.constant dense<0.000000e+00> : vector<16x64xf32>
    %185 = tpu.matmul %184, %181, %cst_74 {dimension_numbers = #tpu.dot_dimension_numbers<[1], [0], [0], [1], [0, 0, 1, 1], [], []>} : vector<16x32xbf16>, vector<32x64xbf16>, vector<16x64xf32> -> vector<16x64xf32>
    %186 = vector.broadcast %183 : vector<1x64xf32> to vector<16x64xf32>
    %187 = arith.addf %185, %186 : vector<16x64xf32>
    %cst_75 = arith.constant 5.000000e-01 : f32
    %188 = vector.broadcast %cst_75 : f32 to vector<16x64xf32>
    %189 = arith.mulf %188, %187 : vector<16x64xf32>
    %cst_76 = arith.constant 4.471500e-02 : f32
    %190 = vector.broadcast %cst_76 : f32 to vector<16x64xf32>
    %191 = arith.mulf %190, %187 : vector<16x64xf32>
    %192 = arith.mulf %191, %187 : vector<16x64xf32>
    %193 = arith.mulf %192, %187 : vector<16x64xf32>
    %194 = arith.addf %187, %193 : vector<16x64xf32>
    %cst_77 = arith.constant 0.797884583 : f32
    %195 = vector.broadcast %cst_77 : f32 to vector<16x64xf32>
    %196 = arith.mulf %195, %194 : vector<16x64xf32>
    %197 = math.tanh %196 : vector<16x64xf32>
    %cst_78 = arith.constant 1.000000e+00 : f32
    %198 = vector.broadcast %cst_78 : f32 to vector<16x64xf32>
    %199 = arith.addf %198, %197 : vector<16x64xf32>
    %200 = arith.mulf %189, %199 : vector<16x64xf32>
    %c0_79 = arith.constant 0 : index
    %c0_80 = arith.constant 0 : index
    %c0_81 = arith.constant 0 : index
    %201 = vector.load %arg12[%c0_79, %c0_80, %c0_81] : memref<2x64x32xbf16, #tpu.memory_space<vmem>>, vector<1x64x32xbf16>
    %202 = vector.shape_cast %201 : vector<1x64x32xbf16> to vector<64x32xbf16>
    %c0_82 = arith.constant 0 : index
    %c0_83 = arith.constant 0 : index
    %c0_84 = arith.constant 0 : index
    %203 = vector.load %arg13[%c0_82, %c0_83, %c0_84] : memref<2x1x32xf32, #tpu.memory_space<vmem>>, vector<1x1x32xf32>
    %204 = vector.shape_cast %203 : vector<1x1x32xf32> to vector<1x32xf32>
    %205 = arith.truncf %200 : vector<16x64xf32> to vector<16x64xbf16>
    %cst_85 = arith.constant dense<0.000000e+00> : vector<16x32xf32>
    %206 = tpu.matmul %205, %202, %cst_85 {dimension_numbers = #tpu.dot_dimension_numbers<[1], [0], [0], [1], [0, 0, 1, 1], [], []>} : vector<16x64xbf16>, vector<64x32xbf16>, vector<16x32xf32> -> vector<16x32xf32>
    %207 = vector.broadcast %204 : vector<1x32xf32> to vector<16x32xf32>
    %208 = arith.addf %206, %207 : vector<16x32xf32>
    %209 = arith.addf %179, %208 : vector<16x32xf32>
    %c0_86 = arith.constant 0 : index
    %c0_87 = arith.constant 0 : index
    %c0_88 = arith.constant 0 : index
    %210 = vector.load %arg14[%c0_86, %c0_87, %c0_88] : memref<2x1x32xf32, #tpu.memory_space<vmem>>, vector<1x1x32xf32>
    %211 = vector.shape_cast %210 : vector<1x1x32xf32> to vector<1x32xf32>
    %c0_89 = arith.constant 0 : index
    %c0_90 = arith.constant 0 : index
    %c0_91 = arith.constant 0 : index
    %212 = vector.load %arg15[%c0_89, %c0_90, %c0_91] : memref<2x1x32xf32, #tpu.memory_space<vmem>>, vector<1x1x32xf32>
    %213 = vector.shape_cast %212 : vector<1x1x32xf32> to vector<1x32xf32>
    %cst_92 = arith.constant dense<0.000000e+00> : vector<16xf32>
    %214 = vector.multi_reduction <add>, %209, %cst_92 [1] : vector<16x32xf32> to vector<16xf32>
    %215 = vector.shape_cast %214 : vector<16xf32> to vector<16x1xf32>
    %cst_93 = arith.constant 3.200000e+01 : f32
    %216 = vector.broadcast %cst_93 : f32 to vector<16x1xf32>
    %217 = arith.divf %215, %216 : vector<16x1xf32>
    %218 = vector.broadcast %217 : vector<16x1xf32> to vector<16x32xf32>
    %219 = arith.subf %209, %218 : vector<16x32xf32>
    %220 = arith.mulf %219, %219 : vector<16x32xf32>
    %cst_94 = arith.constant dense<0.000000e+00> : vector<16xf32>
    %221 = vector.multi_reduction <add>, %220, %cst_94 [1] : vector<16x32xf32> to vector<16xf32>
    %222 = vector.shape_cast %221 : vector<16xf32> to vector<16x1xf32>
    %cst_95 = arith.constant 3.200000e+01 : f32
    %223 = vector.broadcast %cst_95 : f32 to vector<16x1xf32>
    %224 = arith.divf %222, %223 : vector<16x1xf32>
    %cst_96 = arith.constant 9.99999996E-13 : f32
    %225 = vector.broadcast %cst_96 : f32 to vector<16x1xf32>
    %226 = arith.addf %224, %225 : vector<16x1xf32>
    %227 = math.rsqrt %226 : vector<16x1xf32>
    %228 = vector.broadcast %227 : vector<16x1xf32> to vector<16x32xf32>
    %229 = arith.mulf %219, %228 : vector<16x32xf32>
    %230 = vector.broadcast %211 : vector<1x32xf32> to vector<16x32xf32>
    %231 = arith.mulf %229, %230 : vector<16x32xf32>
    %232 = vector.broadcast %213 : vector<1x32xf32> to vector<16x32xf32>
    %233 = arith.addf %231, %232 : vector<16x32xf32>
    %c0_97 = arith.constant 0 : index
    %c0_98 = arith.constant 0 : index
    %234 = vector.load %arg21[%c0_97, %c0_98] : memref<16x32xf32, #tpu.memory_space<vmem>>, vector<16x32xf32>
    tpu.vector_store %arg21[%c0_97, %c0_98], %233 {strides = array<i32>} : memref<16x32xf32, #tpu.memory_space<vmem>>, vector<16x32xf32>,
    %c0_99 = arith.constant 0 : index
    %c0_100 = arith.constant 0 : index
    %235 = vector.load %arg21[%c0_99, %c0_100] : memref<16x32xf32, #tpu.memory_space<vmem>>, vector<16x32xf32>
    %c1 = arith.constant 1 : index
    %c0_101 = arith.constant 0 : index
    %c0_102 = arith.constant 0 : index
    %236 = vector.load %arg4[%c1, %c0_101, %c0_102] : memref<2x32x96xbf16, #tpu.memory_space<vmem>>, vector<1x32x96xbf16>
    %237 = vector.shape_cast %236 : vector<1x32x96xbf16> to vector<32x96xbf16>
    %c1_103 = arith.constant 1 : index
    %c0_104 = arith.constant 0 : index
    %c0_105 = arith.constant 0 : index
    %238 = vector.load %arg5[%c1_103, %c0_104, %c0_105] : memref<2x1x96xf32, #tpu.memory_space<vmem>>, vector<1x1x96xf32>
    %239 = vector.shape_cast %238 : vector<1x1x96xf32> to vector<1x96xf32>
    %240 = arith.truncf %235 : vector<16x32xf32> to vector<16x32xbf16>
    %cst_106 = arith.constant dense<0.000000e+00> : vector<16x96xf32>
    %241 = tpu.matmul %240, %237, %cst_106 {dimension_numbers = #tpu.dot_dimension_numbers<[1], [0], [0], [1], [0, 0, 1, 1], [], []>} : vector<16x32xbf16>, vector<32x96xbf16>, vector<16x96xf32> -> vector<16x96xf32>
    %242 = vector.broadcast %239 : vector<1x96xf32> to vector<16x96xf32>
    %243 = arith.addf %241, %242 : vector<16x96xf32>
    %244 = vector.extract_strided_slice %243 {offsets = [0, 0], sizes = [16, 8], strides = [1, 1]} : vector<16x96xf32> to vector<16x8xf32>
    %245 = vector.shape_cast %244 : vector<16x8xf32> to vector<2x8x8xf32>
    %246 = vector.extract_strided_slice %243 {offsets = [0, 32], sizes = [16, 8], strides = [1, 1]} : vector<16x96xf32> to vector<16x8xf32>
    %247 = vector.shape_cast %246 : vector<16x8xf32> to vector<2x8x8xf32>
    %248 = vector.extract_strided_slice %243 {offsets = [0, 64], sizes = [16, 8], strides = [1, 1]} : vector<16x96xf32> to vector<16x8xf32>
    %249 = vector.shape_cast %248 : vector<16x8xf32> to vector<2x8x8xf32>
    %250 = arith.truncf %245 : vector<2x8x8xf32> to vector<2x8x8xbf16>
    %251 = arith.truncf %247 : vector<2x8x8xf32> to vector<2x8x8xbf16>
    "tpu.trace_start"() <{level = 10 : i32, message = "bqd,bkd->bqk"}> : () -> ()
    %cst_107 = arith.constant dense<0.000000e+00> : vector<2x8x8xf32>
    %252 = tpu.matmul %250, %251, %cst_107 {dimension_numbers = #tpu.dot_dimension_numbers<[2], [2], [1], [1], [0, 0, 0, 1, 1, 1], [0], [0]>} : vector<2x8x8xbf16>, vector<2x8x8xbf16>, vector<2x8x8xf32> -> vector<2x8x8xf32>
    "tpu.trace_stop"() : () -> ()
    %cst_108 = arith.constant 0.353553385 : f32
    %253 = vector.broadcast %cst_108 : f32 to vector<2x8x8xf32>
    %254 = arith.mulf %252, %253 : vector<2x8x8xf32>
    %255 = vector.broadcast %24 : vector<2x1x8xf32> to vector<2x8x8xf32>
    %256 = arith.addf %254, %255 : vector<2x8x8xf32>
    %cst_109 = arith.constant dense<0xFF800000> : vector<2x8xf32>
    %257 = vector.multi_reduction <maximumf>, %256, %cst_109 [2] : vector<2x8x8xf32> to vector<2x8xf32>
    %258 = vector.shape_cast %257 : vector<2x8xf32> to vector<2x8x1xf32>
    %259 = vector.broadcast %258 : vector<2x8x1xf32> to vector<2x8x8xf32>
    %260 = arith.subf %256, %259 : vector<2x8x8xf32>
    %261 = math.exp %260 : vector<2x8x8xf32>
    %cst_110 = arith.constant dense<0.000000e+00> : vector<2x8xf32>
    %262 = vector.multi_reduction <add>, %261, %cst_110 [2] : vector<2x8x8xf32> to vector<2x8xf32>
    %263 = vector.shape_cast %262 : vector<2x8xf32> to vector<2x8x1xf32>
    %264 = tpu.reciprocal %263 {approx = true} : vector<2x8x1xf32> -> vector<2x8x1xf32>
    %265 = vector.broadcast %264 : vector<2x8x1xf32> to vector<2x8x8xf32>
    %266 = arith.mulf %261, %265 : vector<2x8x8xf32>
    %267 = arith.truncf %266 : vector<2x8x8xf32> to vector<2x8x8xbf16>
    %268 = arith.truncf %249 : vector<2x8x8xf32> to vector<2x8x8xbf16>
    "tpu.trace_start"() <{level = 10 : i32, message = "bqk,bkd->bqd"}> : () -> ()
    %cst_111 = arith.constant dense<0.000000e+00> : vector<2x8x8xf32>
    %269 = tpu.matmul %267, %268, %cst_111 {dimension_numbers = #tpu.dot_dimension_numbers<[2], [1], [1], [2], [0, 0, 0, 1, 1, 2], [0], [0]>} : vector<2x8x8xbf16>, vector<2x8x8xbf16>, vector<2x8x8xf32> -> vector<2x8x8xf32>
    "tpu.trace_stop"() : () -> ()
    %270 = vector.shape_cast %269 : vector<2x8x8xf32> to vector<16x8xf32>
    %c0_112 = arith.constant 0 : index
    %c0_113 = arith.constant 0 : index
    %271 = vector.load %arg22[%c0_112, %c0_113] : memref<16x32xf32, #tpu.memory_space<vmem>>, vector<16x8xf32>
    tpu.vector_store %arg22[%c0_112, %c0_113], %270 {strides = array<i32>} : memref<16x32xf32, #tpu.memory_space<vmem>>, vector<16x8xf32>,
    %272 = vector.extract_strided_slice %243 {offsets = [0, 8], sizes = [16, 8], strides = [1, 1]} : vector<16x96xf32> to vector<16x8xf32>
    %273 = vector.shape_cast %272 : vector<16x8xf32> to vector<2x8x8xf32>
    %274 = vector.extract_strided_slice %243 {offsets = [0, 40], sizes = [16, 8], strides = [1, 1]} : vector<16x96xf32> to vector<16x8xf32>
    %275 = vector.shape_cast %274 : vector<16x8xf32> to vector<2x8x8xf32>
    %276 = vector.extract_strided_slice %243 {offsets = [0, 72], sizes = [16, 8], strides = [1, 1]} : vector<16x96xf32> to vector<16x8xf32>
    %277 = vector.shape_cast %276 : vector<16x8xf32> to vector<2x8x8xf32>
    %278 = arith.truncf %273 : vector<2x8x8xf32> to vector<2x8x8xbf16>
    %279 = arith.truncf %275 : vector<2x8x8xf32> to vector<2x8x8xbf16>
    "tpu.trace_start"() <{level = 10 : i32, message = "bqd,bkd->bqk"}> : () -> ()
    %cst_114 = arith.constant dense<0.000000e+00> : vector<2x8x8xf32>
    %280 = tpu.matmul %278, %279, %cst_114 {dimension_numbers = #tpu.dot_dimension_numbers<[2], [2], [1], [1], [0, 0, 0, 1, 1, 1], [0], [0]>} : vector<2x8x8xbf16>, vector<2x8x8xbf16>, vector<2x8x8xf32> -> vector<2x8x8xf32>
    "tpu.trace_stop"() : () -> ()
    %cst_115 = arith.constant 0.353553385 : f32
    %281 = vector.broadcast %cst_115 : f32 to vector<2x8x8xf32>
    %282 = arith.mulf %280, %281 : vector<2x8x8xf32>
    %283 = vector.broadcast %24 : vector<2x1x8xf32> to vector<2x8x8xf32>
    %284 = arith.addf %282, %283 : vector<2x8x8xf32>
    %cst_116 = arith.constant dense<0xFF800000> : vector<2x8xf32>
    %285 = vector.multi_reduction <maximumf>, %284, %cst_116 [2] : vector<2x8x8xf32> to vector<2x8xf32>
    %286 = vector.shape_cast %285 : vector<2x8xf32> to vector<2x8x1xf32>
    %287 = vector.broadcast %286 : vector<2x8x1xf32> to vector<2x8x8xf32>
    %288 = arith.subf %284, %287 : vector<2x8x8xf32>
    %289 = math.exp %288 : vector<2x8x8xf32>
    %cst_117 = arith.constant dense<0.000000e+00> : vector<2x8xf32>
    %290 = vector.multi_reduction <add>, %289, %cst_117 [2] : vector<2x8x8xf32> to vector<2x8xf32>
    %291 = vector.shape_cast %290 : vector<2x8xf32> to vector<2x8x1xf32>
    %292 = tpu.reciprocal %291 {approx = true} : vector<2x8x1xf32> -> vector<2x8x1xf32>
    %293 = vector.broadcast %292 : vector<2x8x1xf32> to vector<2x8x8xf32>
    %294 = arith.mulf %289, %293 : vector<2x8x8xf32>
    %295 = arith.truncf %294 : vector<2x8x8xf32> to vector<2x8x8xbf16>
    %296 = arith.truncf %277 : vector<2x8x8xf32> to vector<2x8x8xbf16>
    "tpu.trace_start"() <{level = 10 : i32, message = "bqk,bkd->bqd"}> : () -> ()
    %cst_118 = arith.constant dense<0.000000e+00> : vector<2x8x8xf32>
    %297 = tpu.matmul %295, %296, %cst_118 {dimension_numbers = #tpu.dot_dimension_numbers<[2], [1], [1], [2], [0, 0, 0, 1, 1, 2], [0], [0]>} : vector<2x8x8xbf16>, vector<2x8x8xbf16>, vector<2x8x8xf32> -> vector<2x8x8xf32>
    "tpu.trace_stop"() : () -> ()
    %298 = vector.shape_cast %297 : vector<2x8x8xf32> to vector<16x8xf32>
    %c0_119 = arith.constant 0 : index
    %c8_120 = arith.constant 8 : index
    %299 = vector.load %arg22[%c0_119, %c8_120] : memref<16x32xf32, #tpu.memory_space<vmem>>, vector<16x8xf32>
    tpu.vector_store %arg22[%c0_119, %c8_120], %298 {strides = array<i32>} : memref<16x32xf32, #tpu.memory_space<vmem>>, vector<16x8xf32>,
    %300 = vector.extract_strided_slice %243 {offsets = [0, 16], sizes = [16, 8], strides = [1, 1]} : vector<16x96xf32> to vector<16x8xf32>
    %301 = vector.shape_cast %300 : vector<16x8xf32> to vector<2x8x8xf32>
    %302 = vector.extract_strided_slice %243 {offsets = [0, 48], sizes = [16, 8], strides = [1, 1]} : vector<16x96xf32> to vector<16x8xf32>
    %303 = vector.shape_cast %302 : vector<16x8xf32> to vector<2x8x8xf32>
    %304 = vector.extract_strided_slice %243 {offsets = [0, 80], sizes = [16, 8], strides = [1, 1]} : vector<16x96xf32> to vector<16x8xf32>
    %305 = vector.shape_cast %304 : vector<16x8xf32> to vector<2x8x8xf32>
    %306 = arith.truncf %301 : vector<2x8x8xf32> to vector<2x8x8xbf16>
    %307 = arith.truncf %303 : vector<2x8x8xf32> to vector<2x8x8xbf16>
    "tpu.trace_start"() <{level = 10 : i32, message = "bqd,bkd->bqk"}> : () -> ()
    %cst_121 = arith.constant dense<0.000000e+00> : vector<2x8x8xf32>
    %308 = tpu.matmul %306, %307, %cst_121 {dimension_numbers = #tpu.dot_dimension_numbers<[2], [2], [1], [1], [0, 0, 0, 1, 1, 1], [0], [0]>} : vector<2x8x8xbf16>, vector<2x8x8xbf16>, vector<2x8x8xf32> -> vector<2x8x8xf32>
    "tpu.trace_stop"() : () -> ()
    %cst_122 = arith.constant 0.353553385 : f32
    %309 = vector.broadcast %cst_122 : f32 to vector<2x8x8xf32>
    %310 = arith.mulf %308, %309 : vector<2x8x8xf32>
    %311 = vector.broadcast %24 : vector<2x1x8xf32> to vector<2x8x8xf32>
    %312 = arith.addf %310, %311 : vector<2x8x8xf32>
    %cst_123 = arith.constant dense<0xFF800000> : vector<2x8xf32>
    %313 = vector.multi_reduction <maximumf>, %312, %cst_123 [2] : vector<2x8x8xf32> to vector<2x8xf32>
    %314 = vector.shape_cast %313 : vector<2x8xf32> to vector<2x8x1xf32>
    %315 = vector.broadcast %314 : vector<2x8x1xf32> to vector<2x8x8xf32>
    %316 = arith.subf %312, %315 : vector<2x8x8xf32>
    %317 = math.exp %316 : vector<2x8x8xf32>
    %cst_124 = arith.constant dense<0.000000e+00> : vector<2x8xf32>
    %318 = vector.multi_reduction <add>, %317, %cst_124 [2] : vector<2x8x8xf32> to vector<2x8xf32>
    %319 = vector.shape_cast %318 : vector<2x8xf32> to vector<2x8x1xf32>
    %320 = tpu.reciprocal %319 {approx = true} : vector<2x8x1xf32> -> vector<2x8x1xf32>
    %321 = vector.broadcast %320 : vector<2x8x1xf32> to vector<2x8x8xf32>
    %322 = arith.mulf %317, %321 : vector<2x8x8xf32>
    %323 = arith.truncf %322 : vector<2x8x8xf32> to vector<2x8x8xbf16>
    %324 = arith.truncf %305 : vector<2x8x8xf32> to vector<2x8x8xbf16>
    "tpu.trace_start"() <{level = 10 : i32, message = "bqk,bkd->bqd"}> : () -> ()
    %cst_125 = arith.constant dense<0.000000e+00> : vector<2x8x8xf32>
    %325 = tpu.matmul %323, %324, %cst_125 {dimension_numbers = #tpu.dot_dimension_numbers<[2], [1], [1], [2], [0, 0, 0, 1, 1, 2], [0], [0]>} : vector<2x8x8xbf16>, vector<2x8x8xbf16>, vector<2x8x8xf32> -> vector<2x8x8xf32>
    "tpu.trace_stop"() : () -> ()
    %326 = vector.shape_cast %325 : vector<2x8x8xf32> to vector<16x8xf32>
    %c0_126 = arith.constant 0 : index
    %c16_127 = arith.constant 16 : index
    %327 = vector.load %arg22[%c0_126, %c16_127] : memref<16x32xf32, #tpu.memory_space<vmem>>, vector<16x8xf32>
    tpu.vector_store %arg22[%c0_126, %c16_127], %326 {strides = array<i32>} : memref<16x32xf32, #tpu.memory_space<vmem>>, vector<16x8xf32>,
    %328 = vector.extract_strided_slice %243 {offsets = [0, 24], sizes = [16, 8], strides = [1, 1]} : vector<16x96xf32> to vector<16x8xf32>
    %329 = vector.shape_cast %328 : vector<16x8xf32> to vector<2x8x8xf32>
    %330 = vector.extract_strided_slice %243 {offsets = [0, 56], sizes = [16, 8], strides = [1, 1]} : vector<16x96xf32> to vector<16x8xf32>
    %331 = vector.shape_cast %330 : vector<16x8xf32> to vector<2x8x8xf32>
    %332 = vector.extract_strided_slice %243 {offsets = [0, 88], sizes = [16, 8], strides = [1, 1]} : vector<16x96xf32> to vector<16x8xf32>
    %333 = vector.shape_cast %332 : vector<16x8xf32> to vector<2x8x8xf32>
    %334 = arith.truncf %329 : vector<2x8x8xf32> to vector<2x8x8xbf16>
    %335 = arith.truncf %331 : vector<2x8x8xf32> to vector<2x8x8xbf16>
    "tpu.trace_start"() <{level = 10 : i32, message = "bqd,bkd->bqk"}> : () -> ()
    %cst_128 = arith.constant dense<0.000000e+00> : vector<2x8x8xf32>
    %336 = tpu.matmul %334, %335, %cst_128 {dimension_numbers = #tpu.dot_dimension_numbers<[2], [2], [1], [1], [0, 0, 0, 1, 1, 1], [0], [0]>} : vector<2x8x8xbf16>, vector<2x8x8xbf16>, vector<2x8x8xf32> -> vector<2x8x8xf32>
    "tpu.trace_stop"() : () -> ()
    %cst_129 = arith.constant 0.353553385 : f32
    %337 = vector.broadcast %cst_129 : f32 to vector<2x8x8xf32>
    %338 = arith.mulf %336, %337 : vector<2x8x8xf32>
    %339 = vector.broadcast %24 : vector<2x1x8xf32> to vector<2x8x8xf32>
    %340 = arith.addf %338, %339 : vector<2x8x8xf32>
    %cst_130 = arith.constant dense<0xFF800000> : vector<2x8xf32>
    %341 = vector.multi_reduction <maximumf>, %340, %cst_130 [2] : vector<2x8x8xf32> to vector<2x8xf32>
    %342 = vector.shape_cast %341 : vector<2x8xf32> to vector<2x8x1xf32>
    %343 = vector.broadcast %342 : vector<2x8x1xf32> to vector<2x8x8xf32>
    %344 = arith.subf %340, %343 : vector<2x8x8xf32>
    %345 = math.exp %344 : vector<2x8x8xf32>
    %cst_131 = arith.constant dense<0.000000e+00> : vector<2x8xf32>
    %346 = vector.multi_reduction <add>, %345, %cst_131 [2] : vector<2x8x8xf32> to vector<2x8xf32>
    %347 = vector.shape_cast %346 : vector<2x8xf32> to vector<2x8x1xf32>
    %348 = tpu.reciprocal %347 {approx = true} : vector<2x8x1xf32> -> vector<2x8x1xf32>
    %349 = vector.broadcast %348 : vector<2x8x1xf32> to vector<2x8x8xf32>
    %350 = arith.mulf %345, %349 : vector<2x8x8xf32>
    %351 = arith.truncf %350 : vector<2x8x8xf32> to vector<2x8x8xbf16>
    %352 = arith.truncf %333 : vector<2x8x8xf32> to vector<2x8x8xbf16>
    "tpu.trace_start"() <{level = 10 : i32, message = "bqk,bkd->bqd"}> : () -> ()
    %cst_132 = arith.constant dense<0.000000e+00> : vector<2x8x8xf32>
    %353 = tpu.matmul %351, %352, %cst_132 {dimension_numbers = #tpu.dot_dimension_numbers<[2], [1], [1], [2], [0, 0, 0, 1, 1, 2], [0], [0]>} : vector<2x8x8xbf16>, vector<2x8x8xbf16>, vector<2x8x8xf32> -> vector<2x8x8xf32>
    "tpu.trace_stop"() : () -> ()
    %354 = vector.shape_cast %353 : vector<2x8x8xf32> to vector<16x8xf32>
    %c0_133 = arith.constant 0 : index
    %c24_134 = arith.constant 24 : index
    %355 = vector.load %arg22[%c0_133, %c24_134] : memref<16x32xf32, #tpu.memory_space<vmem>>, vector<16x8xf32>
    tpu.vector_store %arg22[%c0_133, %c24_134], %354 {strides = array<i32>} : memref<16x32xf32, #tpu.memory_space<vmem>>, vector<16x8xf32>,
    %c0_135 = arith.constant 0 : index
    %c0_136 = arith.constant 0 : index
    %356 = vector.load %arg22[%c0_135, %c0_136] : memref<16x32xf32, #tpu.memory_space<vmem>>, vector<16x32xf32>
    %c1_137 = arith.constant 1 : index
    %c0_138 = arith.constant 0 : index
    %c0_139 = arith.constant 0 : index
    %357 = vector.load %arg6[%c1_137, %c0_138, %c0_139] : memref<2x32x32xbf16, #tpu.memory_space<vmem>>, vector<1x32x32xbf16>
    %358 = vector.shape_cast %357 : vector<1x32x32xbf16> to vector<32x32xbf16>
    %c1_140 = arith.constant 1 : index
    %c0_141 = arith.constant 0 : index
    %c0_142 = arith.constant 0 : index
    %359 = vector.load %arg7[%c1_140, %c0_141, %c0_142] : memref<2x1x32xf32, #tpu.memory_space<vmem>>, vector<1x1x32xf32>
    %360 = vector.shape_cast %359 : vector<1x1x32xf32> to vector<1x32xf32>
    %361 = arith.truncf %356 : vector<16x32xf32> to vector<16x32xbf16>
    %cst_143 = arith.constant dense<0.000000e+00> : vector<16x32xf32>
    %362 = tpu.matmul %361, %358, %cst_143 {dimension_numbers = #tpu.dot_dimension_numbers<[1], [0], [0], [1], [0, 0, 1, 1], [], []>} : vector<16x32xbf16>, vector<32x32xbf16>, vector<16x32xf32> -> vector<16x32xf32>
    %363 = vector.broadcast %360 : vector<1x32xf32> to vector<16x32xf32>
    %364 = arith.addf %362, %363 : vector<16x32xf32>
    %365 = arith.addf %235, %364 : vector<16x32xf32>
    %c1_144 = arith.constant 1 : index
    %c0_145 = arith.constant 0 : index
    %c0_146 = arith.constant 0 : index
    %366 = vector.load %arg8[%c1_144, %c0_145, %c0_146] : memref<2x1x32xf32, #tpu.memory_space<vmem>>, vector<1x1x32xf32>
    %367 = vector.shape_cast %366 : vector<1x1x32xf32> to vector<1x32xf32>
    %c1_147 = arith.constant 1 : index
    %c0_148 = arith.constant 0 : index
    %c0_149 = arith.constant 0 : index
    %368 = vector.load %arg9[%c1_147, %c0_148, %c0_149] : memref<2x1x32xf32, #tpu.memory_space<vmem>>, vector<1x1x32xf32>
    %369 = vector.shape_cast %368 : vector<1x1x32xf32> to vector<1x32xf32>
    %cst_150 = arith.constant dense<0.000000e+00> : vector<16xf32>
    %370 = vector.multi_reduction <add>, %365, %cst_150 [1] : vector<16x32xf32> to vector<16xf32>
    %371 = vector.shape_cast %370 : vector<16xf32> to vector<16x1xf32>
    %cst_151 = arith.constant 3.200000e+01 : f32
    %372 = vector.broadcast %cst_151 : f32 to vector<16x1xf32>
    %373 = arith.divf %371, %372 : vector<16x1xf32>
    %374 = vector.broadcast %373 : vector<16x1xf32> to vector<16x32xf32>
    %375 = arith.subf %365, %374 : vector<16x32xf32>
    %376 = arith.mulf %375, %375 : vector<16x32xf32>
    %cst_152 = arith.constant dense<0.000000e+00> : vector<16xf32>
    %377 = vector.multi_reduction <add>, %376, %cst_152 [1] : vector<16x32xf32> to vector<16xf32>
    %378 = vector.shape_cast %377 : vector<16xf32> to vector<16x1xf32>
    %cst_153 = arith.constant 3.200000e+01 : f32
    %379 = vector.broadcast %cst_153 : f32 to vector<16x1xf32>
    %380 = arith.divf %378, %379 : vector<16x1xf32>
    %cst_154 = arith.constant 9.99999996E-13 : f32
    %381 = vector.broadcast %cst_154 : f32 to vector<16x1xf32>
    %382 = arith.addf %380, %381 : vector<16x1xf32>
    %383 = math.rsqrt %382 : vector<16x1xf32>
    %384 = vector.broadcast %383 : vector<16x1xf32> to vector<16x32xf32>
    %385 = arith.mulf %375, %384 : vector<16x32xf32>
    %386 = vector.broadcast %367 : vector<1x32xf32> to vector<16x32xf32>
    %387 = arith.mulf %385, %386 : vector<16x32xf32>
    %388 = vector.broadcast %369 : vector<1x32xf32> to vector<16x32xf32>
    %389 = arith.addf %387, %388 : vector<16x32xf32>
    %c1_155 = arith.constant 1 : index
    %c0_156 = arith.constant 0 : index
    %c0_157 = arith.constant 0 : index
    %390 = vector.load %arg10[%c1_155, %c0_156, %c0_157] : memref<2x32x64xbf16, #tpu.memory_space<vmem>>, vector<1x32x64xbf16>
    %391 = vector.shape_cast %390 : vector<1x32x64xbf16> to vector<32x64xbf16>
    %c1_158 = arith.constant 1 : index
    %c0_159 = arith.constant 0 : index
    %c0_160 = arith.constant 0 : index
    %392 = vector.load %arg11[%c1_158, %c0_159, %c0_160] : memref<2x1x64xf32, #tpu.memory_space<vmem>>, vector<1x1x64xf32>
    %393 = vector.shape_cast %392 : vector<1x1x64xf32> to vector<1x64xf32>
    %394 = arith.truncf %389 : vector<16x32xf32> to vector<16x32xbf16>
    %cst_161 = arith.constant dense<0.000000e+00> : vector<16x64xf32>
    %395 = tpu.matmul %394, %391, %cst_161 {dimension_numbers = #tpu.dot_dimension_numbers<[1], [0], [0], [1], [0, 0, 1, 1], [], []>} : vector<16x32xbf16>, vector<32x64xbf16>, vector<16x64xf32> -> vector<16x64xf32>
    %396 = vector.broadcast %393 : vector<1x64xf32> to vector<16x64xf32>
    %397 = arith.addf %395, %396 : vector<16x64xf32>
    %cst_162 = arith.constant 5.000000e-01 : f32
    %398 = vector.broadcast %cst_162 : f32 to vector<16x64xf32>
    %399 = arith.mulf %398, %397 : vector<16x64xf32>
    %cst_163 = arith.constant 4.471500e-02 : f32
    %400 = vector.broadcast %cst_163 : f32 to vector<16x64xf32>
    %401 = arith.mulf %400, %397 : vector<16x64xf32>
    %402 = arith.mulf %401, %397 : vector<16x64xf32>
    %403 = arith.mulf %402, %397 : vector<16x64xf32>
    %404 = arith.addf %397, %403 : vector<16x64xf32>
    %cst_164 = arith.constant 0.797884583 : f32
    %405 = vector.broadcast %cst_164 : f32 to vector<16x64xf32>
    %406 = arith.mulf %405, %404 : vector<16x64xf32>
    %407 = math.tanh %406 : vector<16x64xf32>
    %cst_165 = arith.constant 1.000000e+00 : f32
    %408 = vector.broadcast %cst_165 : f32 to vector<16x64xf32>
    %409 = arith.addf %408, %407 : vector<16x64xf32>
    %410 = arith.mulf %399, %409 : vector<16x64xf32>
    %c1_166 = arith.constant 1 : index
    %c0_167 = arith.constant 0 : index
    %c0_168 = arith.constant 0 : index
    %411 = vector.load %arg12[%c1_166, %c0_167, %c0_168] : memref<2x64x32xbf16, #tpu.memory_space<vmem>>, vector<1x64x32xbf16>
    %412 = vector.shape_cast %411 : vector<1x64x32xbf16> to vector<64x32xbf16>
    %c1_169 = arith.constant 1 : index
    %c0_170 = arith.constant 0 : index
    %c0_171 = arith.constant 0 : index
    %413 = vector.load %arg13[%c1_169, %c0_170, %c0_171] : memref<2x1x32xf32, #tpu.memory_space<vmem>>, vector<1x1x32xf32>
    %414 = vector.shape_cast %413 : vector<1x1x32xf32> to vector<1x32xf32>
    %415 = arith.truncf %410 : vector<16x64xf32> to vector<16x64xbf16>
    %cst_172 = arith.constant dense<0.000000e+00> : vector<16x32xf32>
    %416 = tpu.matmul %415, %412, %cst_172 {dimension_numbers = #tpu.dot_dimension_numbers<[1], [0], [0], [1], [0, 0, 1, 1], [], []>} : vector<16x64xbf16>, vector<64x32xbf16>, vector<16x32xf32> -> vector<16x32xf32>
    %417 = vector.broadcast %414 : vector<1x32xf32> to vector<16x32xf32>
    %418 = arith.addf %416, %417 : vector<16x32xf32>
    %419 = arith.addf %389, %418 : vector<16x32xf32>
    %c1_173 = arith.constant 1 : index
    %c0_174 = arith.constant 0 : index
    %c0_175 = arith.constant 0 : index
    %420 = vector.load %arg14[%c1_173, %c0_174, %c0_175] : memref<2x1x32xf32, #tpu.memory_space<vmem>>, vector<1x1x32xf32>
    %421 = vector.shape_cast %420 : vector<1x1x32xf32> to vector<1x32xf32>
    %c1_176 = arith.constant 1 : index
    %c0_177 = arith.constant 0 : index
    %c0_178 = arith.constant 0 : index
    %422 = vector.load %arg15[%c1_176, %c0_177, %c0_178] : memref<2x1x32xf32, #tpu.memory_space<vmem>>, vector<1x1x32xf32>
    %423 = vector.shape_cast %422 : vector<1x1x32xf32> to vector<1x32xf32>
    %cst_179 = arith.constant dense<0.000000e+00> : vector<16xf32>
    %424 = vector.multi_reduction <add>, %419, %cst_179 [1] : vector<16x32xf32> to vector<16xf32>
    %425 = vector.shape_cast %424 : vector<16xf32> to vector<16x1xf32>
    %cst_180 = arith.constant 3.200000e+01 : f32
    %426 = vector.broadcast %cst_180 : f32 to vector<16x1xf32>
    %427 = arith.divf %425, %426 : vector<16x1xf32>
    %428 = vector.broadcast %427 : vector<16x1xf32> to vector<16x32xf32>
    %429 = arith.subf %419, %428 : vector<16x32xf32>
    %430 = arith.mulf %429, %429 : vector<16x32xf32>
    %cst_181 = arith.constant dense<0.000000e+00> : vector<16xf32>
    %431 = vector.multi_reduction <add>, %430, %cst_181 [1] : vector<16x32xf32> to vector<16xf32>
    %432 = vector.shape_cast %431 : vector<16xf32> to vector<16x1xf32>
    %cst_182 = arith.constant 3.200000e+01 : f32
    %433 = vector.broadcast %cst_182 : f32 to vector<16x1xf32>
    %434 = arith.divf %432, %433 : vector<16x1xf32>
    %cst_183 = arith.constant 9.99999996E-13 : f32
    %435 = vector.broadcast %cst_183 : f32 to vector<16x1xf32>
    %436 = arith.addf %434, %435 : vector<16x1xf32>
    %437 = math.rsqrt %436 : vector<16x1xf32>
    %438 = vector.broadcast %437 : vector<16x1xf32> to vector<16x32xf32>
    %439 = arith.mulf %429, %438 : vector<16x32xf32>
    %440 = vector.broadcast %421 : vector<1x32xf32> to vector<16x32xf32>
    %441 = arith.mulf %439, %440 : vector<16x32xf32>
    %442 = vector.broadcast %423 : vector<1x32xf32> to vector<16x32xf32>
    %443 = arith.addf %441, %442 : vector<16x32xf32>
    %c0_184 = arith.constant 0 : index
    %c0_185 = arith.constant 0 : index
    %444 = vector.load %arg21[%c0_184, %c0_185] : memref<16x32xf32, #tpu.memory_space<vmem>>, vector<16x32xf32>
    tpu.vector_store %arg21[%c0_184, %c0_185], %443 {strides = array<i32>} : memref<16x32xf32, #tpu.memory_space<vmem>>, vector<16x32xf32>,
    %c0_186 = arith.constant 0 : index
    %c0_187 = arith.constant 0 : index
    %445 = vector.load %arg21[%c0_186, %c0_187] : memref<16x32xf32, #tpu.memory_space<vmem>>, vector<16x32xf32>
    %446 = vector.shape_cast %445 : vector<16x32xf32> to vector<2x8x32xf32>
    %447 = vector.extract_strided_slice %446 {offsets = [0, 0, 0], sizes = [2, 1, 32], strides = [1, 1, 1]} : vector<2x8x32xf32> to vector<2x1x32xf32>
    %448 = vector.shape_cast %447 : vector<2x1x32xf32> to vector<2x32xf32>
    %c0_188 = arith.constant 0 : index
    %c0_189 = arith.constant 0 : index
    %449 = vector.load %arg16[%c0_188, %c0_189] : memref<32x32xbf16, #tpu.memory_space<vmem>>, vector<32x32xbf16>
    %c0_190 = arith.constant 0 : index
    %c0_191 = arith.constant 0 : index
    %450 = vector.load %arg17[%c0_190, %c0_191] : memref<1x32xf32, #tpu.memory_space<vmem>>, vector<1x32xf32>
    %451 = arith.truncf %448 : vector<2x32xf32> to vector<2x32xbf16>
    %cst_192 = arith.constant dense<0.000000e+00> : vector<2x32xf32>
    %452 = tpu.matmul %451, %449, %cst_192 {dimension_numbers = #tpu.dot_dimension_numbers<[1], [0], [0], [1], [0, 0, 1, 1], [], []>} : vector<2x32xbf16>, vector<32x32xbf16>, vector<2x32xf32> -> vector<2x32xf32>
    %453 = vector.broadcast %450 : vector<1x32xf32> to vector<2x32xf32>
    %454 = arith.addf %452, %453 : vector<2x32xf32>
    %455 = math.tanh %454 : vector<2x32xf32>
    %c0_193 = arith.constant 0 : index
    %c0_194 = arith.constant 0 : index
    %456 = vector.load %arg18[%c0_193, %c0_194] : memref<32x128xbf16, #tpu.memory_space<vmem>>, vector<32x128xbf16>
    %c0_195 = arith.constant 0 : index
    %c0_196 = arith.constant 0 : index
    %457 = vector.load %arg19[%c0_195, %c0_196] : memref<1x128xf32, #tpu.memory_space<vmem>>, vector<1x128xf32>
    %458 = arith.truncf %455 : vector<2x32xf32> to vector<2x32xbf16>
    %cst_197 = arith.constant dense<0.000000e+00> : vector<2x128xf32>
    %459 = tpu.matmul %458, %456, %cst_197 {dimension_numbers = #tpu.dot_dimension_numbers<[1], [0], [0], [1], [0, 0, 1, 1], [], []>} : vector<2x32xbf16>, vector<32x128xbf16>, vector<2x128xf32> -> vector<2x128xf32>
    %460 = vector.broadcast %457 : vector<1x128xf32> to vector<2x128xf32>
    %461 = arith.addf %459, %460 : vector<2x128xf32>
    %c0_198 = arith.constant 0 : index
    %c0_199 = arith.constant 0 : index
    %462 = vector.load %arg20[%c0_198, %c0_199] : memref<2x128xf32, #tpu.memory_space<vmem>>, vector<2x128xf32>
    tpu.vector_store %arg20[%c0_198, %c0_199], %461 {strides = array<i32>} : memref<2x128xf32, #tpu.memory_space<vmem>>, vector<2x128xf32>,
    return
  }
}

</mosaic_0001>

<bundles_post_ra>
// kernel: tpu_custom_call.1
= control target key start
LH: loop header
LB: loop body
LE: loop exit
PB: predicated region body
PF: predicated region fallthrough
CT: control target
= control target key end

     0   :  { %s4973_s0 = inlined_call_operand.hbm [shape: f32[16,32], index: 0, kind: input, shape index: {}]   ;;  %s4974_s1 = inlined_call_operand.hbm [shape: f32[2,1,8], index: 1, kind: input, shape index: {}]   ;;  %s4975_s2 = inlined_call_operand.hbm [shape: f32[1,32], index: 2, kind: input, shape index: {}]   ;;  %s4976_s3 = inlined_call_operand.hbm [shape: f32[1,32], index: 3, kind: input, shape index: {}]   ;;  %s4977_s4 = inlined_call_operand.vmem [shape: bf16[2,32,96], index: 4, kind: input, shape index: {}]   ;;  %s4978_s5 = inlined_call_operand.hbm [shape: f32[2,1,96], index: 5, kind: input, shape index: {}]   ;;  %s4979_s6 = inlined_call_operand.vmem [shape: bf16[2,32,32], index: 6, kind: input, shape index: {}]   ;;  %s4980_s7 = inlined_call_operand.hbm [shape: f32[2,1,32], index: 7, kind: input, shape index: {}]   ;;  %s4981_s8 = inlined_call_operand.hbm [shape: f32[2,1,32], index: 8, kind: input, shape index: {}]   ;;  %s4982_s9 = inlined_call_operand.hbm [shape: f32[2,1,32], index: 9, kind: input, shape index: {}]   ;;  %s4983_s10 = inlined_call_operand.vmem [shape: bf16[2,32,64], index: 10, kind: input, shape index: {}]   ;;  %s4984_s11 = inlined_call_operand.hbm [shape: f32[2,1,64], index: 11, kind: input, shape index: {}]   ;;  %s4985_s12 = inlined_call_operand.vmem [shape: bf16[2,64,32], index: 12, kind: input, shape index: {}]   ;;  %s4986_s13 = inlined_call_operand.hbm [shape: f32[2,1,32], index: 13, kind: input, shape index: {}]   ;;  %s4987_s14 = inlined_call_operand.hbm [shape: f32[2,1,32], index: 14, kind: input, shape index: {}]   ;;  %s4988_s15 = inlined_call_operand.hbm [shape: f32[2,1,32], index: 15, kind: input, shape index: {}]   ;;  %s4989_s16 = inlined_call_operand.vmem [shape: bf16[32,32], index: 16, kind: input, shape index: {}]   ;;  %s4990_s17 = inlined_call_operand.hbm [shape: f32[1,32], index: 17, kind: input, shape index: {}]   ;;  %s4991_s18 = inlined_call_operand.vmem [shape: bf16[32,128], index: 18, kind: input, shape index: {}]   ;;  %s4992_s19 = inlined_call_operand.vmem [shape: f32[1,128], index: 19, kind: input, shape index: {}]   ;;  %s4993_s20 = inlined_call_operand.hbm [shape: f32[2,128], index: 20, kind: output, shape index: {}]  }
   0x1   :  { %5001 = sst [smem:[#allocation34_spill]] %s4973_s0 }
   0x2   :  { %5002 = sst [smem:[#allocation35_spill]] %s4974_s1 }
   0x3   :  { %5003 = sst [smem:[#allocation36_spill]] %s4975_s2 }
   0x4   :  { %5004 = sst [smem:[#allocation37_spill]] %s4976_s3 }
   0x5   :  { %5005 = sst [smem:[#allocation38_spill]] %s4977_s4 }
   0x6   :  { %5006 = sst [smem:[#allocation39_spill]] %s4991_s18 }
   0x7   :  { %5007 = sst [smem:[#allocation40_spill]] %s4992_s19 }
   0x8   :  { %5008 = sst [smem:[#allocation41_spill]] %s4993_s20 }
   0x9   :  { %25 = vsyncpa [#allocation5], 0 }
   0xa   :  { %26 = vsyncpa [#allocation8], 0 }
   0xb   :  { %27 = vsyncpa [#allocation11], 0 }
   0xc   :  { %28 = vsyncpa [#allocation14], 0 }
   0xd   :  { %29 = vsyncpa [#allocation17], 0 }
   0xe   :  { %30 = vsyncpa [#allocation20], 0 }
   0xf   :  { %31 = vsyncpa [#allocation23], 0 }
  0x10   :  { %32 = vsyncpa [#allocation6], 0  ;;  %s4113_s1 = smov [#allocation7]   ;;  %s5009_s2 = sld [smem:[#allocation35_spill]] }
  0x11   :  { %s50_s22 = sshll.u32 %s4113_s1, 4  ;;  %s51_s22 = int_to_ptr.vmem [resolvable:$true] %s50_s22 }
  0x16   :  { %s3789_s25 = scalar_lea.hbm %s5009_s2, 32 }
  0x17   :  { %p3790_p0 = scmp.ne.s32.totalorder %s5009_s2, %s3789_s25  ;;  %p3793_p1 = scmp.lt.u32.totalorder %s3789_s25, %s5009_s2 }
  0x19   :  { %p3795_p2 = pnand %p3793_p1, %p3790_p0 }
  0x1b   :  { %3798 = shalt.err (!%p3795_p2)
}
  0x1c   :  { %s3799_s4 = scalar_lea.vmem %s51_s22, 32  ;;  %p3804_p4 = scmp.lt.s32.totalorder %s51_s22, %s51_s22 }
  0x1d   :  { %p3800_p3 = scmp.ne.s32.totalorder %s51_s22, %s3799_s4  ;;  %p3805_p5 = scmp.lt.s32.totalorder %s3799_s4, %s3799_s4 }
  0x1f   :  { %p3806_p6 = por %p3805_p5, %p3804_p4 }
  0x21   :  { %p3807_p7 = pnand %p3806_p6, %p3800_p3 }
  0x23   :  { %3810 = shalt.err (!%p3807_p7)
}
  0x24   :  { %s4114_s29 = smov 16   ;;  %s4115_s30 = smov 1  }
  0x25   :  { %56 = dma.hbm_to_vmem [thread:$0]  %s5009_s2, 32, %s51_s22, [#allocation8], %s4114_s29, %s4114_s29, %s4115_s30  }
  0x26   :  { %s4116_s1 = smov [#allocation10]   ;;  %s4117_s24 = smov [#allocation13]  }
  0x27   :  { %s73_s23 = sshll.u32 %s4116_s1, 4  ;;  %s98_s25 = sshll.u32 %s4117_s24, 4  ;;  %s74_s23 = int_to_ptr.vmem [resolvable:$true] %s73_s23  ;;  %s99_s25 = int_to_ptr.vmem [resolvable:$true] %s98_s25 }
  0x28   :  { %s5010_s27 = sld [smem:[#allocation37_spill]] }
  0x2e   :  { %s3811_s28 = scalar_lea.hbm %s5010_s27, 16 }
  0x2f   :  { %p3812_p8 = scmp.ne.s32.totalorder %s5010_s27, %s3811_s28  ;;  %p3815_p9 = scmp.lt.u32.totalorder %s3811_s28, %s5010_s27 }
  0x31   :  { %p3817_p10 = pnand %p3815_p9, %p3812_p8 }
  0x33   :  { %3820 = shalt.err (!%p3817_p10)
}
  0x34   :  { %s3821_s22 = scalar_lea.vmem %s74_s23, 16  ;;  %s3825_s2 = scalar_lea.vmem %s74_s23, 32 }
  0x35   :  { %p3822_p11 = scmp.ne.s32.totalorder %s74_s23, %s3821_s22  ;;  %p3826_p12 = scmp.lt.s32.totalorder %s74_s23, %s74_s23 }
  0x36   :  { %p3827_p13 = scmp.lt.s32.totalorder %s3825_s2, %s3821_s22 }
  0x38   :  { %p3828_p0 = por %p3827_p13, %p3826_p12 }
  0x3a   :  { %p3829_p1 = pnand %p3828_p0, %p3822_p11 }
  0x3c   :  { %3832 = shalt.err (!%p3829_p1)
}
  0x3d   :  { %76 = dma.hbm_to_vmem [thread:$0]  %s5010_s27, 16, %s74_s23, [#allocation11]  }
  0x3e   :  { %s3833_s18 = scalar_lea.hbm %s4980_s7, 32 }
  0x3f   :  { %p3834_p2 = scmp.ne.s32.totalorder %s4980_s7, %s3833_s18  ;;  %p3837_p3 = scmp.lt.u32.totalorder %s3833_s18, %s4980_s7 }
  0x41   :  { %p3839_p4 = pnand %p3837_p3, %p3834_p2 }
  0x43   :  { %3842 = shalt.err (!%p3839_p4)
}
  0x44   :  { %s3843_s28 = scalar_lea.vmem %s99_s25, 32  ;;  %p3848_p6 = scmp.lt.s32.totalorder %s99_s25, %s99_s25 }
  0x45   :  { %p3844_p5 = scmp.ne.s32.totalorder %s99_s25, %s3843_s28  ;;  %p3849_p7 = scmp.lt.s32.totalorder %s3843_s28, %s3843_s28 }
  0x47   :  { %p3850_p8 = por %p3849_p7, %p3848_p6 }
  0x49   :  { %p3851_p9 = pnand %p3850_p8, %p3844_p5 }
  0x4b   :  { %3854 = shalt.err (!%p3851_p9)
}
  0x4c   :  { %104 = dma.hbm_to_vmem [thread:$0]  %s4980_s7, 32, %s99_s25, [#allocation14], %s4114_s29, %s4114_s29, %s4115_s30  }
  0x4d   :  { %s4118_s4 = smov [#allocation16]   ;;  %s4119_s2 = smov [#allocation19]  }
  0x4e   :  { %s122_s22 = sshll.u32 %s4118_s4, 4  ;;  %s150_s0 = sshll.u32 %s4119_s2, 4  ;;  %s123_s22 = int_to_ptr.vmem [resolvable:$true] %s122_s22  ;;  %s151_s0 = int_to_ptr.vmem [resolvable:$true] %s150_s0 }
  0x4f   :  { %s3855_s1 = scalar_lea.hbm %s4982_s9, 32 }
  0x50   :  { %p3856_p10 = scmp.ne.s32.totalorder %s4982_s9, %s3855_s1  ;;  %p3859_p11 = scmp.lt.u32.totalorder %s3855_s1, %s4982_s9 }
  0x52   :  { %p3861_p12 = pnand %p3859_p11, %p3856_p10 }
  0x54   :  { %3864 = shalt.err (!%p3861_p12)
}
  0x55   :  { %s3865_s7 = scalar_lea.vmem %s123_s22, 32  ;;  %p3870_p0 = scmp.lt.s32.totalorder %s123_s22, %s123_s22 }
  0x56   :  { %p3866_p13 = scmp.ne.s32.totalorder %s123_s22, %s3865_s7  ;;  %p3871_p1 = scmp.lt.s32.totalorder %s3865_s7, %s3865_s7 }
  0x58   :  { %p3872_p2 = por %p3871_p1, %p3870_p0 }
  0x5a   :  { %p3873_p3 = pnand %p3872_p2, %p3866_p13 }
  0x5c   :  { %3876 = shalt.err (!%p3873_p3)
}
  0x5d   :  { %128 = dma.hbm_to_vmem [thread:$0]  %s4982_s9, 32, %s123_s22, [#allocation17], %s4114_s29, %s4114_s29, %s4115_s30  }
  0x5e   :  { %s3877_s27 = scalar_lea.hbm %s4986_s13, 32 }
  0x5f   :  { %p3878_p4 = scmp.ne.s32.totalorder %s4986_s13, %s3877_s27  ;;  %p3881_p5 = scmp.lt.u32.totalorder %s3877_s27, %s4986_s13 }
  0x61   :  { %p3883_p6 = pnand %p3881_p5, %p3878_p4 }
  0x63   :  { %3886 = shalt.err (!%p3883_p6)
}
  0x64   :  { %s3887_s1 = scalar_lea.vmem %s151_s0, 32  ;;  %p3892_p8 = scmp.lt.s32.totalorder %s151_s0, %s151_s0 }
  0x65   :  { %p3888_p7 = scmp.ne.s32.totalorder %s151_s0, %s3887_s1  ;;  %p3893_p9 = scmp.lt.s32.totalorder %s3887_s1, %s3887_s1 }
  0x67   :  { %p3894_p10 = por %p3893_p9, %p3892_p8 }
  0x69   :  { %p3895_p11 = pnand %p3894_p10, %p3888_p7 }
  0x6b   :  { %3898 = shalt.err (!%p3895_p11)
}
  0x6c   :  { %156 = dma.hbm_to_vmem [thread:$0]  %s4986_s13, 32, %s151_s0, [#allocation20], %s4114_s29, %s4114_s29, %s4115_s30  }
  0x6d   :  { %s4120_s18 = smov [#allocation22]   ;;  %s4121_s24 = smov [#allocation4]  }
  0x6e   :  { %s174_s19 = sshll.u32 %s4120_s18, 4  ;;  %s38_s3 = sshll.u32 %s4121_s24, 4  ;;  %s175_s19 = int_to_ptr.vmem [resolvable:$true] %s174_s19  ;;  %s39_s3 = int_to_ptr.vmem [resolvable:$true] %s38_s3 }
  0x6f   :  { %s3899_s26 = scalar_lea.hbm %s4988_s15, 32 }
  0x70   :  { %p3900_p12 = scmp.ne.s32.totalorder %s4988_s15, %s3899_s26  ;;  %p3903_p13 = scmp.lt.u32.totalorder %s3899_s26, %s4988_s15 }
  0x72   :  { %p3905_p0 = pnand %p3903_p13, %p3900_p12 }
  0x74   :  { %3908 = shalt.err (!%p3905_p0)
}
  0x75   :  { %s3909_s13 = scalar_lea.vmem %s175_s19, 32  ;;  %p3914_p2 = scmp.lt.s32.totalorder %s175_s19, %s175_s19 }
  0x76   :  { %p3910_p1 = scmp.ne.s32.totalorder %s175_s19, %s3909_s13  ;;  %p3915_p3 = scmp.lt.s32.totalorder %s3909_s13, %s3909_s13 }
  0x78   :  { %p3916_p4 = por %p3915_p3, %p3914_p2 }
  0x7a   :  { %p3917_p5 = pnand %p3916_p4, %p3910_p1 }
  0x7c   :  { %3920 = shalt.err (!%p3917_p5)
}
  0x7d   :  { %180 = dma.hbm_to_vmem [thread:$0]  %s4988_s15, 32, %s175_s19, [#allocation23], %s4114_s29, %s4114_s29, %s4115_s30  }
  0x7e   :  { %s5011_s1 = sld [smem:[#allocation34_spill]] }
  0x84   :  { %s3921_s9 = scalar_lea.hbm %s5011_s1, 256 }
  0x85   :  { %p3922_p6 = scmp.ne.s32.totalorder %s5011_s1, %s3921_s9  ;;  %p3925_p7 = scmp.lt.u32.totalorder %s3921_s9, %s5011_s1 }
  0x87   :  { %p3927_p8 = pnand %p3925_p7, %p3922_p6 }
  0x89   :  { %3930 = shalt.err (!%p3927_p8)
}
  0x8a   :  { %s3931_s25 = scalar_lea.vmem %s39_s3, 256  ;;  %p3936_p10 = scmp.lt.s32.totalorder %s39_s3, %s39_s3 }
  0x8b   :  { %p3932_p9 = scmp.ne.s32.totalorder %s39_s3, %s3931_s25  ;;  %p3937_p11 = scmp.lt.s32.totalorder %s3931_s25, %s3931_s25 }
  0x8d   :  { %p3938_p12 = por %p3937_p11, %p3936_p10 }
  0x8f   :  { %p3939_p13 = pnand %p3938_p12, %p3932_p9 }
  0x91   :  { %3942 = shalt.err (!%p3939_p13)
}
  0x92   :  { %s4122_s15 = smov 128   ;;  %s4123_s19 = smov 8  }
  0x93   :  { %44 = dma.hbm_to_vmem [thread:$0]  %s5011_s1, 256, %s39_s3, [#allocation5], %s4122_s15, %s4122_s15, %s4123_s19  }
  0x94   :  { %s4124_s23 = smov [#allocation9]   ;;  %s4125_s4 = smov [#allocation12]  }
  0x95   :  { %s63_s27 = sshll.u32 %s4124_s23, 4  ;;  %s84_s13 = sshll.u32 %s4125_s4, 4  ;;  %s64_s27 = int_to_ptr.vmem [resolvable:$true] %s63_s27  ;;  %s85_s13 = int_to_ptr.vmem [resolvable:$true] %s84_s13 }
  0x96   :  { %s5012_s21 = sld [smem:[#allocation36_spill]] }
  0x9c   :  { %s3943_s20 = scalar_lea.hbm %s5012_s21, 16 }
  0x9d   :  { %p3944_p0 = scmp.ne.s32.totalorder %s5012_s21, %s3943_s20  ;;  %p3947_p1 = scmp.lt.u32.totalorder %s3943_s20, %s5012_s21 }
  0x9f   :  { %p3949_p2 = pnand %p3947_p1, %p3944_p0 }
  0xa1   :  { %3952 = shalt.err (!%p3949_p2)
}
  0xa2   :  { %s3953_s3 = scalar_lea.vmem %s64_s27, 16  ;;  %s3957_s1 = scalar_lea.vmem %s64_s27, 32 }
  0xa3   :  { %p3954_p3 = scmp.ne.s32.totalorder %s64_s27, %s3953_s3  ;;  %p3958_p4 = scmp.lt.s32.totalorder %s64_s27, %s64_s27 }
  0xa4   :  { %p3959_p5 = scmp.lt.s32.totalorder %s3957_s1, %s3953_s3 }
  0xa6   :  { %p3960_p6 = por %p3959_p5, %p3958_p4 }
  0xa8   :  { %p3961_p7 = pnand %p3960_p6, %p3954_p3 }
  0xaa   :  { %3964 = shalt.err (!%p3961_p7)
}
  0xab   :  { %66 = dma.hbm_to_vmem [thread:$0]  %s5012_s21, 16, %s64_s27, [#allocation8]  }
  0xac   :  { %s3965_s28 = scalar_lea.hbm %s4978_s5, 32 }
  0xad   :  { %p3966_p8 = scmp.ne.s32.totalorder %s4978_s5, %s3965_s28  ;;  %p3969_p9 = scmp.lt.u32.totalorder %s3965_s28, %s4978_s5 }
  0xaf   :  { %p3971_p10 = pnand %p3969_p9, %p3966_p8 }
  0xb1   :  { %3974 = shalt.err (!%p3971_p10)
}
  0xb2   :  { %s3975_s20 = scalar_lea.vmem %s85_s13, 32  ;;  %p3980_p12 = scmp.lt.s32.totalorder %s85_s13, %s85_s13 }
  0xb3   :  { %p3976_p11 = scmp.ne.s32.totalorder %s85_s13, %s3975_s20  ;;  %p3981_p13 = scmp.lt.s32.totalorder %s3975_s20, %s3975_s20 }
  0xb5   :  { %p3982_p0 = por %p3981_p13, %p3980_p12 }
  0xb7   :  { %p3983_p1 = pnand %p3982_p0, %p3976_p11 }
  0xb9   :  { %3986 = shalt.err (!%p3983_p1)
}
  0xba   :  { %90 = dma.hbm_to_vmem [thread:$0]  %s4978_s5, 32, %s85_s13, [#allocation11], %s4114_s29, %s4114_s29, %s4115_s30  }
  0xbb   :  { %s4126_s9 = smov [#allocation15]   ;;  %s4127_s18 = smov [#allocation18]  }
  0xbc   :  { %s110_s22 = sshll.u32 %s4126_s9, 4  ;;  %s136_s24 = sshll.u32 %s4127_s18, 4  ;;  %s111_s22 = int_to_ptr.vmem [resolvable:$true] %s110_s22  ;;  %s137_s24 = int_to_ptr.vmem [resolvable:$true] %s136_s24 }
  0xbd   :  { %s3987_s7 = scalar_lea.hbm %s4981_s8, 32 }
  0xbe   :  { %p3988_p2 = scmp.ne.s32.totalorder %s4981_s8, %s3987_s7  ;;  %p3991_p3 = scmp.lt.u32.totalorder %s3987_s7, %s4981_s8 }
  0xc0   :  { %p3993_p4 = pnand %p3991_p3, %p3988_p2 }
  0xc2   :  { %3996 = shalt.err (!%p3993_p4)
}
  0xc3   :  { %s3997_s5 = scalar_lea.vmem %s111_s22, 32  ;;  %p4002_p6 = scmp.lt.s32.totalorder %s111_s22, %s111_s22 }
  0xc4   :  { %p3998_p5 = scmp.ne.s32.totalorder %s111_s22, %s3997_s5  ;;  %p4003_p7 = scmp.lt.s32.totalorder %s3997_s5, %s3997_s5 }
  0xc6   :  { %p4004_p8 = por %p4003_p7, %p4002_p6 }
  0xc8   :  { %p4005_p9 = pnand %p4004_p8, %p3998_p5 }
  0xca   :  { %4008 = shalt.err (!%p4005_p9)
}
  0xcb   :  { %116 = dma.hbm_to_vmem [thread:$0]  %s4981_s8, 32, %s111_s22, [#allocation14], %s4114_s29, %s4114_s29, %s4115_s30  }
  0xcc   :  { %s4009_s2 = scalar_lea.hbm %s4984_s11, 32 }
  0xcd   :  { %p4010_p10 = scmp.ne.s32.totalorder %s4984_s11, %s4009_s2  ;;  %p4013_p11 = scmp.lt.u32.totalorder %s4009_s2, %s4984_s11 }
  0xcf   :  { %p4015_p12 = pnand %p4013_p11, %p4010_p10 }
  0xd1   :  { %4018 = shalt.err (!%p4015_p12)
}
  0xd2   :  { %s4019_s18 = scalar_lea.vmem %s137_s24, 32  ;;  %p4024_p0 = scmp.lt.s32.totalorder %s137_s24, %s137_s24 }
  0xd3   :  { %p4020_p13 = scmp.ne.s32.totalorder %s137_s24, %s4019_s18  ;;  %p4025_p1 = scmp.lt.s32.totalorder %s4019_s18, %s4019_s18 }
  0xd5   :  { %p4026_p2 = por %p4025_p1, %p4024_p0 }
  0xd7   :  { %p4027_p3 = pnand %p4026_p2, %p4020_p13 }
  0xd9   :  { %4030 = shalt.err (!%p4027_p3)
}
  0xda   :  { %142 = dma.hbm_to_vmem [thread:$0]  %s4984_s11, 32, %s137_s24, [#allocation17], %s4114_s29, %s4114_s29, %s4115_s30  }
  0xdb   :  { %s4128_s3 = smov [#allocation21]   ;;  %s4129_s7 = smov [#allocation24]  }
  0xdc   :  { %s162_s1 = sshll.u32 %s4128_s3, 4  ;;  %s189_s25 = sshll.u32 %s4129_s7, 4  ;;  %s163_s1 = int_to_ptr.vmem [resolvable:$true] %s162_s1  ;;  %s190_s25 = int_to_ptr.vmem [resolvable:$true] %s189_s25 }
  0xdd   :  { %s4031_s28 = scalar_lea.hbm %s4987_s14, 32 }
  0xde   :  { %p4032_p4 = scmp.ne.s32.totalorder %s4987_s14, %s4031_s28  ;;  %p4035_p5 = scmp.lt.u32.totalorder %s4031_s28, %s4987_s14 }
  0xe0   :  { %p4037_p6 = pnand %p4035_p5, %p4032_p4 }
  0xe2   :  { %4040 = shalt.err (!%p4037_p6)
}
  0xe3   :  { %s4041_s11 = scalar_lea.vmem %s163_s1, 32  ;;  %p4046_p8 = scmp.lt.s32.totalorder %s163_s1, %s163_s1 }
  0xe4   :  { %p4042_p7 = scmp.ne.s32.totalorder %s163_s1, %s4041_s11  ;;  %p4047_p9 = scmp.lt.s32.totalorder %s4041_s11, %s4041_s11 }
  0xe6   :  { %p4048_p10 = por %p4047_p9, %p4046_p8 }
  0xe8   :  { %p4049_p11 = pnand %p4048_p10, %p4042_p7 }
  0xea   :  { %4052 = shalt.err (!%p4049_p11)
}
  0xeb   :  { %168 = dma.hbm_to_vmem [thread:$0]  %s4987_s14, 32, %s163_s1, [#allocation20], %s4114_s29, %s4114_s29, %s4115_s30  }
  0xec   :  { %s4053_s27 = scalar_lea.hbm %s4990_s17, 16 }
  0xed   :  { %p4054_p12 = scmp.ne.s32.totalorder %s4990_s17, %s4053_s27  ;;  %p4057_p13 = scmp.lt.u32.totalorder %s4053_s27, %s4990_s17 }
  0xef   :  { %p4059_p0 = pnand %p4057_p13, %p4054_p12 }
  0xf1   :  { %4062 = shalt.err (!%p4059_p0)
}
  0xf2   :  { %s4063_s22 = scalar_lea.vmem %s190_s25, 16  ;;  %s4067_s3 = scalar_lea.vmem %s190_s25, 32 }
  0xf3   :  { %p4064_p1 = scmp.ne.s32.totalorder %s190_s25, %s4063_s22  ;;  %p4068_p2 = scmp.lt.s32.totalorder %s190_s25, %s190_s25 }
  0xf4   :  { %p4069_p3 = scmp.lt.s32.totalorder %s4067_s3, %s4063_s22 }
  0xf6   :  { %p4070_p4 = por %p4069_p3, %p4068_p2 }
  0xf8   :  { %p4071_p5 = pnand %p4070_p4, %p4064_p1 }
  0xfa   :  { %4074 = shalt.err (!%p4071_p5)
}
  0xfb   :  { %192 = dma.hbm_to_vmem [thread:$0]  %s4990_s17, 16, %s190_s25, [#allocation23]  }
  0xfc   :  { %4097 = dma.done.wait [#allocation5], 256  }
  0xfd   :  { %4098 = vsyncadd [#allocation5], 4294967040 }
  0xfe   :  { %4099 = dma.done.wait [#allocation8], 48  }
  0xff   :  { %4100 = vsyncadd [#allocation8], 4294967248 }
 0x100   :  { %4101 = dma.done.wait [#allocation11], 48  }
 0x101   :  { %4102 = vsyncadd [#allocation11], 4294967248 }
 0x102   :  { %4103 = dma.done.wait [#allocation14], 64  }
 0x103   :  { %4104 = vsyncadd [#allocation14], 4294967232 }
 0x104   :  { %4105 = dma.done.wait [#allocation17], 64  }
 0x105   :  { %4106 = vsyncadd [#allocation17], 4294967232 }
 0x106   :  { %4107 = dma.done.wait [#allocation20], 64  }
 0x107   :  { %4108 = vsyncadd [#allocation20], 4294967232 }
 0x108   :  { %4109 = dma.done.wait [#allocation23], 48  }
 0x109   :  { %4110 = vsyncadd [#allocation23], 4294967248  ;;  %vm241_vm0 = vcmask 261120   ;;  %v237_v0 = vld [vmem:[#allocation4] sm:$0xff]  ;;  %v238_v1 = vld [vmem:[#allocation4 + $0x8] sm:$0xff]  ;;  %s5013_s7 = sld [smem:[#allocation38_spill]] }
 0x10a   :  { %v242_v2 = vsel %vm241_vm0, %v237_v0, 0.0  ;;  %v245_v3 = vsel %vm241_vm0, %v238_v1, 0.0  ;;  %v4130_v15 = vmov 0.0   ;;  %vm4131_vm1 = vmmov 0   ;;  %v3151_v24 = vld [vmem:[#allocation9] ss:$0 sm:$0xff] }
 0x10b   :  { %243 = vadd.xlane.f32.xlu0 %v242_v2  ;;  %3357 = vmatprep.subr.bf16.mxu0 %v4130_v15  ;;  %v3152_v26 = vld [vmem:[#allocation10] ss:$0 sm:$0xff]  ;;  %v3153_v36 = vld [vmem:[#allocation12] ss:$0 sm:$0xff]  ;;  %s4132_s26 = smov 96   ;;  %vm364_vm2 = vcmask 64512  }
 0x10c   :  { %3361 = vmatprep.mubr.msk.bf16.mxu0 %vm4131_vm1, %v4130_v15  ;;  %3365 = vmatprep.subr.bf16.mxu1 %v4130_v15  ;;  %v4483_v50 = vld [vmem:[#allocation7] ss:$0 sm:$0xff]  ;;  %v4485_v55 = vld [vmem:[#allocation7 + $0x1] ss:$0 sm:$0xff]  ;;  %s4133_s28 = smov 64   ;;  %s4134_s5 = smov 88  }
 0x10d   :  { %3367 = vmatprep.mubr.msk.bf16.mxu1 %vm4131_vm1, %v4130_v15  ;;  %vm505_vm3 = vcmask 1043456   ;;  %s4135_s13 = smov 120   ;;  %s4136_s23 = smov 56   ;;  %vm831_vm4 = vcmask 130112   ;;  %vm1066_vm5 = vcmask 195712   ;;  %vm1301_vm6 = vcmask 261312  }
 0x10e   :  { %s4137_s4 = smov 80   ;;  %s4138_s11 = smov 112   ;;  %vm1546_vm7 = vcmask 523264   ;;  %vm3003_vm8 = vcmask 1041409  }
 0x10f   :  { %246 = vadd.xlane.f32.xlu0 %v245_v3  ;;  %v3669_v14 = vld [vmem:[%s5013_s7] sm:$0xff]   ;;  %v3670_v16 = vld [vmem:[%s5013_s7 + $0x8] sm:$0xff]   ;;  %s4139_s24 = smov 48   ;;  %s4140_s0 = smov 72  }
 0x110   :  { %3358 = vmatpush3.bf16.msra.mxu0 %v3669_v14  ;;  %s4141_s2 = smov 104   ;;  %s4142_s20 = smov 40  }
 0x111   :  { %3359 = vmatprep.subr.bf16.mxu0 %v4130_v15  ;;  %s4143_s8 = smov 24   ;;  %s5014_s15 = sld [smem:[#allocation39_spill]] }
 0x112   :  { %s5015_s22 = sld [smem:[#allocation40_spill]]  ;;  %s4144_s3 = smov [#allocation25]  }
 0x113   :  { %s3136_s14 = sshll.u32 %s4144_s3, 4  ;;  %s3137_s14 = int_to_ptr.vmem [resolvable:$true] %s3136_s14 }
 0x114   :  { %3360 = vmatpush3.bf16.msra.mxu0 %v3670_v16  ;;  %s4075_s30 = scalar_lea.vmem %s3137_s14, 32  ;;  %p4080_p7 = scmp.lt.s32.totalorder %s3137_s14, %s3137_s14 }
 0x115   :  { %3371 = vmatprep.subr.bf16.mxu0 %v4130_v15  ;;  %p4076_p6 = scmp.ne.s32.totalorder %s3137_s14, %s4075_s30  ;;  %p4081_p8 = scmp.lt.s32.totalorder %s4075_s30, %s4075_s30 }
 0x117   :  { %p4082_p9 = por %p4081_p8, %p4080_p7 }
 0x119   :  { %p4083_p10 = pnand %p4082_p9, %p4076_p6 }
 0x198   :  { %v244_v4 = vpop.xlane.xlu0 %243 }
 0x199   :  { %v249_v5 = vmul.f32 0.03125, %v244_v4 }
 0x19b   :  { %v251_v6 = vsub.f32 %v237_v0, %v249_v5 }
 0x19c   :  { %v247_v7 = vpop.xlane.xlu0 %246 }
 0x19d   :  { %v250_v8 = vmul.f32 0.03125, %v247_v7  ;;  %v253_v9 = vmul.f32 %v251_v6, %v251_v6 }
 0x19f   :  { %v252_v10 = vsub.f32 %v238_v1, %v250_v8  ;;  %v255_v11 = vsel %vm241_vm0, %v253_v9, 0.0 }
 0x1a0   :  { %256 = vadd.xlane.f32.xlu1 %v255_v11 }
 0x1a1   :  { %v254_v12 = vmul.f32 %v252_v10, %v252_v10 }
 0x1a3   :  { %v258_v13 = vsel %vm241_vm0, %v254_v12, 0.0 }
 0x1a4   :  { %259 = vadd.xlane.f32.xlu1 %v258_v13 }
 0x22d   :  { %v257_v17 = vpop.xlane.xlu1 %256 }
 0x22e   :  { %v261_v18 = vmul.f32 0.03125, %v257_v17 }
 0x230   :  { %v263_v19 = vadd.f32 1e-12, %v261_v18 }
 0x231   :  { %v260_v20 = vpop.xlane.xlu1 %259 }
 0x232   :  { %3693 = vrsqrt.f32 %v263_v19  ;;  %v262_v21 = vmul.f32 0.03125, %v260_v20 }
 0x234   :  { %v264_v22 = vadd.f32 1e-12, %v262_v21 }
 0x236   :  { %3695 = vrsqrt.f32 %v264_v22 }
 0x23c   :  { %v3694_v23 = vpop.eup %3693 }
 0x23d   :  { %v267_v25 = vmul.f32 %v3694_v23, %v251_v6 }
 0x23f   :  { %v275_v27 = vmul.f32 %v3151_v24, %v267_v25 }
 0x240   :  { %v3696_v28 = vpop.eup %3695 }
 0x241   :  { %v283_v29 = vadd.f32 %v3152_v26, %v275_v27  ;;  %v268_v30 = vmul.f32 %v3696_v28, %v252_v10 }
 0x243   :  { %285 = vst.msk [vmem:[#allocation2] sm:$0xff] %vm241_vm0, %v283_v29  ;;  %v276_v31 = vmul.f32 %v3151_v24, %v268_v30 }
 0x245   :  { %v284_v32 = vadd.f32 %v3152_v26, %v276_v31 }
 0x247   :  { %286 = vst.msk [vmem:[#allocation2 + $0x8] sm:$0xff] %vm241_vm0, %v284_v32 }
 0x24a   :  { %v4454_v33 = vld [vmem:[#allocation2] sm:$0xff] }
 0x24e   :  { %v4456_v34 = vld [vmem:[#allocation2 + $0x8] sm:$0xff] }
 0x24f   :  { %v296_v35 = vpack.c.bf16 %v4456_v34, %v4454_v33 }
 0x251   :  { %3362 = vmatmul.mubr.msk.bf16.vlgmr.msra.gmra.mrb[0].mxu0 %vm241_vm0, %v296_v35 }
 0x252   :  { %3373 = vmatprep.mubr.msk.bf16.mxu0 %vm4131_vm1, %v4130_v15 }
 0x324   :  { %v352_v37 = vpop.f32.mrb[0].mxu0 }
 0x325   :  { %v353_v38 = vadd.f32 %v3153_v36, %v352_v37  ;;  %v3363_v39 = vpop.f32.mrb[1].mxu0 }
 0x326   :  { %v355_v40 = vpop.f32.mrb[2].mxu0 }
 0x327   :  { %v4463_v41 = vpack.c.bf16 %v353_v38, %v353_v38  ;;  %v356_v42 = vadd.f32 %v3153_v36, %v355_v40  ;;  %v3364_v43 = vpop.f32.mrb[3].mxu0 }
 0x329   :  { %v4465_v44 = vpack.c.bf16 %v356_v42, %v356_v42  ;;  %362 = vrot.lane.b32.xlu0 %v4463_v41, %s4132_s26 }
 0x32b   :  { %412 = vrot.lane.b32.xlu1 %v4465_v44, %s4132_s26 }
 0x39b   :  { %v363_v45 = vpop.permute.xlu0 %362 }
 0x39c   :  { %v369_v46 = vsel %vm364_vm2, %v363_v45, 0 }
 0x39d   :  { %3366 = vmatpush3.bf16.xpose.msra.mxu1 %v369_v46  ;;  %v413_v47 = vpop.permute.xlu1 %412 }
 0x39e   :  { %v418_v48 = vsel %vm364_vm2, %v413_v47, 0  ;;  %3377 = vmatprep.subr.bf16.mxu1 %v4130_v15 }
 0x39f   :  { %3372 = vmatpush3.bf16.xpose.msra.mxu0 %v418_v48 }
 0x3a0   :  { %3383 = vmatprep.subr.bf16.mxu0 %v4130_v15 }
 0x3a4   :  { %3368 = vmatmul.mubr.msk.bf16.vlgmr.msra.gmra.mrb[0].mxu1 %vm364_vm2, %v4463_v41 }
 0x3a5   :  { %3379 = vmatprep.mubr.msk.bf16.mxu1 %vm4131_vm1, %v4130_v15 }
 0x3a6   :  { %3374 = vmatmul.mubr.msk.bf16.vlgmr.msra.gmra.mrb[4].mxu0 %vm364_vm2, %v4465_v44 }
 0x3a7   :  { %3385 = vmatprep.mubr.msk.bf16.mxu0 %vm4131_vm1, %v4130_v15 }
 0x477   :  { %v405_v49 = vpop.f32.mrb[0].mxu1 }
 0x478   :  { %v460_v51 = vmul.f32 0.35355338, %v405_v49  ;;  %v3369_v52 = vpop.f32.mrb[1].mxu1 }
 0x479   :  { %v408_v53 = vpop.f32.mrb[2].mxu1  ;;  %v454_v54 = vpop.f32.mrb[4].mxu0 }
 0x47a   :  { %v461_v56 = vmul.f32 0.35355338, %v454_v54  ;;  %v3370_v57 = vpop.f32.mrb[3].mxu1  ;;  %v3375_v58 = vpop.f32.mrb[5].mxu0  ;;  %v474_v59 = vadd.f32 %v4483_v50, %v460_v51 }
 0x47b   :  { %v457_v60 = vpop.f32.mrb[6].mxu0 }
 0x47c   :  { %v3376_v61 = vpop.f32.mrb[7].mxu0  ;;  %v476_v62 = vsel %vm364_vm2, %v474_v59, -inf  ;;  %v475_v63 = vadd.f32 %v4485_v55, %v461_v56 }
 0x47d   :  { %477 = vmax.xlane.f32.xlu1 %v476_v62 }
 0x47e   :  { %v479_v0 = vsel %vm364_vm2, %v475_v63, -inf }
 0x47f   :  { %480 = vmax.xlane.f32.xlu0 %v479_v0 }
 0x48e   :  { %549 = vrot.lane.b32.xlu1 %v4465_v44, %s4133_s28 }
 0x492   :  { %601 = vrot.lane.b32.xlu1 %v4463_v41, %s4134_s5 }
 0x50a   :  { %v478_v1 = vpop.xlane.xlu1 %477 }
 0x50b   :  { %v482_v2 = vsub.f32 %v474_v59, %v478_v1 }
 0x50c   :  { %v481_v3 = vpop.xlane.xlu0 %480 }
 0x50d   :  { %v484_v4 = vmul.f32 1.442695, %v482_v2  ;;  %v483_v5 = vsub.f32 %v475_v63, %v481_v3 }
 0x50e   :  { %v550_v6 = vpop.permute.xlu1 %549 }
 0x50f   :  { %3697 = vpow2.f32 %v484_v4  ;;  %v486_v7 = vmul.f32 1.442695, %v483_v5  ;;  %v555_v8 = vsel %vm505_vm3, %v550_v6, 0 }
 0x510   :  { %3384 = vmatpush3.bf16.msra.mxu0 %v555_v8 }
 0x511   :  { %3699 = vpow2.f32 %v486_v7  ;;  %3395 = vmatprep.subr.bf16.mxu0 %v4130_v15 }
 0x512   :  { %v602_v13 = vpop.permute.xlu1 %601 }
 0x513   :  { %v607_v25 = vsel %vm364_vm2, %v602_v13, 0 }
 0x519   :  { %v3698_v9 = vpop.eup %3697 }
 0x51a   :  { %v488_v10 = vsel %vm364_vm2, %v3698_v9, 0.0 }
 0x51b   :  { %v3700_v11 = vpop.eup %3699  ;;  %489 = vadd.xlane.f32.xlu0 %v488_v10 }
 0x51c   :  { %v491_v12 = vsel %vm364_vm2, %v3700_v11, 0.0 }
 0x51d   :  { %492 = vadd.xlane.f32.xlu1 %v491_v12 }
 0x52e   :  { %651 = vrot.lane.b32.xlu1 %v4465_v44, %s4134_s5 }
 0x531   :  { %500 = vrot.lane.b32.xlu0 %v4463_v41, %s4133_s28 }
 0x532   :  { %649 = vrot.lane.b32.xlu1 %v4465_v44, %s4135_s13 }
 0x535   :  { %599 = vrot.lane.b32.xlu0 %v4463_v41, %s4135_s13 }
 0x5a8   :  { %v490_v14 = vpop.xlane.xlu0 %489 }
 0x5a9   :  { %3701 = vrcp.f32 %v490_v14 }
 0x5aa   :  { %v493_v16 = vpop.xlane.xlu1 %492 }
 0x5ab   :  { %3703 = vrcp.f32 %v493_v16 }
 0x5ac   :  { %v501_v17 = vpop.permute.xlu0 %500 }
 0x5ad   :  { %v507_v18 = vsel %vm505_vm3, %v501_v17, 0 }
 0x5ae   :  { %3378 = vmatpush3.bf16.msra.mxu1 %v507_v18  ;;  %v652_v24 = vpop.permute.xlu1 %651 }
 0x5af   :  { %3389 = vmatprep.subr.bf16.mxu1 %v4130_v15  ;;  %v657_v27 = vsel %vm364_vm2, %v652_v24, 0 }
 0x5b0   :  { %v600_v28 = vpop.permute.xlu0 %599 }
 0x5b2   :  { %v650_v29 = vpop.permute.xlu1 %649 }
 0x5b3   :  { %v3702_v19 = vpop.eup %3701 }
 0x5b4   :  { %v496_v20 = vmul.f32 %v3702_v19, %v3698_v9 }
 0x5b5   :  { %v3704_v21 = vpop.eup %3703 }
 0x5b6   :  { %v497_v22 = vmul.f32 %v3704_v21, %v3700_v11  ;;  %v498_v23 = vpack.c.bf16 %v496_v20, %v496_v20 }
 0x5b8   :  { %3380 = vmatmul.mubr.msk.bf16.vlgmr.msra.gmra.mrb[4].mxu1 %vm364_vm2, %v498_v23  ;;  %v499_v26 = vpack.c.bf16 %v497_v22, %v497_v22 }
 0x5b9   :  { %3390 = vmatpush3.bf16.xpose.msra.mxu1 %v607_v25  ;;  %3391 = vmatprep.mubr.msk.bf16.mxu1 %vm4131_vm1, %v4130_v15 }
 0x5ba   :  { %3386 = vmatmul.mubr.msk.bf16.vlgmr.msra.gmra.mrb[8].mxu0 %vm364_vm2, %v499_v26  ;;  %3401 = vmatprep.subr.bf16.mxu1 %v4130_v15 }
 0x5bb   :  { %3396 = vmatpush3.bf16.xpose.msra.mxu0 %v657_v27  ;;  %3397 = vmatprep.mubr.msk.bf16.mxu0 %vm4131_vm1, %v4130_v15 }
 0x5bc   :  { %3407 = vmatprep.subr.bf16.mxu0 %v4130_v15 }
 0x5c0   :  { %3392 = vmatmul.mubr.msk.bf16.vlgmr.msra.gmra.mrb[8].mxu1 %vm364_vm2, %v600_v28 }
 0x5c1   :  { %3403 = vmatprep.mubr.msk.bf16.mxu1 %vm4131_vm1, %v4130_v15 }
 0x5c2   :  { %3398 = vmatmul.mubr.msk.bf16.vlgmr.msra.gmra.mrb[12].mxu0 %vm364_vm2, %v650_v29 }
 0x5c3   :  { %3409 = vmatprep.mubr.msk.bf16.mxu0 %vm4131_vm1, %v4130_v15 }
 0x68b   :  { %v543_v30 = vpop.f32.mrb[4].mxu1 }
 0x68c   :  { %597 = vst.msk [vmem:[#allocation3] sm:$0xff] %vm364_vm2, %v543_v30  ;;  %v3381_v31 = vpop.f32.mrb[5].mxu1 }
 0x68d   :  { %v546_v32 = vpop.f32.mrb[6].mxu1  ;;  %v591_v35 = vpop.f32.mrb[8].mxu0 }
 0x68e   :  { %598 = vst.msk [vmem:[#allocation3 + $0x8] sm:$0xff] %vm364_vm2, %v591_v35  ;;  %v3382_v36 = vpop.f32.mrb[7].mxu1  ;;  %v3387_v37 = vpop.f32.mrb[9].mxu0 }
 0x68f   :  { %v594_v38 = vpop.f32.mrb[10].mxu0 }
 0x690   :  { %v3388_v39 = vpop.f32.mrb[11].mxu0 }
 0x693   :  { %v643_v40 = vpop.f32.mrb[8].mxu1 }
 0x694   :  { %v699_v42 = vmul.f32 0.35355338, %v643_v40  ;;  %v3393_v43 = vpop.f32.mrb[9].mxu1 }
 0x695   :  { %v646_v45 = vpop.f32.mrb[10].mxu1  ;;  %v693_v46 = vpop.f32.mrb[12].mxu0 }
 0x696   :  { %v700_v47 = vmul.f32 0.35355338, %v693_v46  ;;  %v3394_v48 = vpop.f32.mrb[11].mxu1  ;;  %v3399_v49 = vpop.f32.mrb[13].mxu0  ;;  %v701_v51 = vadd.f32 %v4483_v50, %v699_v42 }
 0x697   :  { %v696_v52 = vpop.f32.mrb[14].mxu0 }
 0x698   :  { %v3400_v53 = vpop.f32.mrb[15].mxu0  ;;  %v703_v54 = vsel %vm364_vm2, %v701_v51, -inf  ;;  %v702_v56 = vadd.f32 %v4485_v55, %v700_v47 }
 0x699   :  { %704 = vmax.xlane.f32.xlu0 %v703_v54 }
 0x69a   :  { %v706_v57 = vsel %vm364_vm2, %v702_v56, -inf }
 0x69b   :  { %707 = vmax.xlane.f32.xlu1 %v706_v57 }
 0x6ac   :  { %775 = vrot.lane.b32.xlu1 %v4465_v44, %s4136_s23 }
 0x6b0   :  { %836 = vrot.lane.b32.xlu1 %v4463_v41, %s4137_s4 }
 0x6b4   :  { %886 = vrot.lane.b32.xlu1 %v4465_v44, %s4137_s4 }
 0x6b8   :  { %884 = vrot.lane.b32.xlu1 %v4465_v44, %s4138_s11 }
 0x726   :  { %v705_v58 = vpop.xlane.xlu0 %704 }
 0x727   :  { %v709_v59 = vsub.f32 %v701_v51, %v705_v58 }
 0x728   :  { %v708_v60 = vpop.xlane.xlu1 %707 }
 0x729   :  { %v711_v61 = vmul.f32 1.442695, %v709_v59  ;;  %v710_v62 = vsub.f32 %v702_v56, %v708_v60 }
 0x72b   :  { %3705 = vpow2.f32 %v711_v61  ;;  %v713_v63 = vmul.f32 1.442695, %v710_v62 }
 0x72c   :  { %v776_v0 = vpop.permute.xlu1 %775 }
 0x72d   :  { %3707 = vpow2.f32 %v713_v63  ;;  %v781_v1 = vsel %vm505_vm3, %v776_v0, 0 }
 0x72e   :  { %3408 = vmatpush3.bf16.msra.mxu0 %v781_v1 }
 0x72f   :  { %3419 = vmatprep.subr.bf16.mxu0 %v4130_v15 }
 0x730   :  { %v837_v11 = vpop.permute.xlu1 %836 }
 0x731   :  { %v842_v18 = vsel %vm364_vm2, %v837_v11, 0 }
 0x734   :  { %v887_v17 = vpop.permute.xlu1 %886 }
 0x735   :  { %v3706_v2 = vpop.eup %3705  ;;  %v892_v20 = vsel %vm364_vm2, %v887_v17, 0 }
 0x736   :  { %v715_v3 = vsel %vm364_vm2, %v3706_v2, 0.0 }
 0x737   :  { %v3708_v4 = vpop.eup %3707  ;;  %716 = vadd.xlane.f32.xlu0 %v715_v3 }
 0x738   :  { %v718_v5 = vsel %vm364_vm2, %v3708_v4, 0.0  ;;  %v885_v22 = vpop.permute.xlu1 %884 }
 0x73b   :  { %719 = vadd.xlane.f32.xlu0 %v718_v5 }
 0x751   :  { %727 = vrot.lane.b32.xlu0 %v4463_v41, %s4136_s23 }
 0x755   :  { %834 = vrot.lane.b32.xlu0 %v4463_v41, %s4138_s11 }
 0x7c4   :  { %v717_v6 = vpop.xlane.xlu0 %716 }
 0x7c5   :  { %3709 = vrcp.f32 %v717_v6 }
 0x7c8   :  { %v720_v7 = vpop.xlane.xlu0 %719 }
 0x7c9   :  { %3711 = vrcp.f32 %v720_v7 }
 0x7cc   :  { %v728_v8 = vpop.permute.xlu0 %727 }
 0x7cd   :  { %v733_v9 = vsel %vm505_vm3, %v728_v8, 0 }
 0x7ce   :  { %3402 = vmatpush3.bf16.msra.mxu1 %v733_v9 }
 0x7cf   :  { %v3710_v10 = vpop.eup %3709  ;;  %3413 = vmatprep.subr.bf16.mxu1 %v4130_v15 }
 0x7d0   :  { %v723_v12 = vmul.f32 %v3710_v10, %v3706_v2  ;;  %v835_v21 = vpop.permute.xlu0 %834 }
 0x7d2   :  { %v725_v13 = vpack.c.bf16 %v723_v12, %v723_v12 }
 0x7d3   :  { %v3712_v14 = vpop.eup %3711 }
 0x7d4   :  { %v724_v16 = vmul.f32 %v3712_v14, %v3708_v4  ;;  %3404 = vmatmul.mubr.msk.bf16.vlgmr.msra.gmra.mrb[12].mxu1 %vm364_vm2, %v725_v13 }
 0x7d5   :  { %3415 = vmatprep.mubr.msk.bf16.mxu1 %vm4131_vm1, %v4130_v15 }
 0x7d6   :  { %v726_v19 = vpack.c.bf16 %v724_v16, %v724_v16 }
 0x7d7   :  { %3414 = vmatpush3.bf16.xpose.msra.mxu1 %v842_v18 }
 0x7d8   :  { %3410 = vmatmul.mubr.msk.bf16.vlgmr.msra.gmra.mrb[16].mxu0 %vm364_vm2, %v726_v19  ;;  %3425 = vmatprep.subr.bf16.mxu1 %v4130_v15 }
 0x7d9   :  { %3420 = vmatpush3.bf16.xpose.msra.mxu0 %v892_v20  ;;  %3421 = vmatprep.mubr.msk.bf16.mxu0 %vm4131_vm1, %v4130_v15 }
 0x7da   :  { %3431 = vmatprep.subr.bf16.mxu0 %v4130_v15 }
 0x7de   :  { %3416 = vmatmul.mubr.msk.bf16.vlgmr.msra.gmra.mrb[16].mxu1 %vm364_vm2, %v835_v21 }
 0x7df   :  { %3427 = vmatprep.mubr.msk.bf16.mxu1 %vm4131_vm1, %v4130_v15 }
 0x7e0   :  { %3422 = vmatmul.mubr.msk.bf16.vlgmr.msra.gmra.mrb[20].mxu0 %vm364_vm2, %v885_v22 }
 0x7e1   :  { %3433 = vmatprep.mubr.msk.bf16.mxu0 %vm4131_vm1, %v4130_v15 }
 0x8a7   :  { %v4565_v23 = vpop.f32.mrb[12].mxu1 }
 0x8a8   :  { %v3405_v24 = vpop.f32.mrb[13].mxu1 }
 0x8a9   :  { %v772_v25 = vpop.f32.mrb[14].mxu1 }
 0x8aa   :  { %v3406_v26 = vpop.f32.mrb[15].mxu1 }
 0x8ab   :  { %v4567_v27 = vpop.f32.mrb[16].mxu0 }
 0x8ac   :  { %v3411_v28 = vpop.f32.mrb[17].mxu0 }
 0x8ad   :  { %v820_v29 = vpop.f32.mrb[18].mxu0 }
 0x8ae   :  { %v3412_v30 = vpop.f32.mrb[19].mxu0 }
 0x8b1   :  { %v878_v31 = vpop.f32.mrb[16].mxu1 }
 0x8b2   :  { %v934_v32 = vmul.f32 0.35355338, %v878_v31  ;;  %v3417_v35 = vpop.f32.mrb[17].mxu1 }
 0x8b3   :  { %v881_v36 = vpop.f32.mrb[18].mxu1  ;;  %v928_v37 = vpop.f32.mrb[20].mxu0 }
 0x8b4   :  { %v935_v38 = vmul.f32 0.35355338, %v928_v37  ;;  %v3418_v39 = vpop.f32.mrb[19].mxu1  ;;  %v3423_v40 = vpop.f32.mrb[21].mxu0  ;;  %v936_v42 = vadd.f32 %v4483_v50, %v934_v32 }
 0x8b5   :  { %v931_v43 = vpop.f32.mrb[22].mxu0 }
 0x8b6   :  { %v3424_v45 = vpop.f32.mrb[23].mxu0  ;;  %v938_v46 = vsel %vm364_vm2, %v936_v42, -inf  ;;  %v937_v47 = vadd.f32 %v4485_v55, %v935_v38 }
 0x8b7   :  { %939 = vmax.xlane.f32.xlu0 %v938_v46 }
 0x8b8   :  { %v941_v48 = vsel %vm364_vm2, %v937_v47, -inf }
 0x8b9   :  { %942 = vmax.xlane.f32.xlu1 %v941_v48 }
 0x8ca   :  { %1010 = vrot.lane.b32.xlu1 %v4465_v44, %s4139_s24 }
 0x8ce   :  { %1071 = vrot.lane.b32.xlu1 %v4463_v41, %s4140_s0 }
 0x8d2   :  { %1121 = vrot.lane.b32.xlu1 %v4465_v44, %s4140_s0 }
 0x8d6   :  { %1119 = vrot.lane.b32.xlu1 %v4465_v44, %s4141_s2 }
 0x944   :  { %v940_v49 = vpop.xlane.xlu0 %939 }
 0x945   :  { %v944_v51 = vsub.f32 %v936_v42, %v940_v49 }
 0x946   :  { %v943_v52 = vpop.xlane.xlu1 %942 }
 0x947   :  { %v946_v53 = vmul.f32 1.442695, %v944_v51  ;;  %v945_v54 = vsub.f32 %v937_v47, %v943_v52 }
 0x949   :  { %3713 = vpow2.f32 %v946_v53  ;;  %v948_v56 = vmul.f32 1.442695, %v945_v54 }
 0x94a   :  { %v1011_v57 = vpop.permute.xlu1 %1010 }
 0x94b   :  { %3715 = vpow2.f32 %v948_v56  ;;  %v1016_v58 = vsel %vm505_vm3, %v1011_v57, 0 }
 0x94c   :  { %3432 = vmatpush3.bf16.msra.mxu0 %v1016_v58 }
 0x94d   :  { %3443 = vmatprep.subr.bf16.mxu0 %v4130_v15 }
 0x94e   :  { %v1072_v4 = vpop.permute.xlu1 %1071 }
 0x94f   :  { %v1077_v10 = vsel %vm364_vm2, %v1072_v4, 0 }
 0x952   :  { %v1122_v9 = vpop.permute.xlu1 %1121 }
 0x953   :  { %v3714_v59 = vpop.eup %3713  ;;  %v1127_v12 = vsel %vm364_vm2, %v1122_v9, 0 }
 0x954   :  { %v950_v60 = vsel %vm364_vm2, %v3714_v59, 0.0 }
 0x955   :  { %v3716_v61 = vpop.eup %3715  ;;  %951 = vadd.xlane.f32.xlu0 %v950_v60 }
 0x956   :  { %v953_v62 = vsel %vm364_vm2, %v3716_v61, 0.0  ;;  %v1120_v14 = vpop.permute.xlu1 %1119 }
 0x959   :  { %954 = vadd.xlane.f32.xlu0 %v953_v62 }
 0x96f   :  { %962 = vrot.lane.b32.xlu0 %v4463_v41, %s4139_s24 }
 0x973   :  { %1069 = vrot.lane.b32.xlu0 %v4463_v41, %s4141_s2 }
 0x9e2   :  { %v952_v63 = vpop.xlane.xlu0 %951 }
 0x9e3   :  { %3717 = vrcp.f32 %v952_v63 }
 0x9e6   :  { %v955_v0 = vpop.xlane.xlu0 %954 }
 0x9e7   :  { %3719 = vrcp.f32 %v955_v0 }
 0x9ea   :  { %v963_v1 = vpop.permute.xlu0 %962 }
 0x9eb   :  { %v968_v2 = vsel %vm505_vm3, %v963_v1, 0 }
 0x9ec   :  { %3426 = vmatpush3.bf16.msra.mxu1 %v968_v2  ;;  %v3671_v2 = vld [vmem:[%s4979_s6] sm:$0xff]  }
 0x9ed   :  { %v3718_v3 = vpop.eup %3717  ;;  %3437 = vmatprep.subr.bf16.mxu1 %v4130_v15 }
 0x9ee   :  { %v958_v5 = vmul.f32 %v3718_v3, %v3714_v59  ;;  %v1070_v13 = vpop.permute.xlu0 %1069  ;;  %v3672_v3 = vld [vmem:[%s4979_s6 + $0x8] sm:$0xff]  }
 0x9f0   :  { %v960_v6 = vpack.c.bf16 %v958_v5, %v958_v5 }
 0x9f1   :  { %v3720_v7 = vpop.eup %3719 }
 0x9f2   :  { %v959_v8 = vmul.f32 %v3720_v7, %v3716_v61  ;;  %3428 = vmatmul.mubr.msk.bf16.vlgmr.msra.gmra.mrb[20].mxu1 %vm364_vm2, %v960_v6 }
 0x9f3   :  { %3439 = vmatprep.mubr.msk.bf16.mxu1 %vm4131_vm1, %v4130_v15 }
 0x9f4   :  { %v961_v11 = vpack.c.bf16 %v959_v8, %v959_v8 }
 0x9f5   :  { %3438 = vmatpush3.bf16.xpose.msra.mxu1 %v1077_v10 }
 0x9f6   :  { %3434 = vmatmul.mubr.msk.bf16.vlgmr.msra.gmra.mrb[24].mxu0 %vm364_vm2, %v961_v11  ;;  %3449 = vmatprep.subr.bf16.mxu1 %v4130_v15 }
 0x9f7   :  { %3444 = vmatpush3.bf16.xpose.msra.mxu0 %v1127_v12  ;;  %3445 = vmatprep.mubr.msk.bf16.mxu0 %vm4131_vm1, %v4130_v15 }
 0x9f8   :  { %3455 = vmatprep.subr.bf16.mxu0 %v4130_v15 }
 0x9fc   :  { %3440 = vmatmul.mubr.msk.bf16.vlgmr.msra.gmra.mrb[24].mxu1 %vm364_vm2, %v1070_v13 }
 0x9fd   :  { %3451 = vmatprep.mubr.msk.bf16.mxu1 %vm4131_vm1, %v4130_v15 }
 0x9fe   :  { %3446 = vmatmul.mubr.msk.bf16.vlgmr.msra.gmra.mrb[28].mxu0 %vm364_vm2, %v1120_v14 }
 0x9ff   :  { %3457 = vmatprep.mubr.msk.bf16.mxu0 %vm4131_vm1, %v4130_v15 }
 0xac5   :  { %v1004_v16 = vpop.f32.mrb[20].mxu1 }
 0xac6   :  { %v3429_v17 = vpop.f32.mrb[21].mxu1 }
 0xac7   :  { %v1007_v18 = vpop.f32.mrb[22].mxu1 }
 0xac8   :  { %v3430_v19 = vpop.f32.mrb[23].mxu1  ;;  %v3175_v18 = vld [vmem:[#allocation13] ss:$0 sm:$0xff] }
 0xac9   :  { %v1052_v20 = vpop.f32.mrb[24].mxu0 }
 0xaca   :  { %v3435_v21 = vpop.f32.mrb[25].mxu0 }
 0xacb   :  { %v1055_v22 = vpop.f32.mrb[26].mxu0 }
 0xacc   :  { %v3436_v24 = vpop.f32.mrb[27].mxu0 }
 0xacf   :  { %v1113_v25 = vpop.f32.mrb[24].mxu1 }
 0xad0   :  { %v1169_v26 = vmul.f32 0.35355338, %v1113_v25  ;;  %v3441_v28 = vpop.f32.mrb[25].mxu1 }
 0xad1   :  { %v1116_v29 = vpop.f32.mrb[26].mxu1  ;;  %v1163_v30 = vpop.f32.mrb[28].mxu0 }
 0xad2   :  { %v1170_v31 = vmul.f32 0.35355338, %v1163_v30  ;;  %v3442_v32 = vpop.f32.mrb[27].mxu1  ;;  %v3447_v35 = vpop.f32.mrb[29].mxu0  ;;  %v1171_v36 = vadd.f32 %v4483_v50, %v1169_v26 }
 0xad3   :  { %v1166_v37 = vpop.f32.mrb[30].mxu0 }
 0xad4   :  { %v3448_v38 = vpop.f32.mrb[31].mxu0  ;;  %v1173_v39 = vsel %vm364_vm2, %v1171_v36, -inf  ;;  %v1172_v40 = vadd.f32 %v4485_v55, %v1170_v31 }
 0xad5   :  { %1174 = vmax.xlane.f32.xlu0 %v1173_v39 }
 0xad6   :  { %v1176_v42 = vsel %vm364_vm2, %v1172_v40, -inf }
 0xad7   :  { %1177 = vmax.xlane.f32.xlu1 %v1176_v42 }
 0xae8   :  { %1245 = vrot.lane.b32.xlu1 %v4465_v44, %s4142_s20 }
 0xaec   :  { %825 = vrot.lane.b32.xlu1 %v4565_v23, %s4123_s19 }
 0xaf0   :  { %827 = vrot.lane.b32.xlu1 %v4567_v27, %s4123_s19 }
 0xaf4   :  { %1062 = vrot.lane.b32.xlu1 %v1052_v20, %s4114_s29 }
 0xb62   :  { %v1175_v50 = vpop.xlane.xlu0 %1174 }
 0xb63   :  { %v1179_v43 = vsub.f32 %v1171_v36, %v1175_v50  ;;  %v3674_v50 = vld [vmem:[%s4983_s10 + $0x8] sm:$0xff]  }
 0xb64   :  { %v1178_v45 = vpop.xlane.xlu1 %1177 }
 0xb65   :  { %v1181_v55 = vmul.f32 1.442695, %v1179_v43  ;;  %v1180_v46 = vsub.f32 %v1172_v40, %v1178_v45 }
 0xb67   :  { %3721 = vpow2.f32 %v1181_v55  ;;  %v1183_v47 = vmul.f32 1.442695, %v1180_v46 }
 0xb68   :  { %v1246_v48 = vpop.permute.xlu1 %1245 }
 0xb69   :  { %3723 = vpow2.f32 %v1183_v47  ;;  %v1251_v49 = vsel %vm505_vm3, %v1246_v48, 0 }
 0xb6a   :  { %3456 = vmatpush3.bf16.msra.mxu0 %v1251_v49 }
 0xb6b   :  { %3469 = vmatprep.subr.bf16.mxu0 %v4130_v15 }
 0xb6c   :  { %v826_v44 = vpop.permute.xlu1 %825 }
 0xb6d   :  { %832 = vst.msk [vmem:[#allocation3] sm:$0xff] %vm831_vm4, %v826_v44 }
 0xb70   :  { %v828_v23 = vpop.permute.xlu1 %827 }
 0xb71   :  { %v3722_v27 = vpop.eup %3721  ;;  %833 = vst.msk [vmem:[#allocation3 + $0x8] sm:$0xff] %vm831_vm4, %v828_v23  ;;  %v3179_v23 = vld [vmem:[#allocation15] ss:$0 sm:$0xff] }
 0xb72   :  { %v1185_v51 = vsel %vm364_vm2, %v3722_v27, 0.0 }
 0xb73   :  { %v3724_v52 = vpop.eup %3723  ;;  %1186 = vadd.xlane.f32.xlu0 %v1185_v51 }
 0xb74   :  { %v1063_v53 = vpop.permute.xlu1 %1062  ;;  %v1188_v54 = vsel %vm364_vm2, %v3724_v52, 0.0 }
 0xb75   :  { %1068 = vst.msk [vmem:[#allocation3 + $0x8] sm:$0xff] %vm1066_vm5, %v1063_v53  ;;  %v3180_v53 = vld [vmem:[#allocation16] ss:$0 sm:$0xff] }
 0xb77   :  { %1189 = vadd.xlane.f32.xlu0 %v1188_v54 }
 0xb8d   :  { %1197 = vrot.lane.b32.xlu0 %v4463_v41, %s4142_s20 }
 0xb91   :  { %1060 = vrot.lane.b32.xlu0 %v1004_v16, %s4114_s29 }
 0xc00   :  { %v1187_v56 = vpop.xlane.xlu0 %1186 }
 0xc01   :  { %3725 = vrcp.f32 %v1187_v56 }
 0xc04   :  { %v1190_v57 = vpop.xlane.xlu0 %1189 }
 0xc05   :  { %3727 = vrcp.f32 %v1190_v57 }
 0xc08   :  { %v1198_v58 = vpop.permute.xlu0 %1197 }
 0xc09   :  { %v1203_v59 = vsel %vm505_vm3, %v1198_v58, 0 }
 0xc0a   :  { %3450 = vmatpush3.bf16.msra.mxu1 %v1203_v59  ;;  %v3675_v59 = vld [vmem:[%s4985_s12] sm:$0xff]  }
 0xc0b   :  { %v3726_v60 = vpop.eup %3725  ;;  %3461 = vmatprep.subr.bf16.mxu1 %v4130_v15 }
 0xc0c   :  { %v1193_v61 = vmul.f32 %v3726_v60, %v3722_v27  ;;  %v1061_v62 = vpop.permute.xlu0 %1060  ;;  %v3676_v60 = vld [vmem:[%s4985_s12 + $0x8] sm:$0xff]  }
 0xc0d   :  { %1067 = vst.msk [vmem:[#allocation3] sm:$0xff] %vm1066_vm5, %v1061_v62  ;;  %v3678_v62 = vld [vmem:[%s4985_s12 + $0x18] sm:$0xff]  }
 0xc0e   :  { %v1195_v63 = vpack.c.bf16 %v1193_v61, %v1193_v61  ;;  %v3677_v61 = vld [vmem:[%s4985_s12 + $0x10] sm:$0xff]  }
 0xc0f   :  { %v3728_v0 = vpop.eup %3727 }
 0xc10   :  { %v1194_v41 = vmul.f32 %v3728_v0, %v3724_v52  ;;  %3452 = vmatmul.mubr.msk.bf16.vlgmr.msra.gmra.mrb[28].mxu1 %vm364_vm2, %v1195_v63  ;;  %v3181_v63 = vld [vmem:[#allocation18] ss:$0 sm:$0xff] }
 0xc11   :  { %3465 = vmatprep.mubr.msk.bf16.mxu1 %vm4131_vm1, %v4130_v15  ;;  %3462 = vmatpush3.bf16.msra.mxu1 %v3671_v2 }
 0xc12   :  { %v1196_v1 = vpack.c.bf16 %v1194_v41, %v1194_v41  ;;  %3463 = vmatprep.subr.bf16.mxu1 %v4130_v15 }
 0xc14   :  { %3458 = vmatmul.mubr.msk.bf16.vlgmr.msra.gmra.mrb[32].mxu0 %vm364_vm2, %v1196_v1 }
 0xc15   :  { %3473 = vmatprep.mubr.msk.bf16.mxu0 %vm4131_vm1, %v4130_v15  ;;  %3464 = vmatpush3.bf16.msra.mxu1 %v3672_v3 }
 0xc16   :  { %3477 = vmatprep.subr.bf16.mxu1 %v4130_v15 }
 0xce3   :  { %v1239_v4 = vpop.f32.mrb[28].mxu1 }
 0xce4   :  { %1295 = vrot.lane.b32.xlu0 %v1239_v4, %s4143_s8  ;;  %v3453_v5 = vpop.f32.mrb[29].mxu1 }
 0xce5   :  { %v1242_v6 = vpop.f32.mrb[30].mxu1 }
 0xce6   :  { %v3454_v7 = vpop.f32.mrb[31].mxu1 }
 0xce7   :  { %v1287_v8 = vpop.f32.mrb[32].mxu0 }
 0xce8   :  { %1297 = vrot.lane.b32.xlu1 %v1287_v8, %s4143_s8  ;;  %v3459_v9 = vpop.f32.mrb[33].mxu0 }
 0xce9   :  { %v1290_v10 = vpop.f32.mrb[34].mxu0 }
 0xcea   :  { %v3460_v11 = vpop.f32.mrb[35].mxu0 }
 0xd56   :  { %v1296_v12 = vpop.permute.xlu0 %1295 }
 0xd57   :  { %1302 = vst.msk [vmem:[#allocation3] sm:$0xff] %vm1301_vm6, %v1296_v12 }
 0xd5a   :  { %v1298_v13 = vpop.permute.xlu1 %1297 }
 0xd5b   :  { %1303 = vst.msk [vmem:[#allocation3 + $0x8] sm:$0xff] %vm1301_vm6, %v1298_v13 }
 0xd5e   :  { %v1304_v14 = vld [vmem:[#allocation3] sm:$0xff] }
 0xd62   :  { %v1305_v16 = vld [vmem:[#allocation3 + $0x8] sm:$0xff] }
 0xd63   :  { %v1311_v17 = vpack.c.bf16 %v1305_v16, %v1304_v14 }
 0xd65   :  { %3466 = vmatmul.mubr.msk.bf16.vlgmr.msra.gmra.mrb[32].mxu1 %vm241_vm0, %v1311_v17 }
 0xd66   :  { %3485 = vmatprep.mubr.msk.bf16.mxu1 %vm4131_vm1, %v4130_v15  ;;  %3478 = vmatpush3.bf16.msra.mxu1 %v3675_v59  ;;  %v3192_v59 = vld [vmem:[#allocation22] ss:$0 sm:$0xff] }
 0xd67   :  { %3479 = vmatprep.subr.bf16.mxu1 %v4130_v15 }
 0xd6a   :  { %3480 = vmatpush3.bf16.msra.mxu1 %v3676_v60 }
 0xd6b   :  { %3481 = vmatprep.subr.bf16.mxu1 %v4130_v15 }
 0xd6e   :  { %3482 = vmatpush3.bf16.msra.mxu1 %v3677_v61 }
 0xd6f   :  { %3483 = vmatprep.subr.bf16.mxu1 %v4130_v15 }
 0xd72   :  { %3484 = vmatpush3.bf16.msra.mxu1 %v3678_v62 }
 0xd73   :  { %3503 = vmatprep.subr.bf16.mxu1 %v4130_v15 }
 0xe38   :  { %v1367_v19 = vpop.f32.mrb[32].mxu1 }
 0xe39   :  { %v1368_v20 = vadd.f32 %v3175_v18, %v1367_v19  ;;  %v3467_v21 = vpop.f32.mrb[33].mxu1 }
 0xe3a   :  { %v1370_v22 = vpop.f32.mrb[34].mxu1 }
 0xe3b   :  { %v1371_v24 = vadd.f32 %v3175_v18, %v1370_v22  ;;  %v3468_v25 = vpop.f32.mrb[35].mxu1  ;;  %v1374_v26 = vadd.f32 %v1368_v20, %v4454_v33 }
 0xe3d   :  { %v1378_v28 = vsel %vm241_vm0, %v1374_v26, 0.0  ;;  %v1375_v29 = vadd.f32 %v1371_v24, %v4456_v34  ;;  %v3673_v34 = vld [vmem:[%s4983_s10] sm:$0xff]  }
 0xe3e   :  { %1379 = vadd.xlane.f32.xlu0 %v1378_v28  ;;  %3470 = vmatpush3.bf16.msra.mxu0 %v3673_v34 }
 0xe3f   :  { %v1381_v30 = vsel %vm241_vm0, %v1375_v29, 0.0  ;;  %3471 = vmatprep.subr.bf16.mxu0 %v4130_v15 }
 0xe40   :  { %1382 = vadd.xlane.f32.xlu1 %v1381_v30 }
 0xe42   :  { %3472 = vmatpush3.bf16.msra.mxu0 %v3674_v50 }
 0xe43   :  { %3489 = vmatprep.subr.bf16.mxu0 %v4130_v15 }
 0xecb   :  { %v1380_v31 = vpop.xlane.xlu0 %1379 }
 0xecc   :  { %v1384_v32 = vmul.f32 0.03125, %v1380_v31 }
 0xecd   :  { %v1383_v35 = vpop.xlane.xlu1 %1382 }
 0xece   :  { %v1386_v36 = vsub.f32 %v1374_v26, %v1384_v32  ;;  %v1385_v37 = vmul.f32 0.03125, %v1383_v35  ;;  %v3185_v26 = vld [vmem:[#allocation19] ss:$0 sm:$0xff] }
 0xed0   :  { %v1387_v38 = vsub.f32 %v1375_v29, %v1385_v37  ;;  %v1388_v39 = vmul.f32 %v1386_v36, %v1386_v36 }
 0xed2   :  { %v1390_v40 = vsel %vm241_vm0, %v1388_v39, 0.0  ;;  %v1389_v42 = vmul.f32 %v1387_v38, %v1387_v38 }
 0xed3   :  { %1391 = vadd.xlane.f32.xlu0 %v1390_v40 }
 0xed4   :  { %v1393_v33 = vsel %vm241_vm0, %v1389_v42, 0.0 }
 0xed7   :  { %1394 = vadd.xlane.f32.xlu0 %v1393_v33 }
 0xf60   :  { %v1392_v43 = vpop.xlane.xlu0 %1391 }
 0xf61   :  { %v1396_v45 = vmul.f32 0.03125, %v1392_v43 }
 0xf63   :  { %v1398_v55 = vadd.f32 1e-12, %v1396_v45 }
 0xf64   :  { %v1395_v46 = vpop.xlane.xlu0 %1394 }
 0xf65   :  { %3729 = vrsqrt.f32 %v1398_v55  ;;  %v1397_v47 = vmul.f32 0.03125, %v1395_v46 }
 0xf67   :  { %v1399_v48 = vadd.f32 1e-12, %v1397_v47 }
 0xf69   :  { %3731 = vrsqrt.f32 %v1399_v48  ;;  %v3679_v48 = vld [vmem:[%s5013_s7 + $0x10] sm:$0xff]  }
 0xf6f   :  { %v3730_v49 = vpop.eup %3729 }
 0xf70   :  { %v1402_v44 = vmul.f32 %v3730_v49, %v1386_v36  ;;  %v3680_v49 = vld [vmem:[%s5013_s7 + $0x18] sm:$0xff]  }
 0xf72   :  { %v1410_v51 = vmul.f32 %v3179_v23, %v1402_v44 }
 0xf73   :  { %v3732_v27 = vpop.eup %3731 }
 0xf74   :  { %v1403_v52 = vmul.f32 %v3732_v27, %v1387_v38  ;;  %v1418_v56 = vadd.f32 %v3180_v53, %v1410_v51 }
 0xf76   :  { %v1411_v54 = vmul.f32 %v3179_v23, %v1403_v52 }
 0xf78   :  { %v1419_v57 = vadd.f32 %v3180_v53, %v1411_v54 }
 0xf7a   :  { %v1425_v58 = vpack.c.bf16 %v1419_v57, %v1418_v56 }
 0xf7c   :  { %3474 = vmatmul.mubr.msk.bf16.vlgmr.msra.gmra.mrb[36].mxu0 %vm241_vm0, %v1425_v58 }
 0xf7d   :  { %3493 = vmatprep.mubr.msk.bf16.mxu0 %vm4131_vm1, %v4130_v15  ;;  %3490 = vmatpush3.bf16.msra.mxu0 %v3679_v48 }
 0xf7e   :  { %3491 = vmatprep.subr.bf16.mxu0 %v4130_v15 }
 0xf81   :  { %3492 = vmatpush3.bf16.msra.mxu0 %v3680_v49 }
 0xf82   :  { %3497 = vmatprep.subr.bf16.mxu0 %v4130_v15 }
0x104f   :  { %v1481_v0 = vpop.f32.mrb[36].mxu0 }
0x1050   :  { %v1482_v41 = vadd.f32 %v3181_v63, %v1481_v0  ;;  %v3475_v1 = vpop.f32.mrb[37].mxu0 }
0x1051   :  { %v1484_v2 = vpop.f32.mrb[38].mxu0 }
0x1052   :  { %v1490_v3 = vmul.f32 0.044715, %v1482_v41  ;;  %v1485_v4 = vadd.f32 %v3181_v63, %v1484_v2  ;;  %v3476_v5 = vpop.f32.mrb[39].mxu0  ;;  %v1488_v19 = vmul.f32 0.5, %v1482_v41 }
0x1054   :  { %v1492_v6 = vmul.f32 %v1490_v3, %v1482_v41  ;;  %v1491_v7 = vmul.f32 0.044715, %v1485_v4  ;;  %v1489_v20 = vmul.f32 0.5, %v1485_v4  ;;  %v3197_v3 = vld [vmem:[#allocation12 + $0x1] ss:$0 sm:$0xff] }
0x1056   :  { %v1494_v8 = vmul.f32 %v1492_v6, %v1482_v41  ;;  %v1493_v9 = vmul.f32 %v1491_v7, %v1485_v4 }
0x1058   :  { %v1496_v10 = vadd.f32 %v1494_v8, %v1482_v41  ;;  %v1495_v11 = vmul.f32 %v1493_v9, %v1485_v4 }
0x105a   :  { %v1498_v12 = vmul.f32 0.7978846, %v1496_v10  ;;  %v1497_v13 = vadd.f32 %v1495_v11, %v1485_v4 }
0x105c   :  { %3733 = vtanh.f32 %v1498_v12  ;;  %v1499_v14 = vmul.f32 0.7978846, %v1497_v13 }
0x105e   :  { %3735 = vtanh.f32 %v1499_v14 }
0x1066   :  { %v3734_v16 = vpop.eup %3733 }
0x1067   :  { %v1502_v17 = vadd.f32 1.0, %v3734_v16 }
0x1068   :  { %v3736_v18 = vpop.eup %3735 }
0x1069   :  { %v1503_v21 = vadd.f32 1.0, %v3736_v18  ;;  %v1504_v22 = vmul.f32 %v1502_v17, %v1488_v19 }
0x106b   :  { %v1505_v24 = vmul.f32 %v1503_v21, %v1489_v20 }
0x106d   :  { %v1515_v25 = vpack.c.bf16 %v1505_v24, %v1504_v22 }
0x106f   :  { %3486 = vmatmul.mubr.msk.bf16.vlgmr.msra.gmra.mrb[36].mxu1 %vm1546_vm7, %v1515_v25 }
0x1070   :  { %3505 = vmatprep.mubr.msk.bf16.mxu1 %vm4131_vm1, %v4130_v15 }
0x1142   :  { %v1584_v28 = vpop.f32.mrb[36].mxu1 }
0x1143   :  { %v1585_v29 = vadd.f32 %v3185_v26, %v1584_v28  ;;  %v3487_v30 = vpop.f32.mrb[37].mxu1 }
0x1144   :  { %v1587_v31 = vpop.f32.mrb[38].mxu1 }
0x1145   :  { %v1588_v32 = vadd.f32 %v3185_v26, %v1587_v31  ;;  %v3488_v35 = vpop.f32.mrb[39].mxu1  ;;  %v1591_v36 = vadd.f32 %v1585_v29, %v1418_v56  ;;  %v3191_v56 = vld [vmem:[#allocation21] ss:$0 sm:$0xff]  ;;  %v4731_v26 = vld [vmem:[#allocation7] ss:$0 sm:$0xff] }
0x1147   :  { %v1595_v37 = vsel %vm241_vm0, %v1591_v36, 0.0  ;;  %v1592_v38 = vadd.f32 %v1588_v32, %v1419_v57  ;;  %v4735_v32 = vld [vmem:[#allocation7 + $0x1] ss:$0 sm:$0xff] }
0x1148   :  { %1596 = vadd.xlane.f32.xlu0 %v1595_v37 }
0x1149   :  { %v1598_v39 = vsel %vm241_vm0, %v1592_v38, 0.0 }
0x114a   :  { %1599 = vadd.xlane.f32.xlu1 %v1598_v39 }
0x11d5   :  { %v1597_v40 = vpop.xlane.xlu0 %1596 }
0x11d6   :  { %v1601_v42 = vmul.f32 0.03125, %v1597_v40 }
0x11d7   :  { %v1600_v33 = vpop.xlane.xlu1 %1599 }
0x11d8   :  { %v1603_v34 = vsub.f32 %v1591_v36, %v1601_v42  ;;  %v1602_v50 = vmul.f32 0.03125, %v1600_v33 }
0x11da   :  { %v1604_v43 = vsub.f32 %v1592_v38, %v1602_v50  ;;  %v1605_v45 = vmul.f32 %v1603_v34, %v1603_v34 }
0x11dc   :  { %v1607_v55 = vsel %vm241_vm0, %v1605_v45, 0.0  ;;  %v1606_v46 = vmul.f32 %v1604_v43, %v1604_v43 }
0x11dd   :  { %1608 = vadd.xlane.f32.xlu0 %v1607_v55 }
0x11de   :  { %v1610_v47 = vsel %vm241_vm0, %v1606_v46, 0.0 }
0x11df   :  { %1611 = vadd.xlane.f32.xlu1 %v1610_v47 }
0x126a   :  { %v1609_v44 = vpop.xlane.xlu0 %1608 }
0x126b   :  { %v1613_v23 = vmul.f32 0.03125, %v1609_v44 }
0x126c   :  { %v1612_v27 = vpop.xlane.xlu1 %1611 }
0x126d   :  { %v1615_v51 = vadd.f32 1e-12, %v1613_v23  ;;  %v1614_v52 = vmul.f32 0.03125, %v1612_v27 }
0x126f   :  { %3737 = vrsqrt.f32 %v1615_v51  ;;  %v1616_v53 = vadd.f32 1e-12, %v1614_v52 }
0x1271   :  { %3739 = vrsqrt.f32 %v1616_v53 }
0x1279   :  { %v3738_v54 = vpop.eup %3737 }
0x127a   :  { %v1619_v57 = vmul.f32 %v3738_v54, %v1603_v34 }
0x127b   :  { %v3740_v58 = vpop.eup %3739 }
0x127c   :  { %v1627_v60 = vmul.f32 %v3191_v56, %v1619_v57  ;;  %v1620_v61 = vmul.f32 %v3740_v58, %v1604_v43 }
0x127e   :  { %v1635_v62 = vadd.f32 %v3192_v59, %v1627_v60  ;;  %v1628_v63 = vmul.f32 %v3191_v56, %v1620_v61 }
0x1280   :  { %1637 = vst.msk [vmem:[#allocation2] sm:$0xff] %vm241_vm0, %v1635_v62  ;;  %v1636_v0 = vadd.f32 %v3192_v59, %v1628_v63 }
0x1282   :  { %1638 = vst.msk [vmem:[#allocation2 + $0x8] sm:$0xff] %vm241_vm0, %v1636_v0 }
0x1287   :  { %v4702_v41 = vld [vmem:[#allocation2] sm:$0xff] }
0x1289   :  { %v4704_v1 = vld [vmem:[#allocation2 + $0x8] sm:$0xff] }
0x128a   :  { %v1648_v2 = vpack.c.bf16 %v4704_v1, %v4702_v41 }
0x128c   :  { %3494 = vmatmul.mubr.msk.bf16.vlgmr.msra.gmra.mrb[40].mxu0 %vm241_vm0, %v1648_v2 }
0x128d   :  { %3499 = vmatprep.mubr.msk.bf16.mxu0 %vm4131_vm1, %v4130_v15 }
0x135f   :  { %v1704_v4 = vpop.f32.mrb[40].mxu0 }
0x1360   :  { %v1705_v5 = vadd.f32 %v3197_v3, %v1704_v4  ;;  %v3495_v6 = vpop.f32.mrb[41].mxu0 }
0x1361   :  { %v1707_v7 = vpop.f32.mrb[42].mxu0 }
0x1362   :  { %v4711_v8 = vpack.c.bf16 %v1705_v5, %v1705_v5  ;;  %v1708_v9 = vadd.f32 %v3197_v3, %v1707_v7  ;;  %v3496_v10 = vpop.f32.mrb[43].mxu0 }
0x1364   :  { %v4713_v11 = vpack.c.bf16 %v1708_v9, %v1708_v9  ;;  %1714 = vrot.lane.b32.xlu0 %v4711_v8, %s4132_s26 }
0x1366   :  { %1763 = vrot.lane.b32.xlu1 %v4713_v11, %s4132_s26 }
0x13d6   :  { %v1715_v12 = vpop.permute.xlu0 %1714 }
0x13d7   :  { %v1720_v13 = vsel %vm364_vm2, %v1715_v12, 0 }
0x13d8   :  { %3498 = vmatpush3.bf16.xpose.msra.mxu0 %v1720_v13  ;;  %v1764_v14 = vpop.permute.xlu1 %1763 }
0x13d9   :  { %v1769_v16 = vsel %vm364_vm2, %v1764_v14, 0  ;;  %3509 = vmatprep.subr.bf16.mxu0 %v4130_v15 }
0x13da   :  { %3504 = vmatpush3.bf16.xpose.msra.mxu1 %v1769_v16 }
0x13db   :  { %3515 = vmatprep.subr.bf16.mxu1 %v4130_v15 }
0x13df   :  { %3500 = vmatmul.mubr.msk.bf16.vlgmr.msra.gmra.mrb[44].mxu0 %vm364_vm2, %v4711_v8 }
0x13e0   :  { %3511 = vmatprep.mubr.msk.bf16.mxu0 %vm4131_vm1, %v4130_v15 }
0x13e1   :  { %3506 = vmatmul.mubr.msk.bf16.vlgmr.msra.gmra.mrb[40].mxu1 %vm364_vm2, %v4713_v11 }
0x13e2   :  { %3517 = vmatprep.mubr.msk.bf16.mxu1 %vm4131_vm1, %v4130_v15 }
0x14b2   :  { %v1756_v17 = vpop.f32.mrb[44].mxu0 }
0x14b3   :  { %v1811_v18 = vmul.f32 0.35355338, %v1756_v17  ;;  %v3501_v19 = vpop.f32.mrb[45].mxu0 }
0x14b4   :  { %v1759_v20 = vpop.f32.mrb[46].mxu0  ;;  %v1805_v21 = vpop.f32.mrb[40].mxu1 }
0x14b5   :  { %v1812_v22 = vmul.f32 0.35355338, %v1805_v21  ;;  %v3502_v24 = vpop.f32.mrb[47].mxu0  ;;  %v3507_v25 = vpop.f32.mrb[41].mxu1  ;;  %v1813_v28 = vadd.f32 %v4731_v26, %v1811_v18 }
0x14b6   :  { %v1808_v29 = vpop.f32.mrb[42].mxu1 }
0x14b7   :  { %v3508_v30 = vpop.f32.mrb[43].mxu1  ;;  %v1815_v31 = vsel %vm364_vm2, %v1813_v28, -inf  ;;  %v1814_v35 = vadd.f32 %v4735_v32, %v1812_v22 }
0x14b8   :  { %1816 = vmax.xlane.f32.xlu1 %v1815_v31 }
0x14b9   :  { %v1818_v36 = vsel %vm364_vm2, %v1814_v35, -inf }
0x14ba   :  { %1819 = vmax.xlane.f32.xlu0 %v1818_v36 }
0x14c9   :  { %1887 = vrot.lane.b32.xlu1 %v4713_v11, %s4133_s28 }
0x14cd   :  { %1939 = vrot.lane.b32.xlu1 %v4711_v8, %s4134_s5 }
0x1545   :  { %v1817_v37 = vpop.xlane.xlu1 %1816 }
0x1546   :  { %v1821_v38 = vsub.f32 %v1813_v28, %v1817_v37 }
0x1547   :  { %v1820_v39 = vpop.xlane.xlu0 %1819 }
0x1548   :  { %v1823_v40 = vmul.f32 1.442695, %v1821_v38  ;;  %v1822_v42 = vsub.f32 %v1814_v35, %v1820_v39 }
0x1549   :  { %v1888_v33 = vpop.permute.xlu1 %1887 }
0x154a   :  { %3741 = vpow2.f32 %v1823_v40  ;;  %v1825_v34 = vmul.f32 1.442695, %v1822_v42  ;;  %v1893_v50 = vsel %vm505_vm3, %v1888_v33, 0 }
0x154b   :  { %3516 = vmatpush3.bf16.msra.mxu1 %v1893_v50 }
0x154c   :  { %3743 = vpow2.f32 %v1825_v34  ;;  %3527 = vmatprep.subr.bf16.mxu1 %v4130_v15 }
0x154d   :  { %v1940_v47 = vpop.permute.xlu1 %1939 }
0x154e   :  { %v1945_v57 = vsel %vm364_vm2, %v1940_v47, 0 }
0x1554   :  { %v3742_v43 = vpop.eup %3741 }
0x1555   :  { %v1827_v45 = vsel %vm364_vm2, %v3742_v43, 0.0 }
0x1556   :  { %v3744_v55 = vpop.eup %3743  ;;  %1828 = vadd.xlane.f32.xlu0 %v1827_v45 }
0x1557   :  { %v1830_v46 = vsel %vm364_vm2, %v3744_v55, 0.0 }
0x1558   :  { %1831 = vadd.xlane.f32.xlu1 %v1830_v46 }
0x1569   :  { %1989 = vrot.lane.b32.xlu1 %v4713_v11, %s4134_s5 }
0x156c   :  { %1839 = vrot.lane.b32.xlu0 %v4711_v8, %s4133_s28 }
0x156d   :  { %1987 = vrot.lane.b32.xlu1 %v4713_v11, %s4135_s13 }
0x1570   :  { %1937 = vrot.lane.b32.xlu0 %v4711_v8, %s4135_s13 }
0x15e3   :  { %v1829_v48 = vpop.xlane.xlu0 %1828 }
0x15e4   :  { %3745 = vrcp.f32 %v1829_v48 }
0x15e5   :  { %v1832_v49 = vpop.xlane.xlu1 %1831 }
0x15e6   :  { %3747 = vrcp.f32 %v1832_v49 }
0x15e7   :  { %v1840_v44 = vpop.permute.xlu0 %1839 }
0x15e8   :  { %v1845_v23 = vsel %vm505_vm3, %v1840_v44, 0 }
0x15e9   :  { %3510 = vmatpush3.bf16.msra.mxu0 %v1845_v23  ;;  %v1990_v56 = vpop.permute.xlu1 %1989 }
0x15ea   :  { %3521 = vmatprep.subr.bf16.mxu0 %v4130_v15  ;;  %v1995_v59 = vsel %vm364_vm2, %v1990_v56, 0 }
0x15eb   :  { %v1938_v60 = vpop.permute.xlu0 %1937 }
0x15ed   :  { %v1988_v61 = vpop.permute.xlu1 %1987 }
0x15ee   :  { %v3746_v27 = vpop.eup %3745 }
0x15ef   :  { %v1835_v51 = vmul.f32 %v3746_v27, %v3742_v43 }
0x15f0   :  { %v3748_v52 = vpop.eup %3747 }
0x15f1   :  { %v1836_v53 = vmul.f32 %v3748_v52, %v3744_v55  ;;  %v1837_v54 = vpack.c.bf16 %v1835_v51, %v1835_v51 }
0x15f3   :  { %3512 = vmatmul.mubr.msk.bf16.vlgmr.msra.gmra.mrb[48].mxu0 %vm364_vm2, %v1837_v54  ;;  %v1838_v58 = vpack.c.bf16 %v1836_v53, %v1836_v53 }
0x15f4   :  { %3522 = vmatpush3.bf16.xpose.msra.mxu0 %v1945_v57  ;;  %3523 = vmatprep.mubr.msk.bf16.mxu0 %vm4131_vm1, %v4130_v15 }
0x15f5   :  { %3518 = vmatmul.mubr.msk.bf16.vlgmr.msra.gmra.mrb[44].mxu1 %vm364_vm2, %v1838_v58  ;;  %3533 = vmatprep.subr.bf16.mxu0 %v4130_v15 }
0x15f6   :  { %3528 = vmatpush3.bf16.xpose.msra.mxu1 %v1995_v59  ;;  %3529 = vmatprep.mubr.msk.bf16.mxu1 %vm4131_vm1, %v4130_v15 }
0x15f7   :  { %3539 = vmatprep.subr.bf16.mxu1 %v4130_v15 }
0x15fb   :  { %3524 = vmatmul.mubr.msk.bf16.vlgmr.msra.gmra.mrb[52].mxu0 %vm364_vm2, %v1938_v60 }
0x15fc   :  { %3535 = vmatprep.mubr.msk.bf16.mxu0 %vm4131_vm1, %v4130_v15 }
0x15fd   :  { %3530 = vmatmul.mubr.msk.bf16.vlgmr.msra.gmra.mrb[48].mxu1 %vm364_vm2, %v1988_v61 }
0x15fe   :  { %3541 = vmatprep.mubr.msk.bf16.mxu1 %vm4131_vm1, %v4130_v15 }
0x16c6   :  { %v1881_v62 = vpop.f32.mrb[48].mxu0 }
0x16c7   :  { %1935 = vst.msk [vmem:[#allocation3] sm:$0xff] %vm364_vm2, %v1881_v62  ;;  %v3513_v63 = vpop.f32.mrb[49].mxu0 }
0x16c8   :  { %v1884_v0 = vpop.f32.mrb[50].mxu0  ;;  %v1929_v2 = vpop.f32.mrb[44].mxu1 }
0x16c9   :  { %1936 = vst.msk [vmem:[#allocation3 + $0x8] sm:$0xff] %vm364_vm2, %v1929_v2  ;;  %v3514_v3 = vpop.f32.mrb[51].mxu0  ;;  %v3519_v4 = vpop.f32.mrb[45].mxu1 }
0x16ca   :  { %v1932_v5 = vpop.f32.mrb[46].mxu1 }
0x16cb   :  { %v3520_v6 = vpop.f32.mrb[47].mxu1 }
0x16ce   :  { %v1981_v7 = vpop.f32.mrb[52].mxu0 }
0x16cf   :  { %v2037_v9 = vmul.f32 0.35355338, %v1981_v7  ;;  %v3525_v10 = vpop.f32.mrb[53].mxu0 }
0x16d0   :  { %v1984_v12 = vpop.f32.mrb[54].mxu0  ;;  %v2031_v13 = vpop.f32.mrb[48].mxu1 }
0x16d1   :  { %v2038_v14 = vmul.f32 0.35355338, %v2031_v13  ;;  %v3526_v16 = vpop.f32.mrb[55].mxu0  ;;  %v3531_v17 = vpop.f32.mrb[49].mxu1  ;;  %v2039_v18 = vadd.f32 %v4731_v26, %v2037_v9 }
0x16d2   :  { %v2034_v19 = vpop.f32.mrb[50].mxu1 }
0x16d3   :  { %v3532_v20 = vpop.f32.mrb[51].mxu1  ;;  %v2041_v21 = vsel %vm364_vm2, %v2039_v18, -inf  ;;  %v2040_v22 = vadd.f32 %v4735_v32, %v2038_v14 }
0x16d4   :  { %2042 = vmax.xlane.f32.xlu0 %v2041_v21 }
0x16d5   :  { %v2044_v24 = vsel %vm364_vm2, %v2040_v22, -inf }
0x16d6   :  { %2045 = vmax.xlane.f32.xlu1 %v2044_v24 }
0x16e7   :  { %2113 = vrot.lane.b32.xlu1 %v4713_v11, %s4136_s23 }
0x16eb   :  { %2173 = vrot.lane.b32.xlu1 %v4711_v8, %s4137_s4 }
0x16ef   :  { %2223 = vrot.lane.b32.xlu1 %v4713_v11, %s4137_s4 }
0x16f3   :  { %2221 = vrot.lane.b32.xlu1 %v4713_v11, %s4138_s11 }
0x1761   :  { %v2043_v25 = vpop.xlane.xlu0 %2042 }
0x1762   :  { %v2047_v28 = vsub.f32 %v2039_v18, %v2043_v25 }
0x1763   :  { %v2046_v29 = vpop.xlane.xlu1 %2045 }
0x1764   :  { %v2049_v30 = vmul.f32 1.442695, %v2047_v28  ;;  %v2048_v31 = vsub.f32 %v2040_v22, %v2046_v29 }
0x1766   :  { %3749 = vpow2.f32 %v2049_v30  ;;  %v2051_v35 = vmul.f32 1.442695, %v2048_v31 }
0x1767   :  { %v2114_v36 = vpop.permute.xlu1 %2113 }
0x1768   :  { %3751 = vpow2.f32 %v2051_v35  ;;  %v2119_v37 = vsel %vm505_vm3, %v2114_v36, 0 }
0x1769   :  { %3540 = vmatpush3.bf16.msra.mxu1 %v2119_v37 }
0x176a   :  { %3551 = vmatprep.subr.bf16.mxu1 %v4130_v15 }
0x176b   :  { %v2174_v55 = vpop.permute.xlu1 %2173 }
0x176c   :  { %v2179_v23 = vsel %vm364_vm2, %v2174_v55, 0 }
0x176f   :  { %v2224_v44 = vpop.permute.xlu1 %2223 }
0x1770   :  { %v3750_v38 = vpop.eup %3749  ;;  %v2229_v51 = vsel %vm364_vm2, %v2224_v44, 0 }
0x1771   :  { %v2053_v39 = vsel %vm364_vm2, %v3750_v38, 0.0 }
0x1772   :  { %v3752_v40 = vpop.eup %3751  ;;  %2054 = vadd.xlane.f32.xlu0 %v2053_v39 }
0x1773   :  { %v2056_v42 = vsel %vm364_vm2, %v3752_v40, 0.0  ;;  %v2222_v53 = vpop.permute.xlu1 %2221 }
0x1776   :  { %2057 = vadd.xlane.f32.xlu0 %v2056_v42 }
0x178c   :  { %2065 = vrot.lane.b32.xlu0 %v4711_v8, %s4136_s23 }
0x1790   :  { %2171 = vrot.lane.b32.xlu0 %v4711_v8, %s4138_s11 }
0x17ff   :  { %v2055_v33 = vpop.xlane.xlu0 %2054 }
0x1800   :  { %3753 = vrcp.f32 %v2055_v33 }
0x1803   :  { %v2058_v34 = vpop.xlane.xlu0 %2057 }
0x1804   :  { %3755 = vrcp.f32 %v2058_v34 }
0x1807   :  { %v2066_v50 = vpop.permute.xlu0 %2065 }
0x1808   :  { %v2071_v43 = vsel %vm505_vm3, %v2066_v50, 0 }
0x1809   :  { %3534 = vmatpush3.bf16.msra.mxu0 %v2071_v43 }
0x180a   :  { %v3754_v45 = vpop.eup %3753  ;;  %3545 = vmatprep.subr.bf16.mxu0 %v4130_v15 }
0x180b   :  { %v2061_v46 = vmul.f32 %v3754_v45, %v3750_v38  ;;  %v2172_v52 = vpop.permute.xlu0 %2171 }
0x180d   :  { %v2063_v47 = vpack.c.bf16 %v2061_v46, %v2061_v46 }
0x180e   :  { %v3756_v48 = vpop.eup %3755 }
0x180f   :  { %v2062_v49 = vmul.f32 %v3756_v48, %v3752_v40  ;;  %3536 = vmatmul.mubr.msk.bf16.vlgmr.msra.gmra.mrb[56].mxu0 %vm364_vm2, %v2063_v47 }
0x1810   :  { %3547 = vmatprep.mubr.msk.bf16.mxu0 %vm4131_vm1, %v4130_v15 }
0x1811   :  { %v2064_v27 = vpack.c.bf16 %v2062_v49, %v2062_v49 }
0x1812   :  { %3546 = vmatpush3.bf16.xpose.msra.mxu0 %v2179_v23 }
0x1813   :  { %3542 = vmatmul.mubr.msk.bf16.vlgmr.msra.gmra.mrb[52].mxu1 %vm364_vm2, %v2064_v27  ;;  %3557 = vmatprep.subr.bf16.mxu0 %v4130_v15 }
0x1814   :  { %3552 = vmatpush3.bf16.xpose.msra.mxu1 %v2229_v51  ;;  %3553 = vmatprep.mubr.msk.bf16.mxu1 %vm4131_vm1, %v4130_v15 }
0x1815   :  { %3563 = vmatprep.subr.bf16.mxu1 %v4130_v15 }
0x1819   :  { %3548 = vmatmul.mubr.msk.bf16.vlgmr.msra.gmra.mrb[60].mxu0 %vm364_vm2, %v2172_v52 }
0x181a   :  { %3559 = vmatprep.mubr.msk.bf16.mxu0 %vm4131_vm1, %v4130_v15 }
0x181b   :  { %3554 = vmatmul.mubr.msk.bf16.vlgmr.msra.gmra.mrb[56].mxu1 %vm364_vm2, %v2222_v53 }
0x181c   :  { %3565 = vmatprep.mubr.msk.bf16.mxu1 %vm4131_vm1, %v4130_v15 }
0x18e2   :  { %v4813_v54 = vpop.f32.mrb[56].mxu0 }
0x18e3   :  { %v3537_v56 = vpop.f32.mrb[57].mxu0 }
0x18e4   :  { %v2110_v57 = vpop.f32.mrb[58].mxu0 }
0x18e5   :  { %v3538_v58 = vpop.f32.mrb[59].mxu0 }
0x18e6   :  { %v4815_v59 = vpop.f32.mrb[52].mxu1 }
0x18e7   :  { %v3543_v60 = vpop.f32.mrb[53].mxu1 }
0x18e8   :  { %v2158_v61 = vpop.f32.mrb[54].mxu1 }
0x18e9   :  { %v3544_v62 = vpop.f32.mrb[55].mxu1 }
0x18ec   :  { %v2215_v63 = vpop.f32.mrb[60].mxu0 }
0x18ed   :  { %v2271_v0 = vmul.f32 0.35355338, %v2215_v63  ;;  %v3549_v2 = vpop.f32.mrb[61].mxu0 }
0x18ee   :  { %v2218_v3 = vpop.f32.mrb[62].mxu0  ;;  %v2265_v4 = vpop.f32.mrb[56].mxu1 }
0x18ef   :  { %v2272_v5 = vmul.f32 0.35355338, %v2265_v4  ;;  %v3550_v6 = vpop.f32.mrb[63].mxu0  ;;  %v3555_v7 = vpop.f32.mrb[57].mxu1  ;;  %v2273_v9 = vadd.f32 %v4731_v26, %v2271_v0 }
0x18f0   :  { %v2268_v10 = vpop.f32.mrb[58].mxu1 }
0x18f1   :  { %v3556_v12 = vpop.f32.mrb[59].mxu1  ;;  %v2275_v13 = vsel %vm364_vm2, %v2273_v9, -inf  ;;  %v2274_v14 = vadd.f32 %v4735_v32, %v2272_v5 }
0x18f2   :  { %2276 = vmax.xlane.f32.xlu0 %v2275_v13 }
0x18f3   :  { %v2278_v16 = vsel %vm364_vm2, %v2274_v14, -inf }
0x18f4   :  { %2279 = vmax.xlane.f32.xlu1 %v2278_v16 }
0x1905   :  { %2347 = vrot.lane.b32.xlu1 %v4713_v11, %s4139_s24 }
0x1909   :  { %2407 = vrot.lane.b32.xlu1 %v4711_v8, %s4140_s0 }
0x190d   :  { %2457 = vrot.lane.b32.xlu1 %v4713_v11, %s4140_s0 }
0x1911   :  { %2455 = vrot.lane.b32.xlu1 %v4713_v11, %s4141_s2 }
0x197f   :  { %v2277_v17 = vpop.xlane.xlu0 %2276 }
0x1980   :  { %v2281_v18 = vsub.f32 %v2273_v9, %v2277_v17 }
0x1981   :  { %v2280_v19 = vpop.xlane.xlu1 %2279 }
0x1982   :  { %v2283_v20 = vmul.f32 1.442695, %v2281_v18  ;;  %v2282_v21 = vsub.f32 %v2274_v14, %v2280_v19 }
0x1984   :  { %3757 = vpow2.f32 %v2283_v20  ;;  %v2285_v22 = vmul.f32 1.442695, %v2282_v21 }
0x1985   :  { %v2348_v24 = vpop.permute.xlu1 %2347 }
0x1986   :  { %3759 = vpow2.f32 %v2285_v22  ;;  %v2353_v25 = vsel %vm505_vm3, %v2348_v24, 0 }
0x1987   :  { %3564 = vmatpush3.bf16.msra.mxu1 %v2353_v25 }
0x1988   :  { %3575 = vmatprep.subr.bf16.mxu1 %v4130_v15 }
0x1989   :  { %v2408_v40 = vpop.permute.xlu1 %2407 }
0x198a   :  { %v2413_v45 = vsel %vm364_vm2, %v2408_v40, 0 }
0x198d   :  { %v2458_v43 = vpop.permute.xlu1 %2457 }
0x198e   :  { %v3758_v28 = vpop.eup %3757  ;;  %v2463_v46 = vsel %vm364_vm2, %v2458_v43, 0 }
0x198f   :  { %v2287_v29 = vsel %vm364_vm2, %v3758_v28, 0.0 }
0x1990   :  { %v3760_v30 = vpop.eup %3759  ;;  %2288 = vadd.xlane.f32.xlu0 %v2287_v29 }
0x1991   :  { %v2290_v31 = vsel %vm364_vm2, %v3760_v30, 0.0  ;;  %v2456_v48 = vpop.permute.xlu1 %2455 }
0x1994   :  { %2291 = vadd.xlane.f32.xlu0 %v2290_v31 }
0x19aa   :  { %2299 = vrot.lane.b32.xlu0 %v4711_v8, %s4139_s24 }
0x19ae   :  { %2405 = vrot.lane.b32.xlu0 %v4711_v8, %s4141_s2 }
0x1a1d   :  { %v2289_v35 = vpop.xlane.xlu0 %2288 }
0x1a1e   :  { %3761 = vrcp.f32 %v2289_v35 }
0x1a21   :  { %v2292_v36 = vpop.xlane.xlu0 %2291 }
0x1a22   :  { %3763 = vrcp.f32 %v2292_v36 }
0x1a25   :  { %v2300_v37 = vpop.permute.xlu0 %2299 }
0x1a26   :  { %v2305_v38 = vsel %vm505_vm3, %v2300_v37, 0 }
0x1a27   :  { %3558 = vmatpush3.bf16.msra.mxu0 %v2305_v38  ;;  %v3681_v38 = vld [vmem:[%s4979_s6 + $0x10] sm:$0xff]  }
0x1a28   :  { %v3762_v39 = vpop.eup %3761  ;;  %3569 = vmatprep.subr.bf16.mxu0 %v4130_v15 }
0x1a29   :  { %v2295_v42 = vmul.f32 %v3762_v39, %v3758_v28  ;;  %v2406_v47 = vpop.permute.xlu0 %2405  ;;  %v3682_v39 = vld [vmem:[%s4979_s6 + $0x18] sm:$0xff]  }
0x1a2b   :  { %v2297_v33 = vpack.c.bf16 %v2295_v42, %v2295_v42 }
0x1a2c   :  { %v3764_v34 = vpop.eup %3763 }
0x1a2d   :  { %v2296_v50 = vmul.f32 %v3764_v34, %v3760_v30  ;;  %3560 = vmatmul.mubr.msk.bf16.vlgmr.msra.gmra.mrb[64].mxu0 %vm364_vm2, %v2297_v33 }
0x1a2e   :  { %3571 = vmatprep.mubr.msk.bf16.mxu0 %vm4131_vm1, %v4130_v15 }
0x1a2f   :  { %v2298_v55 = vpack.c.bf16 %v2296_v50, %v2296_v50 }
0x1a30   :  { %3570 = vmatpush3.bf16.xpose.msra.mxu0 %v2413_v45 }
0x1a31   :  { %3566 = vmatmul.mubr.msk.bf16.vlgmr.msra.gmra.mrb[60].mxu1 %vm364_vm2, %v2298_v55  ;;  %3581 = vmatprep.subr.bf16.mxu0 %v4130_v15 }
0x1a32   :  { %3576 = vmatpush3.bf16.xpose.msra.mxu1 %v2463_v46  ;;  %3577 = vmatprep.mubr.msk.bf16.mxu1 %vm4131_vm1, %v4130_v15 }
0x1a33   :  { %3587 = vmatprep.subr.bf16.mxu1 %v4130_v15 }
0x1a37   :  { %3572 = vmatmul.mubr.msk.bf16.vlgmr.msra.gmra.mrb[68].mxu0 %vm364_vm2, %v2406_v47 }
0x1a38   :  { %3583 = vmatprep.mubr.msk.bf16.mxu0 %vm4131_vm1, %v4130_v15 }
0x1a39   :  { %3578 = vmatmul.mubr.msk.bf16.vlgmr.msra.gmra.mrb[64].mxu1 %vm364_vm2, %v2456_v48 }
0x1a3a   :  { %3589 = vmatprep.mubr.msk.bf16.mxu1 %vm4131_vm1, %v4130_v15 }
0x1b00   :  { %v2341_v49 = vpop.f32.mrb[64].mxu0 }
0x1b01   :  { %v3561_v44 = vpop.f32.mrb[65].mxu0 }
0x1b02   :  { %v2344_v23 = vpop.f32.mrb[66].mxu0 }
0x1b03   :  { %v3562_v27 = vpop.f32.mrb[67].mxu0  ;;  %v3221_v23 = vld [vmem:[#allocation13 + $0x1] ss:$0 sm:$0xff] }
0x1b04   :  { %v2389_v51 = vpop.f32.mrb[60].mxu1 }
0x1b05   :  { %v3567_v52 = vpop.f32.mrb[61].mxu1 }
0x1b06   :  { %v2392_v53 = vpop.f32.mrb[62].mxu1 }
0x1b07   :  { %v3568_v56 = vpop.f32.mrb[63].mxu1 }
0x1b0a   :  { %v2449_v57 = vpop.f32.mrb[68].mxu0 }
0x1b0b   :  { %v2505_v58 = vmul.f32 0.35355338, %v2449_v57  ;;  %v3573_v60 = vpop.f32.mrb[69].mxu0 }
0x1b0c   :  { %v2452_v61 = vpop.f32.mrb[70].mxu0  ;;  %v2499_v62 = vpop.f32.mrb[64].mxu1 }
0x1b0d   :  { %v2506_v63 = vmul.f32 0.35355338, %v2499_v62  ;;  %v3574_v0 = vpop.f32.mrb[71].mxu0  ;;  %v3579_v2 = vpop.f32.mrb[65].mxu1  ;;  %v2507_v3 = vadd.f32 %v4731_v26, %v2505_v58 }
0x1b0e   :  { %v2502_v4 = vpop.f32.mrb[66].mxu1 }
0x1b0f   :  { %v3580_v5 = vpop.f32.mrb[67].mxu1  ;;  %v2509_v6 = vsel %vm364_vm2, %v2507_v3, -inf  ;;  %v2508_v7 = vadd.f32 %v4735_v32, %v2506_v63 }
0x1b10   :  { %2510 = vmax.xlane.f32.xlu0 %v2509_v6 }
0x1b11   :  { %v2512_v9 = vsel %vm364_vm2, %v2508_v7, -inf }
0x1b12   :  { %2513 = vmax.xlane.f32.xlu1 %v2512_v9 }
0x1b23   :  { %2581 = vrot.lane.b32.xlu1 %v4713_v11, %s4142_s20 }
0x1b27   :  { %2163 = vrot.lane.b32.xlu1 %v4813_v54, %s4123_s19 }
0x1b2b   :  { %2165 = vrot.lane.b32.xlu1 %v4815_v59, %s4123_s19 }
0x1b2f   :  { %2399 = vrot.lane.b32.xlu1 %v2389_v51, %s4114_s29 }
0x1b9d   :  { %v2511_v26 = vpop.xlane.xlu0 %2510 }
0x1b9e   :  { %v2515_v10 = vsub.f32 %v2507_v3, %v2511_v26  ;;  %v3684_v26 = vld [vmem:[%s4983_s10 + $0x18] sm:$0xff]  }
0x1b9f   :  { %v2514_v12 = vpop.xlane.xlu1 %2513 }
0x1ba0   :  { %v2517_v13 = vmul.f32 1.442695, %v2515_v10  ;;  %v2516_v32 = vsub.f32 %v2508_v7, %v2514_v12 }
0x1ba2   :  { %3765 = vpow2.f32 %v2517_v13  ;;  %v2519_v14 = vmul.f32 1.442695, %v2516_v32 }
0x1ba3   :  { %v2582_v16 = vpop.permute.xlu1 %2581 }
0x1ba4   :  { %3767 = vpow2.f32 %v2519_v14  ;;  %v2587_v17 = vsel %vm505_vm3, %v2582_v16, 0 }
0x1ba5   :  { %3588 = vmatpush3.bf16.msra.mxu1 %v2587_v17 }
0x1ba6   :  { %3601 = vmatprep.subr.bf16.mxu1 %v4130_v15 }
0x1ba7   :  { %v2164_v11 = vpop.permute.xlu1 %2163 }
0x1ba8   :  { %2169 = vst.msk [vmem:[#allocation3] sm:$0xff] %vm831_vm4, %v2164_v11 }
0x1bab   :  { %v2166_v54 = vpop.permute.xlu1 %2165 }
0x1bac   :  { %v3766_v59 = vpop.eup %3765  ;;  %2170 = vst.msk [vmem:[#allocation3 + $0x8] sm:$0xff] %vm831_vm4, %v2166_v54  ;;  %v3225_v54 = vld [vmem:[#allocation15 + $0x1] ss:$0 sm:$0xff] }
0x1bad   :  { %v2521_v18 = vsel %vm364_vm2, %v3766_v59, 0.0 }
0x1bae   :  { %v3768_v19 = vpop.eup %3767  ;;  %2522 = vadd.xlane.f32.xlu0 %v2521_v18 }
0x1baf   :  { %v2400_v20 = vpop.permute.xlu1 %2399  ;;  %v2524_v21 = vsel %vm364_vm2, %v3768_v19, 0.0 }
0x1bb0   :  { %2404 = vst.msk [vmem:[#allocation3 + $0x8] sm:$0xff] %vm1066_vm5, %v2400_v20  ;;  %v3226_v20 = vld [vmem:[#allocation16 + $0x1] ss:$0 sm:$0xff] }
0x1bb2   :  { %2525 = vadd.xlane.f32.xlu0 %v2524_v21 }
0x1bc8   :  { %2533 = vrot.lane.b32.xlu0 %v4711_v8, %s4142_s20 }
0x1bcc   :  { %2397 = vrot.lane.b32.xlu0 %v2341_v49, %s4114_s29 }
0x1c3b   :  { %v2523_v22 = vpop.xlane.xlu0 %2522 }
0x1c3c   :  { %3769 = vrcp.f32 %v2523_v22 }
0x1c3f   :  { %v2526_v24 = vpop.xlane.xlu0 %2525 }
0x1c40   :  { %3771 = vrcp.f32 %v2526_v24 }
0x1c43   :  { %v2534_v25 = vpop.permute.xlu0 %2533 }
0x1c44   :  { %v2539_v28 = vsel %vm505_vm3, %v2534_v25, 0 }
0x1c45   :  { %3582 = vmatpush3.bf16.msra.mxu0 %v2539_v28  ;;  %v3685_v28 = vld [vmem:[%s4985_s12 + $0x20] sm:$0xff]  }
0x1c46   :  { %v3770_v29 = vpop.eup %3769  ;;  %3593 = vmatprep.subr.bf16.mxu0 %v4130_v15 }
0x1c47   :  { %v2529_v30 = vmul.f32 %v3770_v29, %v3766_v59  ;;  %v2398_v31 = vpop.permute.xlu0 %2397  ;;  %v3686_v29 = vld [vmem:[%s4985_s12 + $0x28] sm:$0xff]  }
0x1c48   :  { %2403 = vst.msk [vmem:[#allocation3] sm:$0xff] %vm1066_vm5, %v2398_v31  ;;  %v3688_v31 = vld [vmem:[%s4985_s12 + $0x38] sm:$0xff]  }
0x1c49   :  { %v2531_v35 = vpack.c.bf16 %v2529_v30, %v2529_v30  ;;  %v3687_v30 = vld [vmem:[%s4985_s12 + $0x30] sm:$0xff]  }
0x1c4a   :  { %v3772_v36 = vpop.eup %3771 }
0x1c4b   :  { %v2530_v8 = vmul.f32 %v3772_v36, %v3768_v19  ;;  %3584 = vmatmul.mubr.msk.bf16.vlgmr.msra.gmra.mrb[72].mxu0 %vm364_vm2, %v2531_v35  ;;  %v3231_v35 = vld [vmem:[#allocation18 + $0x1] ss:$0 sm:$0xff] }
0x1c4c   :  { %3597 = vmatprep.mubr.msk.bf16.mxu0 %vm4131_vm1, %v4130_v15  ;;  %3594 = vmatpush3.bf16.msra.mxu0 %v3681_v38 }
0x1c4d   :  { %v2532_v37 = vpack.c.bf16 %v2530_v8, %v2530_v8  ;;  %3595 = vmatprep.subr.bf16.mxu0 %v4130_v15 }
0x1c4f   :  { %3590 = vmatmul.mubr.msk.bf16.vlgmr.msra.gmra.mrb[68].mxu1 %vm364_vm2, %v2532_v37 }
0x1c50   :  { %3605 = vmatprep.mubr.msk.bf16.mxu1 %vm4131_vm1, %v4130_v15  ;;  %3596 = vmatpush3.bf16.msra.mxu0 %v3682_v39 }
0x1c51   :  { %3609 = vmatprep.subr.bf16.mxu0 %v4130_v15 }
0x1d1e   :  { %v2575_v40 = vpop.f32.mrb[72].mxu0 }
0x1d1f   :  { %2631 = vrot.lane.b32.xlu0 %v2575_v40, %s4143_s8  ;;  %v3585_v42 = vpop.f32.mrb[73].mxu0 }
0x1d20   :  { %v2578_v33 = vpop.f32.mrb[74].mxu0 }
0x1d21   :  { %v3586_v34 = vpop.f32.mrb[75].mxu0 }
0x1d22   :  { %v2623_v50 = vpop.f32.mrb[68].mxu1 }
0x1d23   :  { %2633 = vrot.lane.b32.xlu1 %v2623_v50, %s4143_s8  ;;  %v3591_v43 = vpop.f32.mrb[69].mxu1 }
0x1d24   :  { %v2626_v45 = vpop.f32.mrb[70].mxu1 }
0x1d25   :  { %v3592_v55 = vpop.f32.mrb[71].mxu1 }
0x1d91   :  { %v2632_v46 = vpop.permute.xlu0 %2631 }
0x1d92   :  { %2637 = vst.msk [vmem:[#allocation3] sm:$0xff] %vm1301_vm6, %v2632_v46 }
0x1d95   :  { %v2634_v47 = vpop.permute.xlu1 %2633 }
0x1d96   :  { %2638 = vst.msk [vmem:[#allocation3 + $0x8] sm:$0xff] %vm1301_vm6, %v2634_v47 }
0x1d99   :  { %v2639_v48 = vld [vmem:[#allocation3] sm:$0xff] }
0x1d9d   :  { %v2640_v49 = vld [vmem:[#allocation3 + $0x8] sm:$0xff] }
0x1d9e   :  { %v2648_v44 = vpack.c.bf16 %v2640_v49, %v2639_v48 }
0x1da0   :  { %3598 = vmatmul.mubr.msk.bf16.vlgmr.msra.gmra.mrb[76].mxu0 %vm241_vm0, %v2648_v44 }
0x1da1   :  { %3617 = vmatprep.mubr.msk.bf16.mxu0 %vm4131_vm1, %v4130_v15  ;;  %3610 = vmatpush3.bf16.msra.mxu0 %v3685_v28  ;;  %v3250_v28 = vld [vmem:[#allocation22 + $0x1] ss:$0 sm:$0xff] }
0x1da2   :  { %3611 = vmatprep.subr.bf16.mxu0 %v4130_v15 }
0x1da5   :  { %3612 = vmatpush3.bf16.msra.mxu0 %v3686_v29 }
0x1da6   :  { %3613 = vmatprep.subr.bf16.mxu0 %v4130_v15 }
0x1da9   :  { %3614 = vmatpush3.bf16.msra.mxu0 %v3687_v30 }
0x1daa   :  { %3615 = vmatprep.subr.bf16.mxu0 %v4130_v15 }
0x1dad   :  { %3616 = vmatpush3.bf16.msra.mxu0 %v3688_v31 }
0x1e73   :  { %v2704_v27 = vpop.f32.mrb[76].mxu0 }
0x1e74   :  { %v2705_v51 = vadd.f32 %v3221_v23, %v2704_v27  ;;  %v3599_v52 = vpop.f32.mrb[77].mxu0 }
0x1e75   :  { %v2707_v53 = vpop.f32.mrb[78].mxu0 }
0x1e76   :  { %v2711_v56 = vadd.f32 %v2705_v51, %v4702_v41  ;;  %v2708_v57 = vadd.f32 %v3221_v23, %v2707_v53  ;;  %v3600_v58 = vpop.f32.mrb[79].mxu0 }
0x1e77   :  { %v3243_v58 = vld [vmem:[#allocation19 + $0x1] ss:$0 sm:$0xff] }
0x1e78   :  { %v2712_v60 = vadd.f32 %v2708_v57, %v4704_v1  ;;  %v2717_v61 = vsel %vm241_vm0, %v2711_v56, 0.0  ;;  %v3683_v1 = vld [vmem:[%s4983_s10 + $0x10] sm:$0xff]  }
0x1e79   :  { %2718 = vadd.xlane.f32.xlu0 %v2717_v61  ;;  %3602 = vmatpush3.bf16.msra.mxu1 %v3683_v1 }
0x1e7a   :  { %v2720_v62 = vsel %vm241_vm0, %v2712_v60, 0.0  ;;  %3603 = vmatprep.subr.bf16.mxu1 %v4130_v15 }
0x1e7b   :  { %2721 = vadd.xlane.f32.xlu1 %v2720_v62 }
0x1e7d   :  { %3604 = vmatpush3.bf16.msra.mxu1 %v3684_v26 }
0x1e7e   :  { %3621 = vmatprep.subr.bf16.mxu1 %v4130_v15 }
0x1f06   :  { %v2719_v63 = vpop.xlane.xlu0 %2718 }
0x1f07   :  { %v2723_v0 = vmul.f32 0.03125, %v2719_v63 }
0x1f08   :  { %v2722_v2 = vpop.xlane.xlu1 %2721 }
0x1f09   :  { %v2725_v3 = vsub.f32 %v2711_v56, %v2723_v0  ;;  %v2724_v4 = vmul.f32 0.03125, %v2722_v2 }
0x1f0b   :  { %v2726_v5 = vsub.f32 %v2712_v60, %v2724_v4  ;;  %v2727_v6 = vmul.f32 %v2725_v3, %v2725_v3 }
0x1f0d   :  { %v2729_v7 = vsel %vm241_vm0, %v2727_v6, 0.0  ;;  %v2728_v41 = vmul.f32 %v2726_v5, %v2726_v5 }
0x1f0e   :  { %2730 = vadd.xlane.f32.xlu0 %v2729_v7 }
0x1f0f   :  { %v2732_v9 = vsel %vm241_vm0, %v2728_v41, 0.0 }
0x1f12   :  { %2733 = vadd.xlane.f32.xlu0 %v2732_v9 }
0x1f9b   :  { %v2731_v10 = vpop.xlane.xlu0 %2730 }
0x1f9c   :  { %v2735_v12 = vmul.f32 0.03125, %v2731_v10 }
0x1f9e   :  { %v2737_v13 = vadd.f32 1e-12, %v2735_v12 }
0x1f9f   :  { %v2734_v32 = vpop.xlane.xlu0 %2733 }
0x1fa0   :  { %3773 = vrsqrt.f32 %v2737_v13  ;;  %v2736_v14 = vmul.f32 0.03125, %v2734_v32 }
0x1fa2   :  { %v2738_v16 = vadd.f32 1e-12, %v2736_v14 }
0x1fa4   :  { %3775 = vrsqrt.f32 %v2738_v16  ;;  %v3689_v16 = vld [vmem:[%s4989_s16] sm:$0xff]  }
0x1faa   :  { %v3774_v17 = vpop.eup %3773 }
0x1fab   :  { %v2741_v11 = vmul.f32 %v3774_v17, %v2725_v3  ;;  %v3690_v17 = vld [vmem:[%s4989_s16 + $0x8] sm:$0xff]  }
0x1fad   :  { %v2749_v18 = vmul.f32 %v3225_v54, %v2741_v11 }
0x1fae   :  { %v3776_v59 = vpop.eup %3775 }
0x1faf   :  { %v2742_v19 = vmul.f32 %v3776_v59, %v2726_v5  ;;  %v2757_v22 = vadd.f32 %v3226_v20, %v2749_v18 }
0x1fb1   :  { %v2750_v21 = vmul.f32 %v3225_v54, %v2742_v19 }
0x1fb3   :  { %v2758_v24 = vadd.f32 %v3226_v20, %v2750_v21 }
0x1fb5   :  { %v2766_v25 = vpack.c.bf16 %v2758_v24, %v2757_v22 }
0x1fb7   :  { %3606 = vmatmul.mubr.msk.bf16.vlgmr.msra.gmra.mrb[72].mxu1 %vm241_vm0, %v2766_v25 }
0x1fb8   :  { %3625 = vmatprep.mubr.msk.bf16.mxu1 %vm4131_vm1, %v4130_v15  ;;  %3622 = vmatpush3.bf16.msra.mxu1 %v3689_v16 }
0x1fb9   :  { %3623 = vmatprep.subr.bf16.mxu1 %v4130_v15 }
0x1fbc   :  { %3624 = vmatpush3.bf16.msra.mxu1 %v3690_v17 }
0x1fbd   :  { %3629 = vmatprep.subr.bf16.mxu1 %v4130_v15 }
0x208a   :  { %v2822_v36 = vpop.f32.mrb[72].mxu1 }
0x208b   :  { %v2823_v8 = vadd.f32 %v3231_v35, %v2822_v36  ;;  %v3607_v37 = vpop.f32.mrb[73].mxu1 }
0x208c   :  { %v2825_v38 = vpop.f32.mrb[74].mxu1 }
0x208d   :  { %v2831_v39 = vmul.f32 0.044715, %v2823_v8  ;;  %v2826_v40 = vadd.f32 %v3231_v35, %v2825_v38  ;;  %v3608_v42 = vpop.f32.mrb[75].mxu1  ;;  %v2829_v27 = vmul.f32 0.5, %v2823_v8 }
0x208f   :  { %v2833_v33 = vmul.f32 %v2831_v39, %v2823_v8  ;;  %v2832_v34 = vmul.f32 0.044715, %v2826_v40  ;;  %v2830_v51 = vmul.f32 0.5, %v2826_v40 }
0x2091   :  { %v2835_v50 = vmul.f32 %v2833_v33, %v2823_v8  ;;  %v2834_v43 = vmul.f32 %v2832_v34, %v2826_v40 }
0x2093   :  { %v2837_v45 = vadd.f32 %v2835_v50, %v2823_v8  ;;  %v2836_v55 = vmul.f32 %v2834_v43, %v2826_v40  ;;  %v3691_v43 = vld [vmem:[%s5014_s15] sm:$0xff]  }
0x2095   :  { %v2839_v46 = vmul.f32 0.7978846, %v2837_v45  ;;  %v2838_v47 = vadd.f32 %v2836_v55, %v2826_v40  ;;  %v3692_v45 = vld [vmem:[%s5014_s15 + $0x8] sm:$0xff]   ;;  %v3251_v55 = vld [vmem:[#allocation24] ss:$0 sm:$0xff] }
0x2097   :  { %3777 = vtanh.f32 %v2839_v46  ;;  %v2840_v48 = vmul.f32 0.7978846, %v2838_v47 }
0x2099   :  { %3779 = vtanh.f32 %v2840_v48 }
0x20a1   :  { %v3778_v49 = vpop.eup %3777 }
0x20a2   :  { %v2843_v44 = vadd.f32 1.0, %v3778_v49 }
0x20a3   :  { %v3780_v23 = vpop.eup %3779 }
0x20a4   :  { %v2844_v52 = vadd.f32 1.0, %v3780_v23  ;;  %v2845_v53 = vmul.f32 %v2843_v44, %v2829_v27 }
0x20a6   :  { %v2846_v56 = vmul.f32 %v2844_v52, %v2830_v51 }
0x20a8   :  { %v2858_v57 = vpack.c.bf16 %v2846_v56, %v2845_v53 }
0x20aa   :  { %3618 = vmatmul.mubr.msk.bf16.vlgmr.msra.gmra.mrb[80].mxu0 %vm1546_vm7, %v2858_v57 }
0x217d   :  { %v2926_v60 = vpop.f32.mrb[80].mxu0 }
0x217e   :  { %v2927_v61 = vadd.f32 %v3243_v58, %v2926_v60  ;;  %v3619_v62 = vpop.f32.mrb[81].mxu0 }
0x217f   :  { %v2929_v63 = vpop.f32.mrb[82].mxu0 }
0x2180   :  { %v2933_v0 = vadd.f32 %v2927_v61, %v2757_v22  ;;  %v2930_v2 = vadd.f32 %v3243_v58, %v2929_v63  ;;  %v3620_v3 = vpop.f32.mrb[83].mxu0  ;;  %v3249_v22 = vld [vmem:[#allocation21 + $0x1] ss:$0 sm:$0xff] }
0x2182   :  { %v2934_v4 = vadd.f32 %v2930_v2, %v2758_v24  ;;  %v2939_v5 = vsel %vm241_vm0, %v2933_v0, 0.0 }
0x2183   :  { %2940 = vadd.xlane.f32.xlu1 %v2939_v5 }
0x2184   :  { %v2942_v6 = vsel %vm241_vm0, %v2934_v4, 0.0 }
0x2185   :  { %2943 = vadd.xlane.f32.xlu0 %v2942_v6 }
0x2210   :  { %v2941_v7 = vpop.xlane.xlu1 %2940 }
0x2211   :  { %v2945_v41 = vmul.f32 0.03125, %v2941_v7 }
0x2212   :  { %v2944_v9 = vpop.xlane.xlu0 %2943 }
0x2213   :  { %v2947_v1 = vsub.f32 %v2933_v0, %v2945_v41  ;;  %v2946_v26 = vmul.f32 0.03125, %v2944_v9 }
0x2215   :  { %v2948_v10 = vsub.f32 %v2934_v4, %v2946_v26  ;;  %v2949_v12 = vmul.f32 %v2947_v1, %v2947_v1 }
0x2217   :  { %v2951_v13 = vsel %vm241_vm0, %v2949_v12, 0.0  ;;  %v2950_v32 = vmul.f32 %v2948_v10, %v2948_v10 }
0x2218   :  { %2952 = vadd.xlane.f32.xlu1 %v2951_v13 }
0x2219   :  { %v2954_v14 = vsel %vm241_vm0, %v2950_v32, 0.0 }
0x221a   :  { %2955 = vadd.xlane.f32.xlu0 %v2954_v14 }
0x22a5   :  { %v2953_v11 = vpop.xlane.xlu1 %2952 }
0x22a6   :  { %v2957_v54 = vmul.f32 0.03125, %v2953_v11 }
0x22a7   :  { %v2956_v59 = vpop.xlane.xlu0 %2955 }
0x22a8   :  { %v2959_v18 = vadd.f32 1e-12, %v2957_v54  ;;  %v2958_v19 = vmul.f32 0.03125, %v2956_v59 }
0x22aa   :  { %3781 = vrsqrt.f32 %v2959_v18  ;;  %v2960_v20 = vadd.f32 1e-12, %v2958_v19 }
0x22ac   :  { %3783 = vrsqrt.f32 %v2960_v20 }
0x22b4   :  { %v3782_v21 = vpop.eup %3781 }
0x22b5   :  { %v2963_v24 = vmul.f32 %v3782_v21, %v2947_v1 }
0x22b6   :  { %v3784_v25 = vpop.eup %3783 }
0x22b7   :  { %v2971_v29 = vmul.f32 %v3249_v22, %v2963_v24  ;;  %v2964_v30 = vmul.f32 %v3784_v25, %v2948_v10 }
0x22b9   :  { %v2979_v31 = vadd.f32 %v3250_v28, %v2971_v29  ;;  %v2972_v35 = vmul.f32 %v3249_v22, %v2964_v30 }
0x22bb   :  { %2981 = vst.msk [vmem:[#allocation2] sm:$0xff] %vm241_vm0, %v2979_v31  ;;  %v2980_v36 = vadd.f32 %v3250_v28, %v2972_v35 }
0x22bd   :  { %2982 = vst.msk [vmem:[#allocation2 + $0x8] sm:$0xff] %vm241_vm0, %v2980_v36 }
0x22c2   :  { %v2983_v8 = vld [vmem:[#allocation2] sm:$0xff] }
0x22c3   :  { %v2990_v38 = vpack.c.bf16 %v2983_v8, %v2983_v8 }
0x22c4   :  { %v2984_v37 = vld [vmem:[#allocation2 + $0x8] sm:$0xff] }
0x22c5   :  { %v2991_v39 = vpack.c.bf16 %v2984_v37, %v2984_v37  ;;  %v3000_v42 = vunpack.c.l.b16 %v2990_v38 }
0x22c7   :  { %v3001_v40 = vunpack.c.l.b16 %v2991_v39 }
0x22c9   :  { %v3002_v33 = vrot.slane %v3001_v40, 7 }
0x22cb   :  { %v3004_v34 = vsel %vm3003_vm8, %v3002_v33, %v3000_v42 }
0x22cc   :  { %v3005_v50 = vpack.c.b16 %v3004_v34, %v3004_v34 }
0x22ce   :  { %3626 = vmatmul.mubr.msk.bf16.vlgmr.msra.gmra.mrb[76].mxu1 %vm241_vm0, %v3005_v50 }
0x22cf   :  { %3633 = vmatprep.mubr.msk.bf16.mxu1 %vm4131_vm1, %v4130_v15  ;;  %3630 = vmatpush3.bf16.msra.mxu1 %v3691_v43 }
0x22d0   :  { %3631 = vmatprep.subr.bf16.mxu1 %v4130_v15  ;;  %v3255_v15 = vld [vmem:[%s5015_s22] ss:$0 sm:$0xff] }
0x22d3   :  { %3632 = vmatpush3.bf16.msra.mxu1 %v3692_v45 }
0x23a1   :  { %v3055_v46 = vpop.f32.mrb[76].mxu1 }
0x23a2   :  { %v3056_v47 = vadd.f32 %v3251_v55, %v3055_v46  ;;  %v3627_v48 = vpop.f32.mrb[77].mxu1 }
0x23a3   :  { %v3058_v49 = vpop.f32.mrb[78].mxu1 }
0x23a4   :  { %3785 = vtanh.f32 %v3056_v47  ;;  %v3628_v44 = vpop.f32.mrb[79].mxu1 }
0x23ae   :  { %v3786_v23 = vpop.eup %3785 }
0x23af   :  { %v3067_v27 = vpack.c.bf16 %v3786_v23, %v3786_v23 }
0x23b1   :  { %3634 = vmatmul.mubr.msk.bf16.vlgmr.msra.gmra.mrb[80].mxu1 %vm241_vm0, %v3067_v27 }
0x2484   :  { %v3123_v51 = vpop.f32.mrb[80].mxu1 }
0x2485   :  { %v3124_v52 = vadd.f32 %v3255_v15, %v3123_v51  ;;  %v3635_v53 = vpop.f32.mrb[81].mxu1 }
0x2486   :  { %v3126_v56 = vpop.f32.mrb[82].mxu1 }
0x2487   :  { %3129 = vst [vmem:[#allocation25] sm:$0x3] %v3124_v52  ;;  %v3636_v57 = vpop.f32.mrb[83].mxu1 }
0x2488   :  { %4086 = shalt.err (!%p4083_p10)
}
0x2489   :  { %s5016_s7 = sld [smem:[#allocation41_spill]] }
0x248f   :  { %s4087_s26 = scalar_lea.hbm %s5016_s7, 32 }
0x2490   :  { %p4088_p11 = scmp.ne.s32.totalorder %s5016_s7, %s4087_s26  ;;  %p4091_p12 = scmp.lt.u32.totalorder %s4087_s26, %s5016_s7 }
0x2492   :  { %p4093_p13 = pnand %p4091_p12, %p4088_p11 }
0x2494   :  { %4096 = shalt.err (!%p4093_p13)
}
0x2495   :  { %3139 = dma.vmem_to_hbm [thread:$0]  %s3137_s14, 32, %s5016_s7, [#allocation6]  }
0x2496   :  { %4111 = dma.done.wait [#allocation6], 32  }
0x2497   :  { %4112 = vsyncadd [#allocation6], 4294967264 }
0x2498   :  { %3143 = vsyncpa [#allocation5], 1 }
0x2499   :  { %3144 = vsyncpa [#allocation8], 1 }
0x249a   :  { %3145 = vsyncpa [#allocation11], 1 }
0x249b   :  { %3146 = vsyncpa [#allocation14], 1 }
0x249c   :  { %3147 = vsyncpa [#allocation17], 1 }
0x249d   :  { %3148 = vsyncpa [#allocation20], 1 }
0x249e   :  { %3149 = vsyncpa [#allocation23], 1 }
0x249f   :  { %3150 = vsyncpa [#allocation6], 1 }

</bundles_post_ra>
